<compile_context>
chip_gen: v7x
topology: tpu7x:2x2x1
jax: 0.10.0
libtpu: 0.0.40
codegen_flags: <defaults>
</compile_context>

<pallas_src>
import functools
import math

import jax
import jax.numpy as jnp
from jax.experimental import pallas as pl
from jax.experimental.pallas import tpu as pltpu


MATMUL_DTYPE = jnp.bfloat16            # MXU input dtype (accumulate in f32)
_INV_SQRT_2PI = 1.0 / math.sqrt(2.0 * math.pi)
_LN3 = math.log(3.0)


def _layernorm(x, gamma, beta, eps=1e-5):
    mu = jnp.mean(x, axis=-1, keepdims=True)
    var = jnp.mean((x - mu) ** 2, axis=-1, keepdims=True)
    return (x - mu) * jax.lax.rsqrt(var + eps) * gamma + beta


def fused_encoder_kernel(n_heads,
                         x_ref, dist_ref,
                         wqkvs_ref, bqkvs_ref,
                         wo3_ref, bo_ref,
                         w1_ref, b1_ref, w2_ref, b2_ref,
                         g1_ref, be1_ref, g2_ref, be2_ref,
                         gf_ref, bf_ref,
                         xo_ref, ser_ref, pri_ref, sig_ref):
    """All encoder layers + final LayerNorm for one batch element (grid axis)."""
    _, L, D = x_ref.shape
    NL = wqkvs_ref.shape[0]
    H = n_heads
    E = D // H
    scale = 1.0 / math.sqrt(E)

    dist = dist_ref[...]                      # (L, L)
    neg_d2 = -(dist * dist)                   # computed once, reused every layer

    x = x_ref[0]                              # (L, D) f32

    # TODO(synk): for large layer counts switch this static unroll to
    # lax.fori_loop (or a layer grid axis) to bound register pressure.
    for l in range(NL):
        x_mm = x.astype(MATMUL_DTYPE)

        # ---- fused q|k|v|sigma projection: ONE lane-padded MXU matmul -------
        qkvs = jnp.dot(x_mm, wqkvs_ref[l],
                       preferred_element_type=jnp.float32) + bqkvs_ref[l]
        q = qkvs[:, 0:D]
        k = qkvs[:, D:2 * D]
        v = qkvs[:, 2 * D:3 * D]
        sig = qkvs[:, 3 * D:3 * D + H]        # (L, H)

        # ---- sigma transform + Gaussian prior, vectorized over heads --------
        # Build (H, L, 1) head-major sigma from safe (L, 1) column slices.
        sigma3 = jnp.stack([sig[:, h:h + 1] for h in range(H)], axis=0)  # (H,L,1)
        sigma3 = jax.nn.sigmoid(sigma3 * 5.0) + 1e-5
        sigma3 = jnp.exp(sigma3 * _LN3) - 1.0          # 3**sigma - 1
        sig_ref[0, l] = sigma3                          # compact; caller broadcasts

        inv_sigma = 1.0 / sigma3                        # exact (parity with ref)
        coef = inv_sigma * _INV_SQRT_2PI                # 1 / (sqrt(2*pi) * sigma)
        inv2s2 = 0.5 * inv_sigma * inv_sigma            # 1 / (2 * sigma**2)
        pri_ref[0, l] = coef * jnp.exp(neg_d2[None, :, :] * inv2s2)   # (H, L, L)

        # ---- multi-head attention: heads batched into single dot_generals ---
        q3 = jnp.stack([q[:, h * E:(h + 1) * E] for h in range(H)],
                       axis=0).astype(MATMUL_DTYPE)     # (H, L, E)
        k3 = jnp.stack([k[:, h * E:(h + 1) * E] for h in range(H)],
                       axis=0).astype(MATMUL_DTYPE)
        v3 = jnp.stack([v[:, h * E:(h + 1) * E] for h in range(H)],
                       axis=0).astype(MATMUL_DTYPE)

        s = jax.lax.dot_general(q3, k3, (((2,), (2,)), ((0,), (0,))),
                                preferred_element_type=jnp.float32) * scale
        s_max = jnp.max(s, axis=-1, keepdims=True)
        p = jnp.exp(s - s_max)
        series = p / jnp.sum(p, axis=-1, keepdims=True)  # (H, L, L), exact softmax
        ser_ref[0, l] = series

        out_h = jax.lax.dot_general(series.astype(MATMUL_DTYPE), v3,
                                    (((2,), (1,)), ((0,), (0,))),
                                    preferred_element_type=jnp.float32)  # (H,L,E)

        # ---- output projection: accumulate per-head (L,E)@(E,D) — no slab ---
        new_x = jnp.dot(out_h[0].astype(MATMUL_DTYPE), wo3_ref[l, 0],
                        preferred_element_type=jnp.float32)
        for h in range(1, H):
            new_x = new_x + jnp.dot(out_h[h].astype(MATMUL_DTYPE), wo3_ref[l, h],
                                    preferred_element_type=jnp.float32)
        new_x = new_x + bo_ref[l]

        # ---- residual + norm1 + FFN (1x1 Conv1d pair) + norm2 ----------------
        xn = _layernorm(x + new_x, g1_ref[l], be1_ref[l])
        y = jnp.maximum(jnp.dot(xn.astype(MATMUL_DTYPE), w1_ref[l],
                                preferred_element_type=jnp.float32) + b1_ref[l],
                        0.0)
        y = jnp.dot(y.astype(MATMUL_DTYPE), w2_ref[l],
                    preferred_element_type=jnp.float32) + b2_ref[l]
        x = _layernorm(xn + y, g2_ref[l], be2_ref[l])

    # ---- final Encoder LayerNorm (fused) --------------------------------------
    xo_ref[0] = _layernorm(x, gf_ref[...], bf_ref[...])


def encoder_forward(x, layer_params, final_gamma, final_beta, dist, n_heads):
    """x: (B, L, D). Returns (x_out, series_list, prior_list, sigma_list)."""
    B, L, D = x.shape
    H = n_heads
    E = D // H
    NL = len(layer_params)
    F = layer_params[0]["w1"].shape[1]

    def stack(key):
        return jnp.stack([p[key] for p in layer_params], axis=0)

    # ---- fused q|k|v|sigma projection weights, lane-padded to 128, bf16 ------
    P = 3 * D + H
    P_pad = ((P + 127) // 128) * 128
    wqkvs = jnp.concatenate([stack("wq"), stack("wk"), stack("wv"), stack("wsig")],
                            axis=-1)                                  # (NL, D, P)
    wqkvs = jnp.pad(wqkvs, ((0, 0), (0, 0), (0, P_pad - P))).astype(jnp.bfloat16)
    bqkvs = jnp.concatenate([stack("bq"), stack("bk"), stack("bv"), stack("bsig")],
                            axis=-1)                                  # (NL, 1, P)
    bqkvs = jnp.pad(bqkvs, ((0, 0), (0, 0), (0, P_pad - P)))          # f32

    # Head-major output projection (NL, H, E, D), bf16; FFN weights bf16.
    wo3 = stack("wo").reshape(NL, H, E, D).astype(jnp.bfloat16)
    bo = stack("bo")
    w1 = stack("w1").astype(jnp.bfloat16)
    b1 = stack("b1")
    w2 = stack("w2").astype(jnp.bfloat16)
    b2 = stack("b2")
    g1, be1, g2, be2 = stack("g1"), stack("be1"), stack("g2"), stack("be2")

    out_shape = (
        jax.ShapeDtypeStruct((B, L, D), jnp.float32),             # x out
        jax.ShapeDtypeStruct((B, NL, H, L, L), jnp.float32),      # series
        jax.ShapeDtypeStruct((B, NL, H, L, L), jnp.float32),      # prior
        jax.ShapeDtypeStruct((B, NL, H, L, 1), jnp.float32),      # sigma (compact)
    )

    const3 = lambda b: (0, 0, 0)
    in_specs = [
        pl.BlockSpec((1, L, D), lambda b: (b, 0, 0)),             # x
        pl.BlockSpec((L, L), lambda b: (0, 0)),                   # dist
        pl.BlockSpec((NL, D, P_pad), const3),                     # wqkvs
        pl.BlockSpec((NL, 1, P_pad), const3),                     # bqkvs
        pl.BlockSpec((NL, H, E, D), lambda b: (0, 0, 0, 0)),      # wo3
        pl.BlockSpec((NL, 1, D), const3),                         # bo
        pl.BlockSpec((NL, D, F), const3),                         # w1
        pl.BlockSpec((NL, 1, F), const3),                         # b1
        pl.BlockSpec((NL, F, D), const3),                         # w2
        pl.BlockSpec((NL, 1, D), const3),                         # b2
        pl.BlockSpec((NL, 1, D), const3),                         # g1
        pl.BlockSpec((NL, 1, D), const3),                         # be1
        pl.BlockSpec((NL, 1, D), const3),                         # g2
        pl.BlockSpec((NL, 1, D), const3),                         # be2
        pl.BlockSpec((1, D), lambda b: (0, 0)),                   # final gamma
        pl.BlockSpec((1, D), lambda b: (0, 0)),                   # final beta
    ]
    out_specs = (
        pl.BlockSpec((1, L, D), lambda b: (b, 0, 0)),
        pl.BlockSpec((1, NL, H, L, L), lambda b: (b, 0, 0, 0, 0)),
        pl.BlockSpec((1, NL, H, L, L), lambda b: (b, 0, 0, 0, 0)),
        pl.BlockSpec((1, NL, H, L, 1), lambda b: (b, 0, 0, 0, 0)),
    )

    fn = pl.pallas_call(
        functools.partial(fused_encoder_kernel, n_heads),
        out_shape=out_shape,
        grid=(B,),
        in_specs=in_specs,
        out_specs=out_specs,
        compiler_params=pltpu.CompilerParams(
            dimension_semantics=("parallel",),      # use 2nd TC on v7x; no-op v5e/v6e
            vmem_limit_bytes=32 * 1024 * 1024,      # v5e scoped default is 16 MiB
        ),
    )
    xo, ser, pri, sig = fn(x, dist, wqkvs, bqkvs, wo3, bo, w1, b1, w2, b2,
                           g1, be1, g2, be2, final_gamma, final_beta)

    series_list = [ser[:, l] for l in range(NL)]
    prior_list = [pri[:, l] for l in range(NL)]
    # sigma semantics match the reference: (B,L,H)->transpose->(B,H,L)->repeat
    # to (B,H,L,L); the kernel already emits head-major (B,NL,H,L,1).
    sigma_list = [jnp.broadcast_to(sig[:, l], (B, H, L, L)) for l in range(NL)]
    return xo, series_list, prior_list, sigma_list


# ----------------------------- deterministic init ----------------------------

def init_layer_params(key, D, H, F):
    ks = jax.random.split(key, 8)

    def w(k, shape):
        return jax.random.normal(k, shape, dtype=jnp.float32) * 0.05

    z = lambda s: jnp.zeros(s, jnp.float32)
    o = lambda s: jnp.ones(s, jnp.float32)
    return dict(
        wq=w(ks[0], (D, D)), bq=z((1, D)),
        wk=w(ks[1], (D, D)), bk=z((1, D)),
        wv=w(ks[2], (D, D)), bv=z((1, D)),
        wsig=w(ks[3], (D, H)), bsig=z((1, H)),
        wo=w(ks[4], (D, D)), bo=z((1, D)),
        w1=w(ks[5], (D, F)), b1=z((1, F)),
        w2=w(ks[6], (F, D)), b2=z((1, D)),
        g1=o((1, D)), be1=z((1, D)),
        g2=o((1, D)), be2=z((1, D)),
    )


if __name__ == "__main__":
    B, L, D, H, F = 2, 16, 32, 4, 64      # batch, win_size, d_model, n_heads, d_ff
    NUM_LAYERS = 2

    key = jax.random.PRNGKey(0)
    kx, *lkeys = jax.random.split(key, NUM_LAYERS + 1)

    x = jax.random.normal(kx, (B, L, D), dtype=jnp.float32)
    layer_params = [init_layer_params(lk, D, H, F) for lk in lkeys]
    final_gamma = jnp.ones((1, D), jnp.float32)
    final_beta = jnp.zeros((1, D), jnp.float32)

    idx = jnp.arange(L, dtype=jnp.float32)
    dist = jnp.abs(idx[:, None] - idx[None, :])   # AnomalyAttention distance matrix

    x_out, series_list, prior_list, sigma_list = encoder_forward(
        x, layer_params, final_gamma, final_beta, dist, H)

    jax.block_until_ready(x_out)
    for s in series_list + prior_list + sigma_list:
        jax.block_until_ready(s)

    assert x_out.shape == (B, L, D)
    assert series_list[0].shape == (B, H, L, L)
    assert prior_list[0].shape == (B, H, L, L)
    assert sigma_list[0].shape == (B, H, L, L)
    print("KERNEL_OK")
</pallas_src>

<mosaic_0001>
module attributes {stable_mosaic.version = 11 : i64} {
  func.func @fused_encoder_kernel(%arg0: i32, %arg1: memref<1x16x32xf32, #tpu.memory_space<vmem>>, %arg2: memref<16x16xf32, #tpu.memory_space<vmem>>, %arg3: memref<2x32x128xbf16, #tpu.memory_space<vmem>>, %arg4: memref<2x1x128xf32, #tpu.memory_space<vmem>>, %arg5: memref<2x4x8x32xbf16, #tpu.memory_space<vmem>>, %arg6: memref<2x1x32xf32, #tpu.memory_space<vmem>>, %arg7: memref<2x32x64xbf16, #tpu.memory_space<vmem>>, %arg8: memref<2x1x64xf32, #tpu.memory_space<vmem>>, %arg9: memref<2x64x32xbf16, #tpu.memory_space<vmem>>, %arg10: memref<2x1x32xf32, #tpu.memory_space<vmem>>, %arg11: memref<2x1x32xf32, #tpu.memory_space<vmem>>, %arg12: memref<2x1x32xf32, #tpu.memory_space<vmem>>, %arg13: memref<2x1x32xf32, #tpu.memory_space<vmem>>, %arg14: memref<2x1x32xf32, #tpu.memory_space<vmem>>, %arg15: memref<1x32xf32, #tpu.memory_space<vmem>>, %arg16: memref<1x32xf32, #tpu.memory_space<vmem>>, %arg17: memref<1x16x32xf32, #tpu.memory_space<vmem>>, %arg18: memref<1x2x4x16x16xf32, #tpu.memory_space<vmem>>, %arg19: memref<1x2x4x16x16xf32, #tpu.memory_space<vmem>>, %arg20: memref<1x2x4x16x1xf32, #tpu.memory_space<vmem>>) attributes {dimension_semantics = [#tpu.dimension_semantics<parallel>], iteration_bounds = array<i64: 2>, scalar_prefetch = 0 : i64, scratch_operands = 0 : i64, tpu.core_type = #tpu.core_type<tc>, window_params = [{transform_indices = @transform_0, window_bounds = array<i64: 1, 16, 32>}, {pipeline_mode = #tpu.pipeline_mode<synchronous>, transform_indices = @transform_1, window_bounds = array<i64: 16, 16>}, {pipeline_mode = #tpu.pipeline_mode<synchronous>, transform_indices = @transform_2, window_bounds = array<i64: 2, 32, 128>}, {pipeline_mode = #tpu.pipeline_mode<synchronous>, transform_indices = @transform_3, window_bounds = array<i64: 2, 1, 128>}, {pipeline_mode = #tpu.pipeline_mode<synchronous>, transform_indices = @transform_4, window_bounds = array<i64: 2, 4, 8, 32>}, {pipeline_mode = #tpu.pipeline_mode<synchronous>, transform_indices = @transform_5, window_bounds = array<i64: 2, 1, 32>}, {pipeline_mode = #tpu.pipeline_mode<synchronous>, transform_indices = @transform_6, window_bounds = array<i64: 2, 32, 64>}, {pipeline_mode = #tpu.pipeline_mode<synchronous>, transform_indices = @transform_7, window_bounds = array<i64: 2, 1, 64>}, {pipeline_mode = #tpu.pipeline_mode<synchronous>, transform_indices = @transform_8, window_bounds = array<i64: 2, 64, 32>}, {pipeline_mode = #tpu.pipeline_mode<synchronous>, transform_indices = @transform_9, window_bounds = array<i64: 2, 1, 32>}, {pipeline_mode = #tpu.pipeline_mode<synchronous>, transform_indices = @transform_10, window_bounds = array<i64: 2, 1, 32>}, {pipeline_mode = #tpu.pipeline_mode<synchronous>, transform_indices = @transform_11, window_bounds = array<i64: 2, 1, 32>}, {pipeline_mode = #tpu.pipeline_mode<synchronous>, transform_indices = @transform_12, window_bounds = array<i64: 2, 1, 32>}, {pipeline_mode = #tpu.pipeline_mode<synchronous>, transform_indices = @transform_13, window_bounds = array<i64: 2, 1, 32>}, {pipeline_mode = #tpu.pipeline_mode<synchronous>, transform_indices = @transform_14, window_bounds = array<i64: 1, 32>}, {pipeline_mode = #tpu.pipeline_mode<synchronous>, transform_indices = @transform_15, window_bounds = array<i64: 1, 32>}, {transform_indices = @transform_16, window_bounds = array<i64: 1, 16, 32>}, {transform_indices = @transform_17, window_bounds = array<i64: 1, 2, 4, 16, 16>}, {transform_indices = @transform_18, window_bounds = array<i64: 1, 2, 4, 16, 16>}, {transform_indices = @transform_19, window_bounds = array<i64: 1, 2, 4, 16, 1>}]} {
    %c0 = arith.constant 0 : index
    %c0_0 = arith.constant 0 : index
    %0 = vector.load %arg2[%c0, %c0_0] : memref<16x16xf32, #tpu.memory_space<vmem>>, vector<16x16xf32>
    %1 = arith.mulf %0, %0 : vector<16x16xf32>
    %cst = arith.constant 0.000000e+00 : f32
    %2 = vector.broadcast %cst : f32 to vector<16x16xf32>
    %3 = arith.subf %2, %1 : vector<16x16xf32>
    %c0_1 = arith.constant 0 : index
    %c0_2 = arith.constant 0 : index
    %c0_3 = arith.constant 0 : index
    %4 = vector.load %arg1[%c0_1, %c0_2, %c0_3] : memref<1x16x32xf32, #tpu.memory_space<vmem>>, vector<1x16x32xf32>
    %5 = vector.shape_cast %4 : vector<1x16x32xf32> to vector<16x32xf32>
    %6 = arith.truncf %5 : vector<16x32xf32> to vector<16x32xbf16>
    %c0_4 = arith.constant 0 : index
    %c0_5 = arith.constant 0 : index
    %c0_6 = arith.constant 0 : index
    %7 = vector.load %arg3[%c0_4, %c0_5, %c0_6] : memref<2x32x128xbf16, #tpu.memory_space<vmem>>, vector<1x32x128xbf16>
    %8 = vector.shape_cast %7 : vector<1x32x128xbf16> to vector<32x128xbf16>
    %cst_7 = arith.constant dense<0.000000e+00> : vector<16x128xf32>
    %9 = tpu.matmul %6, %8, %cst_7 {dimension_numbers = #tpu.dot_dimension_numbers<[1], [0], [0], [1], [0, 0, 1, 1], [], []>} : vector<16x32xbf16>, vector<32x128xbf16>, vector<16x128xf32> -> vector<16x128xf32>
    %c0_8 = arith.constant 0 : index
    %c0_9 = arith.constant 0 : index
    %c0_10 = arith.constant 0 : index
    %10 = vector.load %arg4[%c0_8, %c0_9, %c0_10] : memref<2x1x128xf32, #tpu.memory_space<vmem>>, vector<1x1x128xf32>
    %11 = vector.shape_cast %10 : vector<1x1x128xf32> to vector<1x128xf32>
    %12 = vector.broadcast %11 : vector<1x128xf32> to vector<16x128xf32>
    %13 = arith.addf %9, %12 : vector<16x128xf32>
    %14 = vector.extract_strided_slice %13 {offsets = [0, 0], sizes = [16, 32], strides = [1, 1]} : vector<16x128xf32> to vector<16x32xf32>
    %15 = vector.extract_strided_slice %13 {offsets = [0, 32], sizes = [16, 32], strides = [1, 1]} : vector<16x128xf32> to vector<16x32xf32>
    %16 = vector.extract_strided_slice %13 {offsets = [0, 64], sizes = [16, 32], strides = [1, 1]} : vector<16x128xf32> to vector<16x32xf32>
    %17 = vector.extract_strided_slice %13 {offsets = [0, 96], sizes = [16, 4], strides = [1, 1]} : vector<16x128xf32> to vector<16x4xf32>
    %18 = vector.extract_strided_slice %17 {offsets = [0, 0], sizes = [16, 1], strides = [1, 1]} : vector<16x4xf32> to vector<16x1xf32>
    %19 = vector.extract_strided_slice %17 {offsets = [0, 1], sizes = [16, 1], strides = [1, 1]} : vector<16x4xf32> to vector<16x1xf32>
    %20 = vector.extract_strided_slice %17 {offsets = [0, 2], sizes = [16, 1], strides = [1, 1]} : vector<16x4xf32> to vector<16x1xf32>
    %21 = vector.extract_strided_slice %17 {offsets = [0, 3], sizes = [16, 1], strides = [1, 1]} : vector<16x4xf32> to vector<16x1xf32>
    %22 = vector.shape_cast %18 : vector<16x1xf32> to vector<1x16x1xf32>
    %23 = vector.shape_cast %19 : vector<16x1xf32> to vector<1x16x1xf32>
    %24 = vector.shape_cast %20 : vector<16x1xf32> to vector<1x16x1xf32>
    %25 = vector.shape_cast %21 : vector<16x1xf32> to vector<1x16x1xf32>
    %26 = tpu.concatenate %22, %23, %24, %25 in 0 : vector<1x16x1xf32>, vector<1x16x1xf32>, vector<1x16x1xf32>, vector<1x16x1xf32> -> vector<4x16x1xf32>
    %cst_11 = arith.constant 5.000000e+00 : f32
    %27 = vector.broadcast %cst_11 : f32 to vector<4x16x1xf32>
    %28 = arith.mulf %26, %27 : vector<4x16x1xf32>
    %29 = arith.negf %28 : vector<4x16x1xf32>
    %30 = math.exp %29 : vector<4x16x1xf32>
    %cst_12 = arith.constant 1.000000e+00 : f32
    %31 = vector.broadcast %cst_12 : f32 to vector<4x16x1xf32>
    %32 = arith.addf %31, %30 : vector<4x16x1xf32>
    %33 = arith.divf %31, %32 : vector<4x16x1xf32>
    %cst_13 = arith.constant 9.99999974E-6 : f32
    %34 = vector.broadcast %cst_13 : f32 to vector<4x16x1xf32>
    %35 = arith.addf %33, %34 : vector<4x16x1xf32>
    %cst_14 = arith.constant 1.09861231 : f32
    %36 = vector.broadcast %cst_14 : f32 to vector<4x16x1xf32>
    %37 = arith.mulf %35, %36 : vector<4x16x1xf32>
    %38 = math.exp %37 : vector<4x16x1xf32>
    %cst_15 = arith.constant 1.000000e+00 : f32
    %39 = vector.broadcast %cst_15 : f32 to vector<4x16x1xf32>
    %40 = arith.subf %38, %39 : vector<4x16x1xf32>
    %c0_16 = arith.constant 0 : index
    %c0_17 = arith.constant 0 : index
    %c0_18 = arith.constant 0 : index
    %c0_19 = arith.constant 0 : index
    %c0_20 = arith.constant 0 : index
    %41 = vector.load %arg20[%c0_16, %c0_17, %c0_18, %c0_19, %c0_20] : memref<1x2x4x16x1xf32, #tpu.memory_space<vmem>>, vector<1x1x4x16x1xf32>
    %42 = vector.shape_cast %41 : vector<1x1x4x16x1xf32> to vector<4x16x1xf32>
    %43 = vector.shape_cast %40 : vector<4x16x1xf32> to vector<1x1x4x16x1xf32>
    tpu.vector_store %arg20[%c0_16, %c0_17, %c0_18, %c0_19, %c0_20], %43 {strides = array<i32>} : memref<1x2x4x16x1xf32, #tpu.memory_space<vmem>>, vector<1x1x4x16x1xf32>,
    %cst_21 = arith.constant 1.000000e+00 : f32
    %44 = vector.broadcast %cst_21 : f32 to vector<4x16x1xf32>
    %45 = arith.divf %44, %40 : vector<4x16x1xf32>
    %cst_22 = arith.constant 0.398942292 : f32
    %46 = vector.broadcast %cst_22 : f32 to vector<4x16x1xf32>
    %47 = arith.mulf %45, %46 : vector<4x16x1xf32>
    %cst_23 = arith.constant 5.000000e-01 : f32
    %48 = vector.broadcast %cst_23 : f32 to vector<4x16x1xf32>
    %49 = arith.mulf %48, %45 : vector<4x16x1xf32>
    %50 = arith.mulf %49, %45 : vector<4x16x1xf32>
    %51 = vector.shape_cast %3 : vector<16x16xf32> to vector<1x16x16xf32>
    %52 = vector.broadcast %51 : vector<1x16x16xf32> to vector<4x16x16xf32>
    %53 = vector.broadcast %50 : vector<4x16x1xf32> to vector<4x16x16xf32>
    %54 = arith.mulf %52, %53 : vector<4x16x16xf32>
    %55 = math.exp %54 : vector<4x16x16xf32>
    %56 = vector.broadcast %47 : vector<4x16x1xf32> to vector<4x16x16xf32>
    %57 = arith.mulf %56, %55 : vector<4x16x16xf32>
    %c0_24 = arith.constant 0 : index
    %c0_25 = arith.constant 0 : index
    %c0_26 = arith.constant 0 : index
    %c0_27 = arith.constant 0 : index
    %c0_28 = arith.constant 0 : index
    %58 = vector.load %arg19[%c0_24, %c0_25, %c0_26, %c0_27, %c0_28] : memref<1x2x4x16x16xf32, #tpu.memory_space<vmem>>, vector<1x1x4x16x16xf32>
    %59 = vector.shape_cast %58 : vector<1x1x4x16x16xf32> to vector<4x16x16xf32>
    %60 = vector.shape_cast %57 : vector<4x16x16xf32> to vector<1x1x4x16x16xf32>
    tpu.vector_store %arg19[%c0_24, %c0_25, %c0_26, %c0_27, %c0_28], %60 {strides = array<i32>} : memref<1x2x4x16x16xf32, #tpu.memory_space<vmem>>, vector<1x1x4x16x16xf32>,
    %61 = vector.extract_strided_slice %14 {offsets = [0, 0], sizes = [16, 8], strides = [1, 1]} : vector<16x32xf32> to vector<16x8xf32>
    %62 = vector.extract_strided_slice %14 {offsets = [0, 8], sizes = [16, 8], strides = [1, 1]} : vector<16x32xf32> to vector<16x8xf32>
    %63 = vector.extract_strided_slice %14 {offsets = [0, 16], sizes = [16, 8], strides = [1, 1]} : vector<16x32xf32> to vector<16x8xf32>
    %64 = vector.extract_strided_slice %14 {offsets = [0, 24], sizes = [16, 8], strides = [1, 1]} : vector<16x32xf32> to vector<16x8xf32>
    %65 = vector.shape_cast %61 : vector<16x8xf32> to vector<1x16x8xf32>
    %66 = vector.shape_cast %62 : vector<16x8xf32> to vector<1x16x8xf32>
    %67 = vector.shape_cast %63 : vector<16x8xf32> to vector<1x16x8xf32>
    %68 = vector.shape_cast %64 : vector<16x8xf32> to vector<1x16x8xf32>
    %69 = tpu.concatenate %65, %66, %67, %68 in 0 : vector<1x16x8xf32>, vector<1x16x8xf32>, vector<1x16x8xf32>, vector<1x16x8xf32> -> vector<4x16x8xf32>
    %70 = arith.truncf %69 : vector<4x16x8xf32> to vector<4x16x8xbf16>
    %71 = vector.extract_strided_slice %15 {offsets = [0, 0], sizes = [16, 8], strides = [1, 1]} : vector<16x32xf32> to vector<16x8xf32>
    %72 = vector.extract_strided_slice %15 {offsets = [0, 8], sizes = [16, 8], strides = [1, 1]} : vector<16x32xf32> to vector<16x8xf32>
    %73 = vector.extract_strided_slice %15 {offsets = [0, 16], sizes = [16, 8], strides = [1, 1]} : vector<16x32xf32> to vector<16x8xf32>
    %74 = vector.extract_strided_slice %15 {offsets = [0, 24], sizes = [16, 8], strides = [1, 1]} : vector<16x32xf32> to vector<16x8xf32>
    %75 = vector.shape_cast %71 : vector<16x8xf32> to vector<1x16x8xf32>
    %76 = vector.shape_cast %72 : vector<16x8xf32> to vector<1x16x8xf32>
    %77 = vector.shape_cast %73 : vector<16x8xf32> to vector<1x16x8xf32>
    %78 = vector.shape_cast %74 : vector<16x8xf32> to vector<1x16x8xf32>
    %79 = tpu.concatenate %75, %76, %77, %78 in 0 : vector<1x16x8xf32>, vector<1x16x8xf32>, vector<1x16x8xf32>, vector<1x16x8xf32> -> vector<4x16x8xf32>
    %80 = arith.truncf %79 : vector<4x16x8xf32> to vector<4x16x8xbf16>
    %81 = vector.extract_strided_slice %16 {offsets = [0, 0], sizes = [16, 8], strides = [1, 1]} : vector<16x32xf32> to vector<16x8xf32>
    %82 = vector.extract_strided_slice %16 {offsets = [0, 8], sizes = [16, 8], strides = [1, 1]} : vector<16x32xf32> to vector<16x8xf32>
    %83 = vector.extract_strided_slice %16 {offsets = [0, 16], sizes = [16, 8], strides = [1, 1]} : vector<16x32xf32> to vector<16x8xf32>
    %84 = vector.extract_strided_slice %16 {offsets = [0, 24], sizes = [16, 8], strides = [1, 1]} : vector<16x32xf32> to vector<16x8xf32>
    %85 = vector.shape_cast %81 : vector<16x8xf32> to vector<1x16x8xf32>
    %86 = vector.shape_cast %82 : vector<16x8xf32> to vector<1x16x8xf32>
    %87 = vector.shape_cast %83 : vector<16x8xf32> to vector<1x16x8xf32>
    %88 = vector.shape_cast %84 : vector<16x8xf32> to vector<1x16x8xf32>
    %89 = tpu.concatenate %85, %86, %87, %88 in 0 : vector<1x16x8xf32>, vector<1x16x8xf32>, vector<1x16x8xf32>, vector<1x16x8xf32> -> vector<4x16x8xf32>
    %90 = arith.truncf %89 : vector<4x16x8xf32> to vector<4x16x8xbf16>
    %cst_29 = arith.constant dense<0.000000e+00> : vector<4x16x16xf32>
    %91 = tpu.matmul %70, %80, %cst_29 {dimension_numbers = #tpu.dot_dimension_numbers<[2], [2], [1], [1], [0, 0, 0, 1, 1, 1], [0], [0]>} : vector<4x16x8xbf16>, vector<4x16x8xbf16>, vector<4x16x16xf32> -> vector<4x16x16xf32>
    %cst_30 = arith.constant 0.353553385 : f32
    %92 = vector.broadcast %cst_30 : f32 to vector<4x16x16xf32>
    %93 = arith.mulf %91, %92 : vector<4x16x16xf32>
    %cst_31 = arith.constant dense<0xFF800000> : vector<4x16xf32>
    %94 = vector.multi_reduction <maximumf>, %93, %cst_31 [2] : vector<4x16x16xf32> to vector<4x16xf32>
    %95 = vector.shape_cast %94 : vector<4x16xf32> to vector<4x16x1xf32>
    %96 = vector.broadcast %95 : vector<4x16x1xf32> to vector<4x16x16xf32>
    %97 = arith.subf %93, %96 : vector<4x16x16xf32>
    %98 = math.exp %97 : vector<4x16x16xf32>
    %cst_32 = arith.constant dense<0.000000e+00> : vector<4x16xf32>
    %99 = vector.multi_reduction <add>, %98, %cst_32 [2] : vector<4x16x16xf32> to vector<4x16xf32>
    %100 = vector.shape_cast %99 : vector<4x16xf32> to vector<4x16x1xf32>
    %101 = vector.broadcast %100 : vector<4x16x1xf32> to vector<4x16x16xf32>
    %102 = arith.divf %98, %101 : vector<4x16x16xf32>
    %c0_33 = arith.constant 0 : index
    %c0_34 = arith.constant 0 : index
    %c0_35 = arith.constant 0 : index
    %c0_36 = arith.constant 0 : index
    %c0_37 = arith.constant 0 : index
    %103 = vector.load %arg18[%c0_33, %c0_34, %c0_35, %c0_36, %c0_37] : memref<1x2x4x16x16xf32, #tpu.memory_space<vmem>>, vector<1x1x4x16x16xf32>
    %104 = vector.shape_cast %103 : vector<1x1x4x16x16xf32> to vector<4x16x16xf32>
    %105 = vector.shape_cast %102 : vector<4x16x16xf32> to vector<1x1x4x16x16xf32>
    tpu.vector_store %arg18[%c0_33, %c0_34, %c0_35, %c0_36, %c0_37], %105 {strides = array<i32>} : memref<1x2x4x16x16xf32, #tpu.memory_space<vmem>>, vector<1x1x4x16x16xf32>,
    %106 = arith.truncf %102 : vector<4x16x16xf32> to vector<4x16x16xbf16>
    %cst_38 = arith.constant dense<0.000000e+00> : vector<4x16x8xf32>
    %107 = tpu.matmul %106, %90, %cst_38 {dimension_numbers = #tpu.dot_dimension_numbers<[2], [1], [1], [2], [0, 0, 0, 1, 1, 2], [0], [0]>} : vector<4x16x16xbf16>, vector<4x16x8xbf16>, vector<4x16x8xf32> -> vector<4x16x8xf32>
    %108 = vector.extract_strided_slice %107 {offsets = [0, 0, 0], sizes = [1, 16, 8], strides = [1, 1, 1]} : vector<4x16x8xf32> to vector<1x16x8xf32>
    %109 = vector.shape_cast %108 : vector<1x16x8xf32> to vector<16x8xf32>
    %110 = arith.truncf %109 : vector<16x8xf32> to vector<16x8xbf16>
    %c0_39 = arith.constant 0 : index
    %c0_40 = arith.constant 0 : index
    %c0_41 = arith.constant 0 : index
    %c0_42 = arith.constant 0 : index
    %111 = vector.load %arg5[%c0_39, %c0_40, %c0_41, %c0_42] : memref<2x4x8x32xbf16, #tpu.memory_space<vmem>>, vector<1x1x8x32xbf16>
    %112 = vector.shape_cast %111 : vector<1x1x8x32xbf16> to vector<8x32xbf16>
    %cst_43 = arith.constant dense<0.000000e+00> : vector<16x32xf32>
    %113 = tpu.matmul %110, %112, %cst_43 {dimension_numbers = #tpu.dot_dimension_numbers<[1], [0], [0], [1], [0, 0, 1, 1], [], []>} : vector<16x8xbf16>, vector<8x32xbf16>, vector<16x32xf32> -> vector<16x32xf32>
    %114 = vector.extract_strided_slice %107 {offsets = [1, 0, 0], sizes = [1, 16, 8], strides = [1, 1, 1]} : vector<4x16x8xf32> to vector<1x16x8xf32>
    %115 = vector.shape_cast %114 : vector<1x16x8xf32> to vector<16x8xf32>
    %116 = arith.truncf %115 : vector<16x8xf32> to vector<16x8xbf16>
    %c0_44 = arith.constant 0 : index
    %c1 = arith.constant 1 : index
    %c0_45 = arith.constant 0 : index
    %c0_46 = arith.constant 0 : index
    %117 = vector.load %arg5[%c0_44, %c1, %c0_45, %c0_46] : memref<2x4x8x32xbf16, #tpu.memory_space<vmem>>, vector<1x1x8x32xbf16>
    %118 = vector.shape_cast %117 : vector<1x1x8x32xbf16> to vector<8x32xbf16>
    %cst_47 = arith.constant dense<0.000000e+00> : vector<16x32xf32>
    %119 = tpu.matmul %116, %118, %cst_47 {dimension_numbers = #tpu.dot_dimension_numbers<[1], [0], [0], [1], [0, 0, 1, 1], [], []>} : vector<16x8xbf16>, vector<8x32xbf16>, vector<16x32xf32> -> vector<16x32xf32>
    %120 = arith.addf %113, %119 : vector<16x32xf32>
    %121 = vector.extract_strided_slice %107 {offsets = [2, 0, 0], sizes = [1, 16, 8], strides = [1, 1, 1]} : vector<4x16x8xf32> to vector<1x16x8xf32>
    %122 = vector.shape_cast %121 : vector<1x16x8xf32> to vector<16x8xf32>
    %123 = arith.truncf %122 : vector<16x8xf32> to vector<16x8xbf16>
    %c0_48 = arith.constant 0 : index
    %c2 = arith.constant 2 : index
    %c0_49 = arith.constant 0 : index
    %c0_50 = arith.constant 0 : index
    %124 = vector.load %arg5[%c0_48, %c2, %c0_49, %c0_50] : memref<2x4x8x32xbf16, #tpu.memory_space<vmem>>, vector<1x1x8x32xbf16>
    %125 = vector.shape_cast %124 : vector<1x1x8x32xbf16> to vector<8x32xbf16>
    %cst_51 = arith.constant dense<0.000000e+00> : vector<16x32xf32>
    %126 = tpu.matmul %123, %125, %cst_51 {dimension_numbers = #tpu.dot_dimension_numbers<[1], [0], [0], [1], [0, 0, 1, 1], [], []>} : vector<16x8xbf16>, vector<8x32xbf16>, vector<16x32xf32> -> vector<16x32xf32>
    %127 = arith.addf %120, %126 : vector<16x32xf32>
    %128 = vector.extract_strided_slice %107 {offsets = [3, 0, 0], sizes = [1, 16, 8], strides = [1, 1, 1]} : vector<4x16x8xf32> to vector<1x16x8xf32>
    %129 = vector.shape_cast %128 : vector<1x16x8xf32> to vector<16x8xf32>
    %130 = arith.truncf %129 : vector<16x8xf32> to vector<16x8xbf16>
    %c0_52 = arith.constant 0 : index
    %c3 = arith.constant 3 : index
    %c0_53 = arith.constant 0 : index
    %c0_54 = arith.constant 0 : index
    %131 = vector.load %arg5[%c0_52, %c3, %c0_53, %c0_54] : memref<2x4x8x32xbf16, #tpu.memory_space<vmem>>, vector<1x1x8x32xbf16>
    %132 = vector.shape_cast %131 : vector<1x1x8x32xbf16> to vector<8x32xbf16>
    %cst_55 = arith.constant dense<0.000000e+00> : vector<16x32xf32>
    %133 = tpu.matmul %130, %132, %cst_55 {dimension_numbers = #tpu.dot_dimension_numbers<[1], [0], [0], [1], [0, 0, 1, 1], [], []>} : vector<16x8xbf16>, vector<8x32xbf16>, vector<16x32xf32> -> vector<16x32xf32>
    %134 = arith.addf %127, %133 : vector<16x32xf32>
    %c0_56 = arith.constant 0 : index
    %c0_57 = arith.constant 0 : index
    %c0_58 = arith.constant 0 : index
    %135 = vector.load %arg6[%c0_56, %c0_57, %c0_58] : memref<2x1x32xf32, #tpu.memory_space<vmem>>, vector<1x1x32xf32>
    %136 = vector.shape_cast %135 : vector<1x1x32xf32> to vector<1x32xf32>
    %137 = vector.broadcast %136 : vector<1x32xf32> to vector<16x32xf32>
    %138 = arith.addf %134, %137 : vector<16x32xf32>
    %139 = arith.addf %5, %138 : vector<16x32xf32>
    %c0_59 = arith.constant 0 : index
    %c0_60 = arith.constant 0 : index
    %c0_61 = arith.constant 0 : index
    %140 = vector.load %arg11[%c0_59, %c0_60, %c0_61] : memref<2x1x32xf32, #tpu.memory_space<vmem>>, vector<1x1x32xf32>
    %141 = vector.shape_cast %140 : vector<1x1x32xf32> to vector<1x32xf32>
    %c0_62 = arith.constant 0 : index
    %c0_63 = arith.constant 0 : index
    %c0_64 = arith.constant 0 : index
    %142 = vector.load %arg12[%c0_62, %c0_63, %c0_64] : memref<2x1x32xf32, #tpu.memory_space<vmem>>, vector<1x1x32xf32>
    %143 = vector.shape_cast %142 : vector<1x1x32xf32> to vector<1x32xf32>
    %cst_65 = arith.constant dense<0.000000e+00> : vector<16xf32>
    %144 = vector.multi_reduction <add>, %139, %cst_65 [1] : vector<16x32xf32> to vector<16xf32>
    %145 = vector.shape_cast %144 : vector<16xf32> to vector<16x1xf32>
    %cst_66 = arith.constant 3.200000e+01 : f32
    %146 = vector.broadcast %cst_66 : f32 to vector<16x1xf32>
    %147 = arith.divf %145, %146 : vector<16x1xf32>
    %148 = vector.broadcast %147 : vector<16x1xf32> to vector<16x32xf32>
    %149 = arith.subf %139, %148 : vector<16x32xf32>
    %150 = arith.mulf %149, %149 : vector<16x32xf32>
    %cst_67 = arith.constant dense<0.000000e+00> : vector<16xf32>
    %151 = vector.multi_reduction <add>, %150, %cst_67 [1] : vector<16x32xf32> to vector<16xf32>
    %152 = vector.shape_cast %151 : vector<16xf32> to vector<16x1xf32>
    %cst_68 = arith.constant 3.200000e+01 : f32
    %153 = vector.broadcast %cst_68 : f32 to vector<16x1xf32>
    %154 = arith.divf %152, %153 : vector<16x1xf32>
    %155 = vector.broadcast %147 : vector<16x1xf32> to vector<16x32xf32>
    %156 = arith.subf %139, %155 : vector<16x32xf32>
    %cst_69 = arith.constant 9.99999974E-6 : f32
    %157 = vector.broadcast %cst_69 : f32 to vector<16x1xf32>
    %158 = arith.addf %154, %157 : vector<16x1xf32>
    %159 = math.rsqrt %158 : vector<16x1xf32>
    %160 = vector.broadcast %159 : vector<16x1xf32> to vector<16x32xf32>
    %161 = arith.mulf %156, %160 : vector<16x32xf32>
    %162 = vector.broadcast %141 : vector<1x32xf32> to vector<16x32xf32>
    %163 = arith.mulf %161, %162 : vector<16x32xf32>
    %164 = vector.broadcast %143 : vector<1x32xf32> to vector<16x32xf32>
    %165 = arith.addf %163, %164 : vector<16x32xf32>
    %166 = arith.truncf %165 : vector<16x32xf32> to vector<16x32xbf16>
    %c0_70 = arith.constant 0 : index
    %c0_71 = arith.constant 0 : index
    %c0_72 = arith.constant 0 : index
    %167 = vector.load %arg7[%c0_70, %c0_71, %c0_72] : memref<2x32x64xbf16, #tpu.memory_space<vmem>>, vector<1x32x64xbf16>
    %168 = vector.shape_cast %167 : vector<1x32x64xbf16> to vector<32x64xbf16>
    %cst_73 = arith.constant dense<0.000000e+00> : vector<16x64xf32>
    %169 = tpu.matmul %166, %168, %cst_73 {dimension_numbers = #tpu.dot_dimension_numbers<[1], [0], [0], [1], [0, 0, 1, 1], [], []>} : vector<16x32xbf16>, vector<32x64xbf16>, vector<16x64xf32> -> vector<16x64xf32>
    %c0_74 = arith.constant 0 : index
    %c0_75 = arith.constant 0 : index
    %c0_76 = arith.constant 0 : index
    %170 = vector.load %arg8[%c0_74, %c0_75, %c0_76] : memref<2x1x64xf32, #tpu.memory_space<vmem>>, vector<1x1x64xf32>
    %171 = vector.shape_cast %170 : vector<1x1x64xf32> to vector<1x64xf32>
    %172 = vector.broadcast %171 : vector<1x64xf32> to vector<16x64xf32>
    %173 = arith.addf %169, %172 : vector<16x64xf32>
    %cst_77 = arith.constant 0.000000e+00 : f32
    %174 = vector.broadcast %cst_77 : f32 to vector<16x64xf32>
    %175 = arith.maximumf %173, %174 : vector<16x64xf32>
    %176 = arith.truncf %175 : vector<16x64xf32> to vector<16x64xbf16>
    %c0_78 = arith.constant 0 : index
    %c0_79 = arith.constant 0 : index
    %c0_80 = arith.constant 0 : index
    %177 = vector.load %arg9[%c0_78, %c0_79, %c0_80] : memref<2x64x32xbf16, #tpu.memory_space<vmem>>, vector<1x64x32xbf16>
    %178 = vector.shape_cast %177 : vector<1x64x32xbf16> to vector<64x32xbf16>
    %cst_81 = arith.constant dense<0.000000e+00> : vector<16x32xf32>
    %179 = tpu.matmul %176, %178, %cst_81 {dimension_numbers = #tpu.dot_dimension_numbers<[1], [0], [0], [1], [0, 0, 1, 1], [], []>} : vector<16x64xbf16>, vector<64x32xbf16>, vector<16x32xf32> -> vector<16x32xf32>
    %c0_82 = arith.constant 0 : index
    %c0_83 = arith.constant 0 : index
    %c0_84 = arith.constant 0 : index
    %180 = vector.load %arg10[%c0_82, %c0_83, %c0_84] : memref<2x1x32xf32, #tpu.memory_space<vmem>>, vector<1x1x32xf32>
    %181 = vector.shape_cast %180 : vector<1x1x32xf32> to vector<1x32xf32>
    %182 = vector.broadcast %181 : vector<1x32xf32> to vector<16x32xf32>
    %183 = arith.addf %179, %182 : vector<16x32xf32>
    %184 = arith.addf %165, %183 : vector<16x32xf32>
    %c0_85 = arith.constant 0 : index
    %c0_86 = arith.constant 0 : index
    %c0_87 = arith.constant 0 : index
    %185 = vector.load %arg13[%c0_85, %c0_86, %c0_87] : memref<2x1x32xf32, #tpu.memory_space<vmem>>, vector<1x1x32xf32>
    %186 = vector.shape_cast %185 : vector<1x1x32xf32> to vector<1x32xf32>
    %c0_88 = arith.constant 0 : index
    %c0_89 = arith.constant 0 : index
    %c0_90 = arith.constant 0 : index
    %187 = vector.load %arg14[%c0_88, %c0_89, %c0_90] : memref<2x1x32xf32, #tpu.memory_space<vmem>>, vector<1x1x32xf32>
    %188 = vector.shape_cast %187 : vector<1x1x32xf32> to vector<1x32xf32>
    %cst_91 = arith.constant dense<0.000000e+00> : vector<16xf32>
    %189 = vector.multi_reduction <add>, %184, %cst_91 [1] : vector<16x32xf32> to vector<16xf32>
    %190 = vector.shape_cast %189 : vector<16xf32> to vector<16x1xf32>
    %cst_92 = arith.constant 3.200000e+01 : f32
    %191 = vector.broadcast %cst_92 : f32 to vector<16x1xf32>
    %192 = arith.divf %190, %191 : vector<16x1xf32>
    %193 = vector.broadcast %192 : vector<16x1xf32> to vector<16x32xf32>
    %194 = arith.subf %184, %193 : vector<16x32xf32>
    %195 = arith.mulf %194, %194 : vector<16x32xf32>
    %cst_93 = arith.constant dense<0.000000e+00> : vector<16xf32>
    %196 = vector.multi_reduction <add>, %195, %cst_93 [1] : vector<16x32xf32> to vector<16xf32>
    %197 = vector.shape_cast %196 : vector<16xf32> to vector<16x1xf32>
    %cst_94 = arith.constant 3.200000e+01 : f32
    %198 = vector.broadcast %cst_94 : f32 to vector<16x1xf32>
    %199 = arith.divf %197, %198 : vector<16x1xf32>
    %200 = vector.broadcast %192 : vector<16x1xf32> to vector<16x32xf32>
    %201 = arith.subf %184, %200 : vector<16x32xf32>
    %cst_95 = arith.constant 9.99999974E-6 : f32
    %202 = vector.broadcast %cst_95 : f32 to vector<16x1xf32>
    %203 = arith.addf %199, %202 : vector<16x1xf32>
    %204 = math.rsqrt %203 : vector<16x1xf32>
    %205 = vector.broadcast %204 : vector<16x1xf32> to vector<16x32xf32>
    %206 = arith.mulf %201, %205 : vector<16x32xf32>
    %207 = vector.broadcast %186 : vector<1x32xf32> to vector<16x32xf32>
    %208 = arith.mulf %206, %207 : vector<16x32xf32>
    %209 = vector.broadcast %188 : vector<1x32xf32> to vector<16x32xf32>
    %210 = arith.addf %208, %209 : vector<16x32xf32>
    %211 = arith.truncf %210 : vector<16x32xf32> to vector<16x32xbf16>
    %c1_96 = arith.constant 1 : index
    %c0_97 = arith.constant 0 : index
    %c0_98 = arith.constant 0 : index
    %212 = vector.load %arg3[%c1_96, %c0_97, %c0_98] : memref<2x32x128xbf16, #tpu.memory_space<vmem>>, vector<1x32x128xbf16>
    %213 = vector.shape_cast %212 : vector<1x32x128xbf16> to vector<32x128xbf16>
    %cst_99 = arith.constant dense<0.000000e+00> : vector<16x128xf32>
    %214 = tpu.matmul %211, %213, %cst_99 {dimension_numbers = #tpu.dot_dimension_numbers<[1], [0], [0], [1], [0, 0, 1, 1], [], []>} : vector<16x32xbf16>, vector<32x128xbf16>, vector<16x128xf32> -> vector<16x128xf32>
    %c1_100 = arith.constant 1 : index
    %c0_101 = arith.constant 0 : index
    %c0_102 = arith.constant 0 : index
    %215 = vector.load %arg4[%c1_100, %c0_101, %c0_102] : memref<2x1x128xf32, #tpu.memory_space<vmem>>, vector<1x1x128xf32>
    %216 = vector.shape_cast %215 : vector<1x1x128xf32> to vector<1x128xf32>
    %217 = vector.broadcast %216 : vector<1x128xf32> to vector<16x128xf32>
    %218 = arith.addf %214, %217 : vector<16x128xf32>
    %219 = vector.extract_strided_slice %218 {offsets = [0, 0], sizes = [16, 32], strides = [1, 1]} : vector<16x128xf32> to vector<16x32xf32>
    %220 = vector.extract_strided_slice %218 {offsets = [0, 32], sizes = [16, 32], strides = [1, 1]} : vector<16x128xf32> to vector<16x32xf32>
    %221 = vector.extract_strided_slice %218 {offsets = [0, 64], sizes = [16, 32], strides = [1, 1]} : vector<16x128xf32> to vector<16x32xf32>
    %222 = vector.extract_strided_slice %218 {offsets = [0, 96], sizes = [16, 4], strides = [1, 1]} : vector<16x128xf32> to vector<16x4xf32>
    %223 = vector.extract_strided_slice %222 {offsets = [0, 0], sizes = [16, 1], strides = [1, 1]} : vector<16x4xf32> to vector<16x1xf32>
    %224 = vector.extract_strided_slice %222 {offsets = [0, 1], sizes = [16, 1], strides = [1, 1]} : vector<16x4xf32> to vector<16x1xf32>
    %225 = vector.extract_strided_slice %222 {offsets = [0, 2], sizes = [16, 1], strides = [1, 1]} : vector<16x4xf32> to vector<16x1xf32>
    %226 = vector.extract_strided_slice %222 {offsets = [0, 3], sizes = [16, 1], strides = [1, 1]} : vector<16x4xf32> to vector<16x1xf32>
    %227 = vector.shape_cast %223 : vector<16x1xf32> to vector<1x16x1xf32>
    %228 = vector.shape_cast %224 : vector<16x1xf32> to vector<1x16x1xf32>
    %229 = vector.shape_cast %225 : vector<16x1xf32> to vector<1x16x1xf32>
    %230 = vector.shape_cast %226 : vector<16x1xf32> to vector<1x16x1xf32>
    %231 = tpu.concatenate %227, %228, %229, %230 in 0 : vector<1x16x1xf32>, vector<1x16x1xf32>, vector<1x16x1xf32>, vector<1x16x1xf32> -> vector<4x16x1xf32>
    %cst_103 = arith.constant 5.000000e+00 : f32
    %232 = vector.broadcast %cst_103 : f32 to vector<4x16x1xf32>
    %233 = arith.mulf %231, %232 : vector<4x16x1xf32>
    %234 = arith.negf %233 : vector<4x16x1xf32>
    %235 = math.exp %234 : vector<4x16x1xf32>
    %cst_104 = arith.constant 1.000000e+00 : f32
    %236 = vector.broadcast %cst_104 : f32 to vector<4x16x1xf32>
    %237 = arith.addf %236, %235 : vector<4x16x1xf32>
    %238 = arith.divf %236, %237 : vector<4x16x1xf32>
    %cst_105 = arith.constant 9.99999974E-6 : f32
    %239 = vector.broadcast %cst_105 : f32 to vector<4x16x1xf32>
    %240 = arith.addf %238, %239 : vector<4x16x1xf32>
    %cst_106 = arith.constant 1.09861231 : f32
    %241 = vector.broadcast %cst_106 : f32 to vector<4x16x1xf32>
    %242 = arith.mulf %240, %241 : vector<4x16x1xf32>
    %243 = math.exp %242 : vector<4x16x1xf32>
    %cst_107 = arith.constant 1.000000e+00 : f32
    %244 = vector.broadcast %cst_107 : f32 to vector<4x16x1xf32>
    %245 = arith.subf %243, %244 : vector<4x16x1xf32>
    %c0_108 = arith.constant 0 : index
    %c1_109 = arith.constant 1 : index
    %c0_110 = arith.constant 0 : index
    %c0_111 = arith.constant 0 : index
    %c0_112 = arith.constant 0 : index
    %246 = vector.load %arg20[%c0_108, %c1_109, %c0_110, %c0_111, %c0_112] : memref<1x2x4x16x1xf32, #tpu.memory_space<vmem>>, vector<1x1x4x16x1xf32>
    %247 = vector.shape_cast %246 : vector<1x1x4x16x1xf32> to vector<4x16x1xf32>
    %248 = vector.shape_cast %245 : vector<4x16x1xf32> to vector<1x1x4x16x1xf32>
    tpu.vector_store %arg20[%c0_108, %c1_109, %c0_110, %c0_111, %c0_112], %248 {strides = array<i32>} : memref<1x2x4x16x1xf32, #tpu.memory_space<vmem>>, vector<1x1x4x16x1xf32>,
    %cst_113 = arith.constant 1.000000e+00 : f32
    %249 = vector.broadcast %cst_113 : f32 to vector<4x16x1xf32>
    %250 = arith.divf %249, %245 : vector<4x16x1xf32>
    %cst_114 = arith.constant 0.398942292 : f32
    %251 = vector.broadcast %cst_114 : f32 to vector<4x16x1xf32>
    %252 = arith.mulf %250, %251 : vector<4x16x1xf32>
    %cst_115 = arith.constant 5.000000e-01 : f32
    %253 = vector.broadcast %cst_115 : f32 to vector<4x16x1xf32>
    %254 = arith.mulf %253, %250 : vector<4x16x1xf32>
    %255 = arith.mulf %254, %250 : vector<4x16x1xf32>
    %256 = vector.shape_cast %3 : vector<16x16xf32> to vector<1x16x16xf32>
    %257 = vector.broadcast %256 : vector<1x16x16xf32> to vector<4x16x16xf32>
    %258 = vector.broadcast %255 : vector<4x16x1xf32> to vector<4x16x16xf32>
    %259 = arith.mulf %257, %258 : vector<4x16x16xf32>
    %260 = math.exp %259 : vector<4x16x16xf32>
    %261 = vector.broadcast %252 : vector<4x16x1xf32> to vector<4x16x16xf32>
    %262 = arith.mulf %261, %260 : vector<4x16x16xf32>
    %c0_116 = arith.constant 0 : index
    %c1_117 = arith.constant 1 : index
    %c0_118 = arith.constant 0 : index
    %c0_119 = arith.constant 0 : index
    %c0_120 = arith.constant 0 : index
    %263 = vector.load %arg19[%c0_116, %c1_117, %c0_118, %c0_119, %c0_120] : memref<1x2x4x16x16xf32, #tpu.memory_space<vmem>>, vector<1x1x4x16x16xf32>
    %264 = vector.shape_cast %263 : vector<1x1x4x16x16xf32> to vector<4x16x16xf32>
    %265 = vector.shape_cast %262 : vector<4x16x16xf32> to vector<1x1x4x16x16xf32>
    tpu.vector_store %arg19[%c0_116, %c1_117, %c0_118, %c0_119, %c0_120], %265 {strides = array<i32>} : memref<1x2x4x16x16xf32, #tpu.memory_space<vmem>>, vector<1x1x4x16x16xf32>,
    %266 = vector.extract_strided_slice %219 {offsets = [0, 0], sizes = [16, 8], strides = [1, 1]} : vector<16x32xf32> to vector<16x8xf32>
    %267 = vector.extract_strided_slice %219 {offsets = [0, 8], sizes = [16, 8], strides = [1, 1]} : vector<16x32xf32> to vector<16x8xf32>
    %268 = vector.extract_strided_slice %219 {offsets = [0, 16], sizes = [16, 8], strides = [1, 1]} : vector<16x32xf32> to vector<16x8xf32>
    %269 = vector.extract_strided_slice %219 {offsets = [0, 24], sizes = [16, 8], strides = [1, 1]} : vector<16x32xf32> to vector<16x8xf32>
    %270 = vector.shape_cast %266 : vector<16x8xf32> to vector<1x16x8xf32>
    %271 = vector.shape_cast %267 : vector<16x8xf32> to vector<1x16x8xf32>
    %272 = vector.shape_cast %268 : vector<16x8xf32> to vector<1x16x8xf32>
    %273 = vector.shape_cast %269 : vector<16x8xf32> to vector<1x16x8xf32>
    %274 = tpu.concatenate %270, %271, %272, %273 in 0 : vector<1x16x8xf32>, vector<1x16x8xf32>, vector<1x16x8xf32>, vector<1x16x8xf32> -> vector<4x16x8xf32>
    %275 = arith.truncf %274 : vector<4x16x8xf32> to vector<4x16x8xbf16>
    %276 = vector.extract_strided_slice %220 {offsets = [0, 0], sizes = [16, 8], strides = [1, 1]} : vector<16x32xf32> to vector<16x8xf32>
    %277 = vector.extract_strided_slice %220 {offsets = [0, 8], sizes = [16, 8], strides = [1, 1]} : vector<16x32xf32> to vector<16x8xf32>
    %278 = vector.extract_strided_slice %220 {offsets = [0, 16], sizes = [16, 8], strides = [1, 1]} : vector<16x32xf32> to vector<16x8xf32>
    %279 = vector.extract_strided_slice %220 {offsets = [0, 24], sizes = [16, 8], strides = [1, 1]} : vector<16x32xf32> to vector<16x8xf32>
    %280 = vector.shape_cast %276 : vector<16x8xf32> to vector<1x16x8xf32>
    %281 = vector.shape_cast %277 : vector<16x8xf32> to vector<1x16x8xf32>
    %282 = vector.shape_cast %278 : vector<16x8xf32> to vector<1x16x8xf32>
    %283 = vector.shape_cast %279 : vector<16x8xf32> to vector<1x16x8xf32>
    %284 = tpu.concatenate %280, %281, %282, %283 in 0 : vector<1x16x8xf32>, vector<1x16x8xf32>, vector<1x16x8xf32>, vector<1x16x8xf32> -> vector<4x16x8xf32>
    %285 = arith.truncf %284 : vector<4x16x8xf32> to vector<4x16x8xbf16>
    %286 = vector.extract_strided_slice %221 {offsets = [0, 0], sizes = [16, 8], strides = [1, 1]} : vector<16x32xf32> to vector<16x8xf32>
    %287 = vector.extract_strided_slice %221 {offsets = [0, 8], sizes = [16, 8], strides = [1, 1]} : vector<16x32xf32> to vector<16x8xf32>
    %288 = vector.extract_strided_slice %221 {offsets = [0, 16], sizes = [16, 8], strides = [1, 1]} : vector<16x32xf32> to vector<16x8xf32>
    %289 = vector.extract_strided_slice %221 {offsets = [0, 24], sizes = [16, 8], strides = [1, 1]} : vector<16x32xf32> to vector<16x8xf32>
    %290 = vector.shape_cast %286 : vector<16x8xf32> to vector<1x16x8xf32>
    %291 = vector.shape_cast %287 : vector<16x8xf32> to vector<1x16x8xf32>
    %292 = vector.shape_cast %288 : vector<16x8xf32> to vector<1x16x8xf32>
    %293 = vector.shape_cast %289 : vector<16x8xf32> to vector<1x16x8xf32>
    %294 = tpu.concatenate %290, %291, %292, %293 in 0 : vector<1x16x8xf32>, vector<1x16x8xf32>, vector<1x16x8xf32>, vector<1x16x8xf32> -> vector<4x16x8xf32>
    %295 = arith.truncf %294 : vector<4x16x8xf32> to vector<4x16x8xbf16>
    %cst_121 = arith.constant dense<0.000000e+00> : vector<4x16x16xf32>
    %296 = tpu.matmul %275, %285, %cst_121 {dimension_numbers = #tpu.dot_dimension_numbers<[2], [2], [1], [1], [0, 0, 0, 1, 1, 1], [0], [0]>} : vector<4x16x8xbf16>, vector<4x16x8xbf16>, vector<4x16x16xf32> -> vector<4x16x16xf32>
    %cst_122 = arith.constant 0.353553385 : f32
    %297 = vector.broadcast %cst_122 : f32 to vector<4x16x16xf32>
    %298 = arith.mulf %296, %297 : vector<4x16x16xf32>
    %cst_123 = arith.constant dense<0xFF800000> : vector<4x16xf32>
    %299 = vector.multi_reduction <maximumf>, %298, %cst_123 [2] : vector<4x16x16xf32> to vector<4x16xf32>
    %300 = vector.shape_cast %299 : vector<4x16xf32> to vector<4x16x1xf32>
    %301 = vector.broadcast %300 : vector<4x16x1xf32> to vector<4x16x16xf32>
    %302 = arith.subf %298, %301 : vector<4x16x16xf32>
    %303 = math.exp %302 : vector<4x16x16xf32>
    %cst_124 = arith.constant dense<0.000000e+00> : vector<4x16xf32>
    %304 = vector.multi_reduction <add>, %303, %cst_124 [2] : vector<4x16x16xf32> to vector<4x16xf32>
    %305 = vector.shape_cast %304 : vector<4x16xf32> to vector<4x16x1xf32>
    %306 = vector.broadcast %305 : vector<4x16x1xf32> to vector<4x16x16xf32>
    %307 = arith.divf %303, %306 : vector<4x16x16xf32>
    %c0_125 = arith.constant 0 : index
    %c1_126 = arith.constant 1 : index
    %c0_127 = arith.constant 0 : index
    %c0_128 = arith.constant 0 : index
    %c0_129 = arith.constant 0 : index
    %308 = vector.load %arg18[%c0_125, %c1_126, %c0_127, %c0_128, %c0_129] : memref<1x2x4x16x16xf32, #tpu.memory_space<vmem>>, vector<1x1x4x16x16xf32>
    %309 = vector.shape_cast %308 : vector<1x1x4x16x16xf32> to vector<4x16x16xf32>
    %310 = vector.shape_cast %307 : vector<4x16x16xf32> to vector<1x1x4x16x16xf32>
    tpu.vector_store %arg18[%c0_125, %c1_126, %c0_127, %c0_128, %c0_129], %310 {strides = array<i32>} : memref<1x2x4x16x16xf32, #tpu.memory_space<vmem>>, vector<1x1x4x16x16xf32>,
    %311 = arith.truncf %307 : vector<4x16x16xf32> to vector<4x16x16xbf16>
    %cst_130 = arith.constant dense<0.000000e+00> : vector<4x16x8xf32>
    %312 = tpu.matmul %311, %295, %cst_130 {dimension_numbers = #tpu.dot_dimension_numbers<[2], [1], [1], [2], [0, 0, 0, 1, 1, 2], [0], [0]>} : vector<4x16x16xbf16>, vector<4x16x8xbf16>, vector<4x16x8xf32> -> vector<4x16x8xf32>
    %313 = vector.extract_strided_slice %312 {offsets = [0, 0, 0], sizes = [1, 16, 8], strides = [1, 1, 1]} : vector<4x16x8xf32> to vector<1x16x8xf32>
    %314 = vector.shape_cast %313 : vector<1x16x8xf32> to vector<16x8xf32>
    %315 = arith.truncf %314 : vector<16x8xf32> to vector<16x8xbf16>
    %c1_131 = arith.constant 1 : index
    %c0_132 = arith.constant 0 : index
    %c0_133 = arith.constant 0 : index
    %c0_134 = arith.constant 0 : index
    %316 = vector.load %arg5[%c1_131, %c0_132, %c0_133, %c0_134] : memref<2x4x8x32xbf16, #tpu.memory_space<vmem>>, vector<1x1x8x32xbf16>
    %317 = vector.shape_cast %316 : vector<1x1x8x32xbf16> to vector<8x32xbf16>
    %cst_135 = arith.constant dense<0.000000e+00> : vector<16x32xf32>
    %318 = tpu.matmul %315, %317, %cst_135 {dimension_numbers = #tpu.dot_dimension_numbers<[1], [0], [0], [1], [0, 0, 1, 1], [], []>} : vector<16x8xbf16>, vector<8x32xbf16>, vector<16x32xf32> -> vector<16x32xf32>
    %319 = vector.extract_strided_slice %312 {offsets = [1, 0, 0], sizes = [1, 16, 8], strides = [1, 1, 1]} : vector<4x16x8xf32> to vector<1x16x8xf32>
    %320 = vector.shape_cast %319 : vector<1x16x8xf32> to vector<16x8xf32>
    %321 = arith.truncf %320 : vector<16x8xf32> to vector<16x8xbf16>
    %c1_136 = arith.constant 1 : index
    %c1_137 = arith.constant 1 : index
    %c0_138 = arith.constant 0 : index
    %c0_139 = arith.constant 0 : index
    %322 = vector.load %arg5[%c1_136, %c1_137, %c0_138, %c0_139] : memref<2x4x8x32xbf16, #tpu.memory_space<vmem>>, vector<1x1x8x32xbf16>
    %323 = vector.shape_cast %322 : vector<1x1x8x32xbf16> to vector<8x32xbf16>
    %cst_140 = arith.constant dense<0.000000e+00> : vector<16x32xf32>
    %324 = tpu.matmul %321, %323, %cst_140 {dimension_numbers = #tpu.dot_dimension_numbers<[1], [0], [0], [1], [0, 0, 1, 1], [], []>} : vector<16x8xbf16>, vector<8x32xbf16>, vector<16x32xf32> -> vector<16x32xf32>
    %325 = arith.addf %318, %324 : vector<16x32xf32>
    %326 = vector.extract_strided_slice %312 {offsets = [2, 0, 0], sizes = [1, 16, 8], strides = [1, 1, 1]} : vector<4x16x8xf32> to vector<1x16x8xf32>
    %327 = vector.shape_cast %326 : vector<1x16x8xf32> to vector<16x8xf32>
    %328 = arith.truncf %327 : vector<16x8xf32> to vector<16x8xbf16>
    %c1_141 = arith.constant 1 : index
    %c2_142 = arith.constant 2 : index
    %c0_143 = arith.constant 0 : index
    %c0_144 = arith.constant 0 : index
    %329 = vector.load %arg5[%c1_141, %c2_142, %c0_143, %c0_144] : memref<2x4x8x32xbf16, #tpu.memory_space<vmem>>, vector<1x1x8x32xbf16>
    %330 = vector.shape_cast %329 : vector<1x1x8x32xbf16> to vector<8x32xbf16>
    %cst_145 = arith.constant dense<0.000000e+00> : vector<16x32xf32>
    %331 = tpu.matmul %328, %330, %cst_145 {dimension_numbers = #tpu.dot_dimension_numbers<[1], [0], [0], [1], [0, 0, 1, 1], [], []>} : vector<16x8xbf16>, vector<8x32xbf16>, vector<16x32xf32> -> vector<16x32xf32>
    %332 = arith.addf %325, %331 : vector<16x32xf32>
    %333 = vector.extract_strided_slice %312 {offsets = [3, 0, 0], sizes = [1, 16, 8], strides = [1, 1, 1]} : vector<4x16x8xf32> to vector<1x16x8xf32>
    %334 = vector.shape_cast %333 : vector<1x16x8xf32> to vector<16x8xf32>
    %335 = arith.truncf %334 : vector<16x8xf32> to vector<16x8xbf16>
    %c1_146 = arith.constant 1 : index
    %c3_147 = arith.constant 3 : index
    %c0_148 = arith.constant 0 : index
    %c0_149 = arith.constant 0 : index
    %336 = vector.load %arg5[%c1_146, %c3_147, %c0_148, %c0_149] : memref<2x4x8x32xbf16, #tpu.memory_space<vmem>>, vector<1x1x8x32xbf16>
    %337 = vector.shape_cast %336 : vector<1x1x8x32xbf16> to vector<8x32xbf16>
    %cst_150 = arith.constant dense<0.000000e+00> : vector<16x32xf32>
    %338 = tpu.matmul %335, %337, %cst_150 {dimension_numbers = #tpu.dot_dimension_numbers<[1], [0], [0], [1], [0, 0, 1, 1], [], []>} : vector<16x8xbf16>, vector<8x32xbf16>, vector<16x32xf32> -> vector<16x32xf32>
    %339 = arith.addf %332, %338 : vector<16x32xf32>
    %c1_151 = arith.constant 1 : index
    %c0_152 = arith.constant 0 : index
    %c0_153 = arith.constant 0 : index
    %340 = vector.load %arg6[%c1_151, %c0_152, %c0_153] : memref<2x1x32xf32, #tpu.memory_space<vmem>>, vector<1x1x32xf32>
    %341 = vector.shape_cast %340 : vector<1x1x32xf32> to vector<1x32xf32>
    %342 = vector.broadcast %341 : vector<1x32xf32> to vector<16x32xf32>
    %343 = arith.addf %339, %342 : vector<16x32xf32>
    %344 = arith.addf %210, %343 : vector<16x32xf32>
    %c1_154 = arith.constant 1 : index
    %c0_155 = arith.constant 0 : index
    %c0_156 = arith.constant 0 : index
    %345 = vector.load %arg11[%c1_154, %c0_155, %c0_156] : memref<2x1x32xf32, #tpu.memory_space<vmem>>, vector<1x1x32xf32>
    %346 = vector.shape_cast %345 : vector<1x1x32xf32> to vector<1x32xf32>
    %c1_157 = arith.constant 1 : index
    %c0_158 = arith.constant 0 : index
    %c0_159 = arith.constant 0 : index
    %347 = vector.load %arg12[%c1_157, %c0_158, %c0_159] : memref<2x1x32xf32, #tpu.memory_space<vmem>>, vector<1x1x32xf32>
    %348 = vector.shape_cast %347 : vector<1x1x32xf32> to vector<1x32xf32>
    %cst_160 = arith.constant dense<0.000000e+00> : vector<16xf32>
    %349 = vector.multi_reduction <add>, %344, %cst_160 [1] : vector<16x32xf32> to vector<16xf32>
    %350 = vector.shape_cast %349 : vector<16xf32> to vector<16x1xf32>
    %cst_161 = arith.constant 3.200000e+01 : f32
    %351 = vector.broadcast %cst_161 : f32 to vector<16x1xf32>
    %352 = arith.divf %350, %351 : vector<16x1xf32>
    %353 = vector.broadcast %352 : vector<16x1xf32> to vector<16x32xf32>
    %354 = arith.subf %344, %353 : vector<16x32xf32>
    %355 = arith.mulf %354, %354 : vector<16x32xf32>
    %cst_162 = arith.constant dense<0.000000e+00> : vector<16xf32>
    %356 = vector.multi_reduction <add>, %355, %cst_162 [1] : vector<16x32xf32> to vector<16xf32>
    %357 = vector.shape_cast %356 : vector<16xf32> to vector<16x1xf32>
    %cst_163 = arith.constant 3.200000e+01 : f32
    %358 = vector.broadcast %cst_163 : f32 to vector<16x1xf32>
    %359 = arith.divf %357, %358 : vector<16x1xf32>
    %360 = vector.broadcast %352 : vector<16x1xf32> to vector<16x32xf32>
    %361 = arith.subf %344, %360 : vector<16x32xf32>
    %cst_164 = arith.constant 9.99999974E-6 : f32
    %362 = vector.broadcast %cst_164 : f32 to vector<16x1xf32>
    %363 = arith.addf %359, %362 : vector<16x1xf32>
    %364 = math.rsqrt %363 : vector<16x1xf32>
    %365 = vector.broadcast %364 : vector<16x1xf32> to vector<16x32xf32>
    %366 = arith.mulf %361, %365 : vector<16x32xf32>
    %367 = vector.broadcast %346 : vector<1x32xf32> to vector<16x32xf32>
    %368 = arith.mulf %366, %367 : vector<16x32xf32>
    %369 = vector.broadcast %348 : vector<1x32xf32> to vector<16x32xf32>
    %370 = arith.addf %368, %369 : vector<16x32xf32>
    %371 = arith.truncf %370 : vector<16x32xf32> to vector<16x32xbf16>
    %c1_165 = arith.constant 1 : index
    %c0_166 = arith.constant 0 : index
    %c0_167 = arith.constant 0 : index
    %372 = vector.load %arg7[%c1_165, %c0_166, %c0_167] : memref<2x32x64xbf16, #tpu.memory_space<vmem>>, vector<1x32x64xbf16>
    %373 = vector.shape_cast %372 : vector<1x32x64xbf16> to vector<32x64xbf16>
    %cst_168 = arith.constant dense<0.000000e+00> : vector<16x64xf32>
    %374 = tpu.matmul %371, %373, %cst_168 {dimension_numbers = #tpu.dot_dimension_numbers<[1], [0], [0], [1], [0, 0, 1, 1], [], []>} : vector<16x32xbf16>, vector<32x64xbf16>, vector<16x64xf32> -> vector<16x64xf32>
    %c1_169 = arith.constant 1 : index
    %c0_170 = arith.constant 0 : index
    %c0_171 = arith.constant 0 : index
    %375 = vector.load %arg8[%c1_169, %c0_170, %c0_171] : memref<2x1x64xf32, #tpu.memory_space<vmem>>, vector<1x1x64xf32>
    %376 = vector.shape_cast %375 : vector<1x1x64xf32> to vector<1x64xf32>
    %377 = vector.broadcast %376 : vector<1x64xf32> to vector<16x64xf32>
    %378 = arith.addf %374, %377 : vector<16x64xf32>
    %cst_172 = arith.constant 0.000000e+00 : f32
    %379 = vector.broadcast %cst_172 : f32 to vector<16x64xf32>
    %380 = arith.maximumf %378, %379 : vector<16x64xf32>
    %381 = arith.truncf %380 : vector<16x64xf32> to vector<16x64xbf16>
    %c1_173 = arith.constant 1 : index
    %c0_174 = arith.constant 0 : index
    %c0_175 = arith.constant 0 : index
    %382 = vector.load %arg9[%c1_173, %c0_174, %c0_175] : memref<2x64x32xbf16, #tpu.memory_space<vmem>>, vector<1x64x32xbf16>
    %383 = vector.shape_cast %382 : vector<1x64x32xbf16> to vector<64x32xbf16>
    %cst_176 = arith.constant dense<0.000000e+00> : vector<16x32xf32>
    %384 = tpu.matmul %381, %383, %cst_176 {dimension_numbers = #tpu.dot_dimension_numbers<[1], [0], [0], [1], [0, 0, 1, 1], [], []>} : vector<16x64xbf16>, vector<64x32xbf16>, vector<16x32xf32> -> vector<16x32xf32>
    %c1_177 = arith.constant 1 : index
    %c0_178 = arith.constant 0 : index
    %c0_179 = arith.constant 0 : index
    %385 = vector.load %arg10[%c1_177, %c0_178, %c0_179] : memref<2x1x32xf32, #tpu.memory_space<vmem>>, vector<1x1x32xf32>
    %386 = vector.shape_cast %385 : vector<1x1x32xf32> to vector<1x32xf32>
    %387 = vector.broadcast %386 : vector<1x32xf32> to vector<16x32xf32>
    %388 = arith.addf %384, %387 : vector<16x32xf32>
    %389 = arith.addf %370, %388 : vector<16x32xf32>
    %c1_180 = arith.constant 1 : index
    %c0_181 = arith.constant 0 : index
    %c0_182 = arith.constant 0 : index
    %390 = vector.load %arg13[%c1_180, %c0_181, %c0_182] : memref<2x1x32xf32, #tpu.memory_space<vmem>>, vector<1x1x32xf32>
    %391 = vector.shape_cast %390 : vector<1x1x32xf32> to vector<1x32xf32>
    %c1_183 = arith.constant 1 : index
    %c0_184 = arith.constant 0 : index
    %c0_185 = arith.constant 0 : index
    %392 = vector.load %arg14[%c1_183, %c0_184, %c0_185] : memref<2x1x32xf32, #tpu.memory_space<vmem>>, vector<1x1x32xf32>
    %393 = vector.shape_cast %392 : vector<1x1x32xf32> to vector<1x32xf32>
    %cst_186 = arith.constant dense<0.000000e+00> : vector<16xf32>
    %394 = vector.multi_reduction <add>, %389, %cst_186 [1] : vector<16x32xf32> to vector<16xf32>
    %395 = vector.shape_cast %394 : vector<16xf32> to vector<16x1xf32>
    %cst_187 = arith.constant 3.200000e+01 : f32
    %396 = vector.broadcast %cst_187 : f32 to vector<16x1xf32>
    %397 = arith.divf %395, %396 : vector<16x1xf32>
    %398 = vector.broadcast %397 : vector<16x1xf32> to vector<16x32xf32>
    %399 = arith.subf %389, %398 : vector<16x32xf32>
    %400 = arith.mulf %399, %399 : vector<16x32xf32>
    %cst_188 = arith.constant dense<0.000000e+00> : vector<16xf32>
    %401 = vector.multi_reduction <add>, %400, %cst_188 [1] : vector<16x32xf32> to vector<16xf32>
    %402 = vector.shape_cast %401 : vector<16xf32> to vector<16x1xf32>
    %cst_189 = arith.constant 3.200000e+01 : f32
    %403 = vector.broadcast %cst_189 : f32 to vector<16x1xf32>
    %404 = arith.divf %402, %403 : vector<16x1xf32>
    %405 = vector.broadcast %397 : vector<16x1xf32> to vector<16x32xf32>
    %406 = arith.subf %389, %405 : vector<16x32xf32>
    %cst_190 = arith.constant 9.99999974E-6 : f32
    %407 = vector.broadcast %cst_190 : f32 to vector<16x1xf32>
    %408 = arith.addf %404, %407 : vector<16x1xf32>
    %409 = math.rsqrt %408 : vector<16x1xf32>
    %410 = vector.broadcast %409 : vector<16x1xf32> to vector<16x32xf32>
    %411 = arith.mulf %406, %410 : vector<16x32xf32>
    %412 = vector.broadcast %391 : vector<1x32xf32> to vector<16x32xf32>
    %413 = arith.mulf %411, %412 : vector<16x32xf32>
    %414 = vector.broadcast %393 : vector<1x32xf32> to vector<16x32xf32>
    %415 = arith.addf %413, %414 : vector<16x32xf32>
    %c0_191 = arith.constant 0 : index
    %c0_192 = arith.constant 0 : index
    %416 = vector.load %arg15[%c0_191, %c0_192] : memref<1x32xf32, #tpu.memory_space<vmem>>, vector<1x32xf32>
    %c0_193 = arith.constant 0 : index
    %c0_194 = arith.constant 0 : index
    %417 = vector.load %arg16[%c0_193, %c0_194] : memref<1x32xf32, #tpu.memory_space<vmem>>, vector<1x32xf32>
    %cst_195 = arith.constant dense<0.000000e+00> : vector<16xf32>
    %418 = vector.multi_reduction <add>, %415, %cst_195 [1] : vector<16x32xf32> to vector<16xf32>
    %419 = vector.shape_cast %418 : vector<16xf32> to vector<16x1xf32>
    %cst_196 = arith.constant 3.200000e+01 : f32
    %420 = vector.broadcast %cst_196 : f32 to vector<16x1xf32>
    %421 = arith.divf %419, %420 : vector<16x1xf32>
    %422 = vector.broadcast %421 : vector<16x1xf32> to vector<16x32xf32>
    %423 = arith.subf %415, %422 : vector<16x32xf32>
    %424 = arith.mulf %423, %423 : vector<16x32xf32>
    %cst_197 = arith.constant dense<0.000000e+00> : vector<16xf32>
    %425 = vector.multi_reduction <add>, %424, %cst_197 [1] : vector<16x32xf32> to vector<16xf32>
    %426 = vector.shape_cast %425 : vector<16xf32> to vector<16x1xf32>
    %cst_198 = arith.constant 3.200000e+01 : f32
    %427 = vector.broadcast %cst_198 : f32 to vector<16x1xf32>
    %428 = arith.divf %426, %427 : vector<16x1xf32>
    %429 = vector.broadcast %421 : vector<16x1xf32> to vector<16x32xf32>
    %430 = arith.subf %415, %429 : vector<16x32xf32>
    %cst_199 = arith.constant 9.99999974E-6 : f32
    %431 = vector.broadcast %cst_199 : f32 to vector<16x1xf32>
    %432 = arith.addf %428, %431 : vector<16x1xf32>
    %433 = math.rsqrt %432 : vector<16x1xf32>
    %434 = vector.broadcast %433 : vector<16x1xf32> to vector<16x32xf32>
    %435 = arith.mulf %430, %434 : vector<16x32xf32>
    %436 = vector.broadcast %416 : vector<1x32xf32> to vector<16x32xf32>
    %437 = arith.mulf %435, %436 : vector<16x32xf32>
    %438 = vector.broadcast %417 : vector<1x32xf32> to vector<16x32xf32>
    %439 = arith.addf %437, %438 : vector<16x32xf32>
    %c0_200 = arith.constant 0 : index
    %c0_201 = arith.constant 0 : index
    %c0_202 = arith.constant 0 : index
    %440 = vector.load %arg17[%c0_200, %c0_201, %c0_202] : memref<1x16x32xf32, #tpu.memory_space<vmem>>, vector<1x16x32xf32>
    %441 = vector.shape_cast %440 : vector<1x16x32xf32> to vector<16x32xf32>
    %442 = vector.shape_cast %439 : vector<16x32xf32> to vector<1x16x32xf32>
    tpu.vector_store %arg17[%c0_200, %c0_201, %c0_202], %442 {strides = array<i32>} : memref<1x16x32xf32, #tpu.memory_space<vmem>>, vector<1x16x32xf32>,
    return
  }
  func.func @transform_0(%arg0: i32) -> (i32, i32, i32) {
    %c0_i32 = arith.constant 0 : i32
    %c0_i32_0 = arith.constant 0 : i32
    %c0_i32_1 = arith.constant 0 : i32
    return %arg0, %c0_i32, %c0_i32_0 : i32, i32, i32
  }
  func.func @transform_1(%arg0: i32) -> (i32, i32) {
    %c0_i32 = arith.constant 0 : i32
    %c0_i32_0 = arith.constant 0 : i32
    %c0_i32_1 = arith.constant 0 : i32
    return %c0_i32, %c0_i32_0 : i32, i32
  }
  func.func @transform_2(%arg0: i32) -> (i32, i32, i32) {
    %c0_i32 = arith.constant 0 : i32
    %c0_i32_0 = arith.constant 0 : i32
    %c0_i32_1 = arith.constant 0 : i32
    %c0_i32_2 = arith.constant 0 : i32
    return %c0_i32, %c0_i32_0, %c0_i32_1 : i32, i32, i32
  }
  func.func @transform_3(%arg0: i32) -> (i32, i32, i32) {
    %c0_i32 = arith.constant 0 : i32
    %c0_i32_0 = arith.constant 0 : i32
    %c0_i32_1 = arith.constant 0 : i32
    %c0_i32_2 = arith.constant 0 : i32
    return %c0_i32, %c0_i32_0, %c0_i32_1 : i32, i32, i32
  }
  func.func @transform_4(%arg0: i32) -> (i32, i32, i32, i32) {
    %c0_i32 = arith.constant 0 : i32
    %c0_i32_0 = arith.constant 0 : i32
    %c0_i32_1 = arith.constant 0 : i32
    %c0_i32_2 = arith.constant 0 : i32
    %c0_i32_3 = arith.constant 0 : i32
    return %c0_i32, %c0_i32_0, %c0_i32_1, %c0_i32_2 : i32, i32, i32, i32
  }
  func.func @transform_5(%arg0: i32) -> (i32, i32, i32) {
    %c0_i32 = arith.constant 0 : i32
    %c0_i32_0 = arith.constant 0 : i32
    %c0_i32_1 = arith.constant 0 : i32
    %c0_i32_2 = arith.constant 0 : i32
    return %c0_i32, %c0_i32_0, %c0_i32_1 : i32, i32, i32
  }
  func.func @transform_6(%arg0: i32) -> (i32, i32, i32) {
    %c0_i32 = arith.constant 0 : i32
    %c0_i32_0 = arith.constant 0 : i32
    %c0_i32_1 = arith.constant 0 : i32
    %c0_i32_2 = arith.constant 0 : i32
    return %c0_i32, %c0_i32_0, %c0_i32_1 : i32, i32, i32
  }
  func.func @transform_7(%arg0: i32) -> (i32, i32, i32) {
    %c0_i32 = arith.constant 0 : i32
    %c0_i32_0 = arith.constant 0 : i32
    %c0_i32_1 = arith.constant 0 : i32
    %c0_i32_2 = arith.constant 0 : i32
    return %c0_i32, %c0_i32_0, %c0_i32_1 : i32, i32, i32
  }
  func.func @transform_8(%arg0: i32) -> (i32, i32, i32) {
    %c0_i32 = arith.constant 0 : i32
    %c0_i32_0 = arith.constant 0 : i32
    %c0_i32_1 = arith.constant 0 : i32
    %c0_i32_2 = arith.constant 0 : i32
    return %c0_i32, %c0_i32_0, %c0_i32_1 : i32, i32, i32
  }
  func.func @transform_9(%arg0: i32) -> (i32, i32, i32) {
    %c0_i32 = arith.constant 0 : i32
    %c0_i32_0 = arith.constant 0 : i32
    %c0_i32_1 = arith.constant 0 : i32
    %c0_i32_2 = arith.constant 0 : i32
    return %c0_i32, %c0_i32_0, %c0_i32_1 : i32, i32, i32
  }
  func.func @transform_10(%arg0: i32) -> (i32, i32, i32) {
    %c0_i32 = arith.constant 0 : i32
    %c0_i32_0 = arith.constant 0 : i32
    %c0_i32_1 = arith.constant 0 : i32
    %c0_i32_2 = arith.constant 0 : i32
    return %c0_i32, %c0_i32_0, %c0_i32_1 : i32, i32, i32
  }
  func.func @transform_11(%arg0: i32) -> (i32, i32, i32) {
    %c0_i32 = arith.constant 0 : i32
    %c0_i32_0 = arith.constant 0 : i32
    %c0_i32_1 = arith.constant 0 : i32
    %c0_i32_2 = arith.constant 0 : i32
    return %c0_i32, %c0_i32_0, %c0_i32_1 : i32, i32, i32
  }
  func.func @transform_12(%arg0: i32) -> (i32, i32, i32) {
    %c0_i32 = arith.constant 0 : i32
    %c0_i32_0 = arith.constant 0 : i32
    %c0_i32_1 = arith.constant 0 : i32
    %c0_i32_2 = arith.constant 0 : i32
    return %c0_i32, %c0_i32_0, %c0_i32_1 : i32, i32, i32
  }
  func.func @transform_13(%arg0: i32) -> (i32, i32, i32) {
    %c0_i32 = arith.constant 0 : i32
    %c0_i32_0 = arith.constant 0 : i32
    %c0_i32_1 = arith.constant 0 : i32
    %c0_i32_2 = arith.constant 0 : i32
    return %c0_i32, %c0_i32_0, %c0_i32_1 : i32, i32, i32
  }
  func.func @transform_14(%arg0: i32) -> (i32, i32) {
    %c0_i32 = arith.constant 0 : i32
    %c0_i32_0 = arith.constant 0 : i32
    %c0_i32_1 = arith.constant 0 : i32
    return %c0_i32, %c0_i32_0 : i32, i32
  }
  func.func @transform_15(%arg0: i32) -> (i32, i32) {
    %c0_i32 = arith.constant 0 : i32
    %c0_i32_0 = arith.constant 0 : i32
    %c0_i32_1 = arith.constant 0 : i32
    return %c0_i32, %c0_i32_0 : i32, i32
  }
  func.func @transform_16(%arg0: i32) -> (i32, i32, i32) {
    %c0_i32 = arith.constant 0 : i32
    %c0_i32_0 = arith.constant 0 : i32
    %c0_i32_1 = arith.constant 0 : i32
    return %arg0, %c0_i32, %c0_i32_0 : i32, i32, i32
  }
  func.func @transform_17(%arg0: i32) -> (i32, i32, i32, i32, i32) {
    %c0_i32 = arith.constant 0 : i32
    %c0_i32_0 = arith.constant 0 : i32
    %c0_i32_1 = arith.constant 0 : i32
    %c0_i32_2 = arith.constant 0 : i32
    %c0_i32_3 = arith.constant 0 : i32
    return %arg0, %c0_i32, %c0_i32_0, %c0_i32_1, %c0_i32_2 : i32, i32, i32, i32, i32
  }
  func.func @transform_18(%arg0: i32) -> (i32, i32, i32, i32, i32) {
    %c0_i32 = arith.constant 0 : i32
    %c0_i32_0 = arith.constant 0 : i32
    %c0_i32_1 = arith.constant 0 : i32
    %c0_i32_2 = arith.constant 0 : i32
    %c0_i32_3 = arith.constant 0 : i32
    return %arg0, %c0_i32, %c0_i32_0, %c0_i32_1, %c0_i32_2 : i32, i32, i32, i32, i32
  }
  func.func @transform_19(%arg0: i32) -> (i32, i32, i32, i32, i32) {
    %c0_i32 = arith.constant 0 : i32
    %c0_i32_0 = arith.constant 0 : i32
    %c0_i32_1 = arith.constant 0 : i32
    %c0_i32_2 = arith.constant 0 : i32
    %c0_i32_3 = arith.constant 0 : i32
    return %arg0, %c0_i32, %c0_i32_0, %c0_i32_1, %c0_i32_2 : i32, i32, i32, i32, i32
  }
}

</mosaic_0001>

<bundles_post_ra>
// kernel: tpu_custom_call.1
= control target key start
LH: loop header
LB: loop body
LE: loop exit
PB: predicated region body
PF: predicated region fallthrough
CT: control target
= control target key end

     0   :  { %s5880_s0 = inlined_call_operand.vmem [shape: f32[2,16,32], index: 0, kind: input, shape index: {}]   ;;  %s5881_s1 = inlined_call_operand.hbm [shape: f32[16,16], index: 1, kind: input, shape index: {}]   ;;  %s5882_s2 = inlined_call_operand.vmem [shape: bf16[2,32,128], index: 2, kind: input, shape index: {}]   ;;  %s5883_s3 = inlined_call_operand.vmem [shape: f32[2,1,128], index: 3, kind: input, shape index: {}]   ;;  %s5884_s4 = inlined_call_operand.vmem [shape: bf16[2,4,8,32], index: 4, kind: input, shape index: {}]   ;;  %s5885_s5 = inlined_call_operand.vmem [shape: f32[2,1,32], index: 5, kind: input, shape index: {}]   ;;  %s5886_s6 = inlined_call_operand.hbm [shape: bf16[2,32,64], index: 6, kind: input, shape index: {}]   ;;  %s5887_s7 = inlined_call_operand.vmem [shape: f32[2,1,64], index: 7, kind: input, shape index: {}]   ;;  %s5888_s8 = inlined_call_operand.vmem [shape: bf16[2,64,32], index: 8, kind: input, shape index: {}]   ;;  %s5889_s9 = inlined_call_operand.vmem [shape: f32[2,1,32], index: 9, kind: input, shape index: {}]   ;;  %s5890_s10 = inlined_call_operand.vmem [shape: f32[2,1,32], index: 10, kind: input, shape index: {}]   ;;  %s5891_s11 = inlined_call_operand.vmem [shape: f32[2,1,32], index: 11, kind: input, shape index: {}]   ;;  %s5892_s12 = inlined_call_operand.vmem [shape: f32[2,1,32], index: 12, kind: input, shape index: {}]   ;;  %s5893_s13 = inlined_call_operand.vmem [shape: f32[2,1,32], index: 13, kind: input, shape index: {}]   ;;  %s5894_s14 = inlined_call_operand.vmem [shape: f32[1,32], index: 14, kind: input, shape index: {}]   ;;  %s5895_s15 = inlined_call_operand.vmem [shape: f32[1,32], index: 15, kind: input, shape index: {}]   ;;  %s5896_s16 = inlined_call_operand.hbm [shape: f32[2,16,32], index: 16, kind: output, shape index: {0}]   ;;  %s5897_s17 = inlined_call_operand.hbm [shape: f32[2,2,4,16,16], index: 17, kind: output, shape index: {1}]   ;;  %s5898_s18 = inlined_call_operand.hbm [shape: f32[2,2,4,16,16], index: 18, kind: output, shape index: {2}]   ;;  %s5899_s19 = inlined_call_operand.vmem [shape: f32[2,2,4,16,1], index: 19, kind: output, shape index: {3}]  }
   0x1   :  { %5921 = sst [smem:[#allocation21_spill]] %s5880_s0 }
   0x2   :  { %5922 = sst [smem:[#allocation22_spill]] %s5881_s1 }
   0x3   :  { %5923 = sst [smem:[#allocation23_spill]] %s5882_s2 }
   0x4   :  { %5924 = sst [smem:[#allocation24_spill]] %s5883_s3 }
   0x5   :  { %5925 = sst [smem:[#allocation25_spill]] %s5884_s4 }
   0x6   :  { %5926 = sst [smem:[#allocation26_spill]] %s5885_s5 }
   0x7   :  { %5927 = sst [smem:[#allocation27_spill]] %s5886_s6 }
   0x8   :  { %5928 = sst [smem:[#allocation28_spill]] %s5894_s14 }
   0x9   :  { %5929 = sst [smem:[#allocation29_spill]] %s5895_s15 }
   0xa   :  { %5930 = sst [smem:[#allocation30_spill]] %s5896_s16 }
   0xb   :  { %5931 = sst [smem:[#allocation31_spill]] %s5898_s18 }
   0xc   :  { %25 = vsyncpa [#allocation3], 0 }
   0xd   :  { %26 = vsyncpa [#allocation6], 0 }
   0xe   :  { %27 = vsyncpa [#allocation4], 0 }
   0xf   :  { %29 = vsyncpa [#allocation4 + $0x1], 0 }
  0x10   :  { %30 = vsyncpa [#allocation9], 0 }
  0x11   :  { %32 = vsyncpa [#allocation9 + $0x1], 0  ;;  %s4831_s0 = smov 0   ;;  %s4833_s30 = smov 0  }
  0x12   :  { %s4835_s20 = smov 0   ;;  %s4837_s21 = smov 0  }
  0x13 LB: > { %5932 = sst [smem:[#allocation15_spill]] %s4694_s0  ;;  %s4852_s1 = sadd.s32 4294967295, %s4706_s21   ;;  %s4706_s21 = sphi %s4837_s21, %s5967_s21   ;;  %s4702_s20 = sphi %s4835_s20, %s5969_s20   ;;  %s4698_s30 = sphi %s4833_s30, %s5971_s30   ;;  %s4694_s0 = sphi %s4831_s0, %s5970_s0  }
  0x14   : > { %5933 = sst [smem:[#allocation16_spill]] %s4702_s20  ;;  %s5903_s22 = sadd.s32 4294967294, %s4706_s21  }
  0x15   : > { %5934 = sst [smem:[#allocation17_spill]] %s4706_s21  ;;  %s4856_s2 = sadd.s32 1, %s4706_s21  }
  0x16   : > { %5935 = sst [smem:[#allocation18_spill]] %s4856_s2  ;;  %s386_s23 = sadd.s32 1, %s4702_s20 }
  0x17   : > { %s383_s24 = ssub.s32 %s4706_s21, %s4856_s2  ;;  %p396_p0 = scmp.ne.s32.totalorder %s4702_s20, %s4698_s30 }
  0x18   : > { %p384_p1 = scmp.eq.s32.totalorder %s383_s24, 0  ;;  %p397_p2 = scmp.eq.s32.totalorder %s4852_s1, 1 }
  0x19   : > { %p402_p3 = scmp.ne.s32.totalorder %s4698_s30, %s4694_s0  ;;  %p403_p4 = scmp.eq.s32.totalorder %s5903_s22, 1 }
  0x1a   : > { %s4869_s25 = scalar_select %p384_p1, %s4702_s20, %s386_s23  }
  0x1b   : > { %p4871_p5 = por %p397_p2, %p396_p0  ;;  %p4875_p6 = por %p403_p4, %p402_p3 }
  0x1c   : > { %5936 = sst [smem:[#allocation19_spill]] %s4869_s25  ;;  %p3693_p7 = scmp.ge.s32.totalorder %s4706_s21, 1 }
  0x1d   : > { %s5937_s3 = scalar_select %p4871_p5, 1, 0 }
  0x1e   : > { %s5938_s26 = scalar_select %p4875_p6, 1, 0 }
  0x1f   : > { %p488_p8 = scmp.lt.s32.totalorder %s4706_s21, 3  ;;  %p5912_p9 = scmp.eq.s32.totalorder %s4852_s1, 0 }
  0x20   : > { %5939 = sst [smem:[#allocation20_spill]] %s5938_s26  ;;  %s4708_s28 = smov [#allocation2]  }
  0x21   : > { %p4882_p10 = pnand %p3693_p7, %p488_p8  ;;  %s500_s29 = sshll.u32 %s4708_s28, 4  ;;  %s501_s29 = int_to_ptr.vmem [resolvable:$true] %s500_s29 }
  0x22   : > { %s4709_s24 = smov [#allocation5]   ;;  %s5942_s2 = sld [smem:[#allocation22_spill]] }
  0x23   : > { %s5940_s27 = scalar_select %p4882_p10, 1, 0 }
  0x24   : > { %p4154_p11 = pneg %p4882_p10  ;;  %s525_s22 = sshll.u32 %s4709_s24, 4  ;;  %s4894_s22 = int_to_ptr.vmem [resolvable:$true] %s525_s22 }
  0x26   : > { %p4890_p12 = pnand %p5912_p9, %p4154_p11 }
  0x28   : > { %s4520_s26 = scalar_lea.hbm %s5942_s2, 256  ;;  %p4522_p0 = pneg %p4890_p12 }
  0x29   : > { %p4521_p13 = scmp.ne.s32.totalorder %s5942_s2, %s4520_s26  ;;  %p4527_p3 = scmp.lt.u32.totalorder %s4520_s26, %s5942_s2 }
  0x2b   : > { %p4523_p1 = pnand %p4522_p0, %p4521_p13 }
  0x2d   : > { %p4524_p2 = pneg %p4523_p1 }
  0x2f   : > { %p4529_p4 = pnand %p4527_p3, %p4524_p2 }
  0x31   : > { %4532 = shalt.err (!%p4529_p4)
}
  0x32   : > { %s4533_s24 = scalar_lea.vmem %s501_s29, 256  ;;  %p4541_p9 = scmp.lt.s32.totalorder %s501_s29, %s501_s29 }
  0x33   : > { %p4534_p7 = scmp.ne.s32.totalorder %s501_s29, %s4533_s24  ;;  %p4542_p6 = scmp.lt.s32.totalorder %s4533_s24, %s4533_s24 }
  0x35   : > { %p4536_p8 = pnand %p4534_p7, %p4522_p0  ;;  %p4543_p5 = por %p4542_p6, %p4541_p9 }
  0x37   : > { %p4537_p11 = pneg %p4536_p8 }
  0x39   : > { %p4544_p10 = pnand %p4543_p5, %p4537_p11 }
  0x3b   : > { %4547 = shalt.err (!%p4544_p10)
}
  0x3c   : > { %s4710_s0 = smov 128   ;;  %s4711_s20 = smov 8  }
  0x3d   : > { %4157 = dma.hbm_to_vmem [thread:$0]  (!%p4890_p12), %s5942_s2, 256, %s501_s29, [#allocation3], %s4710_s0, %s4710_s0, %s4711_s20  }
  0x3e   : > { %s5943_s6 = sld [smem:[#allocation27_spill]] }
  0x44   : > { %s4548_s28 = scalar_lea.hbm %s5943_s6, 512 }
  0x45   : > { %p4549_p13 = scmp.ne.s32.totalorder %s5943_s6, %s4548_s28  ;;  %p4555_p9 = scmp.lt.u32.totalorder %s4548_s28, %s5943_s6 }
  0x47   : > { %p4551_p5 = pnand %p4549_p13, %p4522_p0 }
  0x49   : > { %p4552_p6 = pneg %p4551_p5 }
  0x4b   : > { %p4557_p10 = pnand %p4555_p9, %p4552_p6 }
  0x4d   : > { %4560 = shalt.err (!%p4557_p10)
}
  0x4e   : > { %s4561_s29 = scalar_lea.vmem %s4894_s22, 512  ;;  %p4569_p4 = scmp.lt.s32.totalorder %s4894_s22, %s4894_s22 }
  0x4f   : > { %p4562_p1 = scmp.ne.s32.totalorder %s4894_s22, %s4561_s29  ;;  %p4570_p7 = scmp.lt.s32.totalorder %s4561_s29, %s4561_s29 }
  0x51   : > { %p4564_p2 = pnand %p4562_p1, %p4522_p0  ;;  %p4571_p8 = por %p4570_p7, %p4569_p4 }
  0x53   : > { %p4565_p3 = pneg %p4564_p2 }
  0x55   : > { %p4572_p11 = pnand %p4571_p8, %p4565_p3 }
  0x57   : > { %4575 = shalt.err (!%p4572_p11)
}
  0x58   : > { %s4712_s14 = smov 64   ;;  %s4713_s15 = smov 4  }
  0x59   : > { %4160 = dma.hbm_to_vmem [thread:$0]  (!%p4890_p12), %s5943_s6, 512, %s4894_s22, [#allocation6], %s4712_s14, %s4712_s14, %s4713_s15  }
  0x5a   : > { %p5944_p13 = scmp.ne.s32.totalorder %s5940_s27, 0 }
  0x5b   : > { %p5945_p0 = scmp.eq.s32.totalorder (!%p5944_p13), %s4852_s1, 0 }
  0x5c   : > { %576 = sbr.rel (%p5944_p13) target bundleno = 5538 (0x15a2), region = 84 }
  0x63   : > { %4677 = dma.done.wait (%p5945_p0), [#allocation3], 256   ;;  %p5946_p5 = pmov %p5945_p0 }
  0x64   : > { %p5947_p6 = pmov %p5945_p0 }
  0x65   : > { %4679 = vsyncadd (%p5946_p5), [#allocation3], 4294967040 }
  0x66   : > { %4681 = dma.done.wait (%p5947_p6), [#allocation6], 512   ;;  %p5948_p9 = pmov %p5945_p0 }
  0x67   : > { %p651_p10 = scmp.lt.s32.totalorder %s4852_s1, 1  ;;  %v4714_v0 = vmov 0.0   ;;  %vm4715_vm0 = vmmov 0   ;;  %s5949_s16 = sld [smem:[#allocation21_spill]]  ;;  %vm694_vm1 = vcmask 261120   ;;  %vm1082_vm2 = vcmask 64512  }
  0x68   : > { %4683 = vsyncadd (%p5948_p9), [#allocation6], 4294966784  ;;  %3940 = vmatprep.subr.bf16.mxu1 %v4714_v0  ;;  %3944 = vmatprep.mubr.msk.bf16.mxu1 %vm4715_vm0, %v4714_v0  ;;  %s5950_s28 = sld [smem:[#allocation23_spill]]  ;;  %s5951_s18 = sld [smem:[#allocation24_spill]]  ;;  %vm1048_vm3 = vcmask 130048   ;;  %vm1584_vm4 = vcmask 1043456  }
  0x69   : > { %s4958_s22 = scalar_select %p651_p10, %s4852_s1, 1  ;;  %3954 = vmatprep.subr.bf16.mxu0 %v4714_v0  ;;  %3956 = vmatprep.mubr.msk.bf16.mxu0 %vm4715_vm0, %v4714_v0  ;;  %vm1946_vm5 = vcmask 523264   ;;  %vm887_vm6 = vcmask 7168  }
  0x6a   : > { %s4716_s0 = smov 104   ;;  %s4718_s23 = smov 112  }
  0x6b   : > { %s3865_s27 = sshll.u32 %s4958_s22, 4  ;;  %s4719_s20 = smov 96  }
  0x6c   : > { %s5952_s4 = sld [smem:[#allocation25_spill]]  ;;  %s5953_s5 = sld [smem:[#allocation26_spill]] }
  0x6d   : > { %s655_s21 = scalar_lea.vmem %s5949_s16, %s3865_s27  ;;  %s4717_s27 = smov 120  }
  0x6e   : > { %v4260_v1 = vld [vmem:[%s5950_s28] sm:$0xff]   ;;  %v4261_v2 = vld [vmem:[%s5950_s28 + $0x8] sm:$0xff]   ;;  %s5917_s16 = smov 64   ;;  %p5956_p1 = scmp.ne.s32.totalorder %s5937_s3, 0 }
  0x6f   : > { %3941 = vmatpush3.bf16.msra.mxu1 %v4260_v1  ;;  %v4973_v3 = vld [vmem:[%s655_s21] sm:$0xff]  ;;  %v4975_v4 = vld [vmem:[%s655_s21 + $0x8] sm:$0xff]  ;;  %s5071_s21 = sand.u32 1, %s4698_s30  }
  0x70   : > { %3942 = vmatprep.subr.bf16.mxu1 %v4714_v0  ;;  %v670_v5 = vpack.c.bf16 %v4975_v4, %v4973_v3  ;;  %v3707_v6 = vld [vmem:[%s5951_s18] ss:$0 sm:$0xff]  ;;  %s5916_s25 = sshll.u32 %s5071_s21, 7 }
  0x71   : > { %s5077_s26 = scalar_lea.vmem [#allocation8], %s5916_s25 }
  0x72   : > { %s3503_s25 = sshll.u32 %s5077_s26, 4  ;;  %s5741_s25 = int_to_ptr.vmem [resolvable:$true] %s3503_s25 }
  0x73   : > { %3943 = vmatpush3.bf16.msra.mxu1 %v4261_v2 }
  0x74   : > { %3948 = vmatprep.subr.bf16.mxu1 %v4714_v0 }
  0x76   : > { %3945 = vmatmul.mubr.msk.bf16.vlgmr.msra.gmra.mrb[0].mxu1 %vm694_vm1, %v670_v5 }
  0x77   : > { %3950 = vmatprep.mubr.msk.bf16.mxu1 %vm4715_vm0, %v4714_v0 }
 0x149   : > { %v732_v7 = vpop.f32.mrb[0].mxu1 }
 0x14a   : > { %v3946_v8 = vpop.f32.mrb[1].mxu1  ;;  %v4987_v10 = vadd.f32 %v3707_v6, %v732_v7 }
 0x14b   : > { %v735_v9 = vpop.f32.mrb[2].mxu1 }
 0x14c   : > { %v4989_v11 = vadd.f32 %v3707_v6, %v735_v9  ;;  %v3947_v12 = vpop.f32.mrb[3].mxu1 }
 0x14e   : > { %v4238_v13 = vpack.i.bf16 %v4989_v11, %v4987_v10  ;;  %v4997_v14 = vpack.c.bf16 %v4989_v11, %v4987_v10 }
 0x150   : > { %4239 = vrot.lane.b32.xlu1 %v4238_v13, %s4716_s0  ;;  %4229 = vrot.lane.b32.xlu0 %v4238_v13, %s4717_s27 }
 0x154   : > { %4234 = vrot.lane.b32.xlu0 %v4238_v13, %s4718_s23  ;;  %1080 = vrot.lane.b32.xlu1 %v4997_v14, %s4719_s20 }
 0x1c2   : > { %v4240_v15 = vpop.permute.xlu1 %4239  ;;  %v4230_v16 = vpop.permute.xlu0 %4229 }
 0x1c3   : > { %v4232_v17 = vunpack.i.h.bf16 %v4230_v16  ;;  %v4231_v18 = vunpack.i.l.bf16 %v4230_v16  ;;  %v4242_v19 = vunpack.i.h.bf16 %v4240_v15  ;;  %v4241_v20 = vunpack.i.l.bf16 %v4240_v15 }
 0x1c5   : > { %v5002_v21 = vpack.c.bf16 %v4232_v17, %v4231_v18  ;;  %v5007_v27 = vpack.c.bf16 %v4242_v19, %v4241_v20 }
 0x1c6   : > { %v4235_v22 = vpop.permute.xlu0 %4234  ;;  %v1081_v23 = vpop.permute.xlu1 %1080 }
 0x1c7   : > { %v4237_v24 = vunpack.i.h.bf16 %v4235_v22  ;;  %v4236_v25 = vunpack.i.l.bf16 %v4235_v22  ;;  %v1087_v26 = vsel %vm1082_vm2, %v1081_v23, 0  ;;  %1131 = vrot.lane.b32.xlu0 %v5002_v21, %s4719_s20 }
 0x1c8   : > { %3949 = vmatpush3.bf16.xpose.msra.mxu1 %v1087_v26 }
 0x1c9   : > { %v5009_v28 = vpack.c.bf16 %v4237_v24, %v4236_v25  ;;  %3960 = vmatprep.subr.bf16.mxu1 %v4714_v0 }
 0x1cb   : > { %1231 = vrot.lane.b32.xlu0 %v5007_v27, %s4719_s20  ;;  %1181 = vrot.lane.b32.xlu1 %v5009_v28, %s4719_s20 }
 0x1cf   : > { %3951 = vmatmul.mubr.msk.bf16.vlgmr.msra.gmra.mrb[4].mxu1 %vm1082_vm2, %v4997_v14 }
 0x1d0   : > { %3962 = vmatprep.mubr.msk.bf16.mxu1 %vm4715_vm0, %v4714_v0 }
 0x239   : > { %v1132_v29 = vpop.permute.xlu0 %1131 }
 0x23a   : > { %v1137_v30 = vsel %vm1082_vm2, %v1132_v29, 0 }
 0x23b   : > { %3955 = vmatpush3.bf16.xpose.msra.mxu0 %v1137_v30 }
 0x23c   : > { %3966 = vmatprep.subr.bf16.mxu0 %v4714_v0 }
 0x23d   : > { %v1182_v31 = vpop.permute.xlu1 %1181  ;;  %v1232_v33 = vpop.permute.xlu0 %1231 }
 0x23e   : > { %v1187_v32 = vsel %vm1082_vm2, %v1182_v31, 0  ;;  %v1237_v34 = vsel %vm1082_vm2, %v1232_v33, 0 }
 0x23f   : > { %3961 = vmatpush3.bf16.xpose.msra.mxu1 %v1187_v32 }
 0x240   : > { %3972 = vmatprep.subr.bf16.mxu1 %v4714_v0 }
 0x242   : > { %3957 = vmatmul.mubr.msk.bf16.vlgmr.msra.gmra.mrb[0].mxu0 %vm1082_vm2, %v5002_v21 }
 0x243   : > { %3967 = vmatpush3.bf16.xpose.msra.mxu0 %v1237_v34  ;;  %3968 = vmatprep.mubr.msk.bf16.mxu0 %vm4715_vm0, %v4714_v0 }
 0x244   : > { %3978 = vmatprep.subr.bf16.mxu0 %v4714_v0 }
 0x246   : > { %3963 = vmatmul.mubr.msk.bf16.vlgmr.msra.gmra.mrb[8].mxu1 %vm1082_vm2, %v5009_v28 }
 0x247   : > { %3974 = vmatprep.mubr.msk.bf16.mxu1 %vm4715_vm0, %v4714_v0 }
 0x24a   : > { %3969 = vmatmul.mubr.msk.bf16.vlgmr.msra.gmra.mrb[4].mxu0 %vm1082_vm2, %v5007_v27 }
 0x24b   : > { %3980 = vmatprep.mubr.msk.bf16.mxu0 %vm4715_vm0, %v4714_v0 }
 0x2a2   : > { %v1123_v35 = vpop.f32.mrb[4].mxu1 }
 0x2a3   : > { %v1280_v36 = vmul.f32 0.35355338, %v1123_v35  ;;  %v3952_v37 = vpop.f32.mrb[5].mxu1 }
 0x2a4   : > { %v1126_v38 = vpop.f32.mrb[6].mxu1 }
 0x2a5   : > { %v1281_v39 = vmul.f32 0.35355338, %v1126_v38  ;;  %v3953_v40 = vpop.f32.mrb[7].mxu1  ;;  %v1288_v41 = vsel %vm1048_vm3, %v1280_v36, -inf }
 0x2a6   : > { %1289 = vmax.xlane.f32.xlu1 %v1288_v41 }
 0x2a7   : > { %v1291_v42 = vsel %vm1048_vm3, %v1281_v39, -inf }
 0x2a8   : > { %1292 = vmax.xlane.f32.xlu0 %v1291_v42 }
 0x315   : > { %v1173_v43 = vpop.f32.mrb[0].mxu0 }
 0x316   : > { %v1282_v44 = vmul.f32 0.35355338, %v1173_v43  ;;  %v3958_v45 = vpop.f32.mrb[1].mxu0 }
 0x317   : > { %v1176_v46 = vpop.f32.mrb[2].mxu0 }
 0x318   : > { %v1283_v47 = vmul.f32 0.35355338, %v1176_v46  ;;  %v3959_v48 = vpop.f32.mrb[3].mxu0  ;;  %v1294_v49 = vsel %vm1048_vm3, %v1282_v44, -inf }
 0x319   : > { %1295 = vmax.xlane.f32.xlu0 %v1294_v49  ;;  %v1223_v50 = vpop.f32.mrb[8].mxu1 }
 0x31a   : > { %v1284_v51 = vmul.f32 0.35355338, %v1223_v50  ;;  %v3964_v52 = vpop.f32.mrb[9].mxu1  ;;  %v1297_v53 = vsel %vm1048_vm3, %v1283_v47, -inf }
 0x31b   : > { %1298 = vmax.xlane.f32.xlu1 %v1297_v53  ;;  %v1226_v54 = vpop.f32.mrb[10].mxu1 }
 0x31c   : > { %v1285_v55 = vmul.f32 0.35355338, %v1226_v54  ;;  %v3965_v56 = vpop.f32.mrb[11].mxu1  ;;  %v1300_v57 = vsel %vm1048_vm3, %v1284_v51, -inf }
 0x31d   : > { %v1273_v58 = vpop.f32.mrb[4].mxu0  ;;  %1301 = vmax.xlane.f32.xlu0 %v1300_v57 }
 0x31e   : > { %v1286_v59 = vmul.f32 0.35355338, %v1273_v58  ;;  %v3970_v60 = vpop.f32.mrb[5].mxu0  ;;  %v1303_v61 = vsel %vm1048_vm3, %v1285_v55, -inf }
 0x31f   : > { %v1276_v62 = vpop.f32.mrb[6].mxu0  ;;  %1304 = vmax.xlane.f32.xlu1 %v1303_v61 }
 0x320   : > { %v1287_v63 = vmul.f32 0.35355338, %v1276_v62  ;;  %v3971_v1 = vpop.f32.mrb[7].mxu0  ;;  %v1306_v2 = vsel %vm1048_vm3, %v1286_v59, -inf }
 0x321   : > { %1307 = vmax.xlane.f32.xlu0 %v1306_v2 }
 0x322   : > { %v1309_v5 = vsel %vm1048_vm3, %v1287_v63, -inf }
 0x323   : > { %1310 = vmax.xlane.f32.xlu1 %v1309_v5 }
 0x333   : > { %v1290_v6 = vpop.xlane.xlu1 %1289 }
 0x334   : > { %1435 = vrot.lane.b32.xlu1 %v5002_v21, %s5917_s16  ;;  %v1312_v8 = vsub.f32 %v1280_v36, %v1290_v6 }
 0x335   : > { %v1293_v7 = vpop.xlane.xlu0 %1292 }
 0x336   : > { %v1313_v9 = vsub.f32 %v1281_v39, %v1293_v7  ;;  %v1320_v12 = vmul.f32 1.442695, %v1312_v8 }
 0x337   : > { %1388 = vrot.lane.b32.xlu0 %v4997_v14, %s5917_s16 }
 0x338   : > { %v1322_v13 = vmul.f32 1.442695, %v1313_v9  ;;  %4276 = vpow2.f32 %v1320_v12 }
 0x33a   : > { %4278 = vpow2.f32 %v1322_v13 }
 0x342   : > { %v5050_v15 = vpop.eup %4276 }
 0x343   : > { %v1336_v17 = vsel %vm1048_vm3, %v5050_v15, 0.0 }
 0x344   : > { %v5052_v16 = vpop.eup %4278 }
 0x345   : > { %v1339_v18 = vsel %vm1048_vm3, %v5052_v16, 0.0 }
 0x356   : > { %1337 = vadd.xlane.f32.xlu0 %v1336_v17 }
 0x358   : > { %1340 = vadd.xlane.f32.xlu1 %v1339_v18 }
 0x3a6   : > { %v1296_v14 = vpop.xlane.xlu0 %1295 }
 0x3a7   : > { %v1314_v19 = vsub.f32 %v1282_v44, %v1296_v14 }
 0x3a8   : > { %v1299_v20 = vpop.xlane.xlu1 %1298 }
 0x3a9   : > { %v1324_v21 = vmul.f32 1.442695, %v1314_v19  ;;  %v1315_v22 = vsub.f32 %v1283_v47, %v1299_v20  ;;  %v1577_v19 = vld [vmem:[%s5952_s4] sm:$0xf] }
 0x3aa   : > { %v1302_v23 = vpop.xlane.xlu0 %1301 }
 0x3ab   : > { %4280 = vpow2.f32 %v1324_v21  ;;  %v1326_v24 = vmul.f32 1.442695, %v1315_v22  ;;  %v1316_v25 = vsub.f32 %v1284_v51, %v1302_v23  ;;  %v1633_v22 = vsel %vm1584_vm4, %v1577_v19, 0  ;;  %v3735_v23 = vld [vmem:[%s5952_s4 + $0x4] sm:$0xf] }
 0x3ac   : > { %v1305_v26 = vpop.xlane.xlu1 %1304 }
 0x3ad   : > { %4282 = vpow2.f32 %v1326_v24  ;;  %v1328_v29 = vmul.f32 1.442695, %v1316_v25  ;;  %v1317_v30 = vsub.f32 %v1285_v55, %v1305_v26  ;;  %v1586_v24 = vsel %vm1584_vm4, %v3735_v23, 0  ;;  %v3740_v26 = vld [vmem:[%s5952_s4 + $0xc] sm:$0xf] }
 0x3ae   : > { %v1308_v31 = vpop.xlane.xlu0 %1307 }
 0x3af   : > { %4284 = vpow2.f32 %v1328_v29  ;;  %v1330_v32 = vmul.f32 1.442695, %v1317_v30  ;;  %v1318_v33 = vsub.f32 %v1286_v59, %v1308_v31 }
 0x3b0   : > { %v1311_v34 = vpop.xlane.xlu1 %1310 }
 0x3b1   : > { %4286 = vpow2.f32 %v1330_v32  ;;  %v1332_v35 = vmul.f32 1.442695, %v1318_v33  ;;  %v1319_v36 = vsub.f32 %v1287_v63, %v1311_v34  ;;  %v1735_v33 = vsel %vm1584_vm4, %v3740_v26, 0 }
 0x3b2   : > { %v1389_v37 = vpop.permute.xlu0 %1388 }
 0x3b3   : > { %4288 = vpow2.f32 %v1332_v35  ;;  %v1334_v38 = vmul.f32 1.442695, %v1319_v36  ;;  %3973 = vmatpush3.bf16.msra.mxu1 %v1389_v37  ;;  %v3738_v35 = vld [vmem:[%s5952_s4 + $0x8] sm:$0xf] }
 0x3b4   : > { %v1436_v39 = vpop.permute.xlu1 %1435  ;;  %3984 = vmatprep.subr.bf16.mxu1 %v4714_v0 }
 0x3b5   : > { %v4281_v40 = vpop.eup %4280  ;;  %4290 = vpow2.f32 %v1334_v38  ;;  %3979 = vmatpush3.bf16.msra.mxu0 %v1436_v39 }
 0x3b6   : > { %v1342_v41 = vsel %vm1048_vm3, %v4281_v40, 0.0  ;;  %3990 = vmatprep.subr.bf16.mxu0 %v4714_v0 }
 0x3b7   : > { %v4283_v42 = vpop.eup %4282  ;;  %1343 = vadd.xlane.f32.xlu0 %v1342_v41 }
 0x3b8   : > { %v1345_v43 = vsel %vm1048_vm3, %v4283_v42, 0.0 }
 0x3b9   : > { %v4285_v44 = vpop.eup %4284  ;;  %1346 = vadd.xlane.f32.xlu1 %v1345_v43 }
 0x3ba   : > { %v1348_v45 = vsel %vm1048_vm3, %v4285_v44, 0.0 }
 0x3bb   : > { %v4287_v46 = vpop.eup %4286  ;;  %1349 = vadd.xlane.f32.xlu0 %v1348_v45 }
 0x3bc   : > { %v1351_v47 = vsel %vm1048_vm3, %v4287_v46, 0.0 }
 0x3bd   : > { %v4289_v48 = vpop.eup %4288  ;;  %1352 = vadd.xlane.f32.xlu1 %v1351_v47 }
 0x3be   : > { %v1354_v49 = vsel %vm1048_vm3, %v4289_v48, 0.0 }
 0x3bf   : > { %v4291_v50 = vpop.eup %4290  ;;  %1355 = vadd.xlane.f32.xlu0 %v1354_v49 }
 0x3c0   : > { %v1357_v51 = vsel %vm1048_vm3, %v4291_v50, 0.0 }
 0x3c1   : > { %1358 = vadd.xlane.f32.xlu1 %v1357_v51 }
 0x3d2   : > { %1482 = vrot.lane.b32.xlu1 %v5009_v28, %s5917_s16 }
 0x3d5   : > { %1529 = vrot.lane.b32.xlu0 %v5007_v27, %s5917_s16  ;;  %s4724_s16 = smov 32  }
 0x3e3   : > { %v1338_v52 = vpop.xlane.xlu0 %1337 }
 0x3e4   : > { %4292 = vrcp.f32 %v1338_v52 }
 0x3e5   : > { %v1341_v53 = vpop.xlane.xlu1 %1340 }
 0x3e6   : > { %4294 = vrcp.f32 %v1341_v53 }
 0x3ee   : > { %v4293_v54 = vpop.eup %4292 }
 0x3ef   : > { %v1361_v55 = vmul.f32 %v4293_v54, %v5050_v15 }
 0x3f0   : > { %v4295_v56 = vpop.eup %4294 }
 0x3f1   : > { %1376 = vst.msk [vmem:[%s5077_s26] sm:$0xff] %vm1048_vm3, %v1361_v55  ;;  %v1363_v27 = vmul.f32 %v4295_v56, %v5052_v16 }
 0x3f3   : > { %1377 = vst.msk [vmem:[%s5077_s26 + $0x8] sm:$0xff] %vm1048_vm3, %v1363_v27  ;;  %v1384_v28 = vpack.c.bf16 %v1363_v27, %v1361_v55 }
 0x3f5   : > { %3975 = vmatmul.mubr.msk.bf16.vlgmr.msra.gmra.mrb[12].mxu1 %vm1048_vm3, %v1384_v28 }
 0x3f6   : > { %3986 = vmatprep.mubr.msk.bf16.mxu1 %vm4715_vm0, %v4714_v0 }
 0x444   : > { %v1344_v57 = vpop.xlane.xlu0 %1343 }
 0x445   : > { %4296 = vrcp.f32 %v1344_v57 }
 0x446   : > { %v1347_v58 = vpop.xlane.xlu1 %1346 }
 0x447   : > { %4298 = vrcp.f32 %v1347_v58 }
 0x448   : > { %v1350_v59 = vpop.xlane.xlu0 %1349 }
 0x449   : > { %4300 = vrcp.f32 %v1350_v59 }
 0x44a   : > { %v1353_v60 = vpop.xlane.xlu1 %1352 }
 0x44b   : > { %4302 = vrcp.f32 %v1353_v60 }
 0x44c   : > { %v1356_v61 = vpop.xlane.xlu0 %1355 }
 0x44d   : > { %4304 = vrcp.f32 %v1356_v61 }
 0x44e   : > { %v1359_v62 = vpop.xlane.xlu1 %1358 }
 0x44f   : > { %v4297_v63 = vpop.eup %4296  ;;  %4306 = vrcp.f32 %v1359_v62 }
 0x450   : > { %v1365_v1 = vmul.f32 %v4297_v63, %v4281_v40  ;;  %v1530_v15 = vpop.permute.xlu0 %1529  ;;  %v1683_v40 = vsel %vm1584_vm4, %v3738_v35, 0 }
 0x451   : > { %v4299_v2 = vpop.eup %4298 }
 0x452   : > { %1378 = vst.msk [vmem:[%s5077_s26 + $0x10] sm:$0xff] %vm1048_vm3, %v1365_v1  ;;  %v1367_v5 = vmul.f32 %v4299_v2, %v4283_v42  ;;  %v1483_v6 = vpop.permute.xlu1 %1482 }
 0x453   : > { %v4301_v7 = vpop.eup %4300  ;;  %3985 = vmatpush3.bf16.msra.mxu1 %v1483_v6 }
 0x454   : > { %1379 = vst.msk [vmem:[%s5077_s26 + $0x18] sm:$0xff] %vm1048_vm3, %v1367_v5  ;;  %v1369_v8 = vmul.f32 %v4301_v7, %v4285_v44  ;;  %v1385_v9 = vpack.c.bf16 %v1367_v5, %v1365_v1  ;;  %3996 = vmatprep.subr.bf16.mxu1 %v4714_v0  ;;  %v3742_v1 = vld [vmem:[%s5953_s5] ss:$0 sm:$0xff] }
 0x455   : > { %v4303_v12 = vpop.eup %4302 }
 0x456   : > { %1380 = vst.msk [vmem:[%s5077_s26 + $0x20] sm:$0xff] %vm1048_vm3, %v1369_v8  ;;  %v1371_v13 = vmul.f32 %v4303_v12, %v4287_v46  ;;  %3981 = vmatmul.mubr.msk.bf16.vlgmr.msra.gmra.mrb[8].mxu0 %vm1048_vm3, %v1385_v9 }
 0x457   : > { %v4305_v16 = vpop.eup %4304  ;;  %3991 = vmatpush3.bf16.msra.mxu0 %v1530_v15  ;;  %3992 = vmatprep.mubr.msk.bf16.mxu0 %vm4715_vm0, %v4714_v0 }
 0x458   : > { %1381 = vst.msk [vmem:[%s5077_s26 + $0x28] sm:$0xff] %vm1048_vm3, %v1371_v13  ;;  %v1373_v17 = vmul.f32 %v4305_v16, %v4289_v48  ;;  %v1386_v18 = vpack.c.bf16 %v1371_v13, %v1369_v8  ;;  %4002 = vmatprep.subr.bf16.mxu0 %v4714_v0 }
 0x459   : > { %v4307_v14 = vpop.eup %4306 }
 0x45a   : > { %1382 = vst.msk [vmem:[%s5077_s26 + $0x30] sm:$0xff] %vm1048_vm3, %v1373_v17  ;;  %v1375_v20 = vmul.f32 %v4307_v14, %v4291_v50  ;;  %3987 = vmatmul.mubr.msk.bf16.vlgmr.msra.gmra.mrb[16].mxu1 %vm1048_vm3, %v1386_v18 }
 0x45b   : > { %3998 = vmatprep.mubr.msk.bf16.mxu1 %vm4715_vm0, %v4714_v0  ;;  %3997 = vmatpush3.bf16.msra.mxu1 %v1586_v24 }
 0x45c   : > { %1383 = vst.msk [vmem:[%s5077_s26 + $0x38] sm:$0xff] %vm1048_vm3, %v1375_v20  ;;  %v1387_v21 = vpack.c.bf16 %v1375_v20, %v1373_v17  ;;  %4008 = vmatprep.subr.bf16.mxu1 %v4714_v0 }
 0x45e   : > { %3993 = vmatmul.mubr.msk.bf16.vlgmr.msra.gmra.mrb[12].mxu0 %vm1048_vm3, %v1387_v21 }
 0x45f   : > { %4003 = vmatpush3.bf16.msra.mxu0 %v1633_v22  ;;  %4004 = vmatprep.mubr.msk.bf16.mxu0 %vm4715_vm0, %v4714_v0 }
 0x460   : > { %4014 = vmatprep.subr.bf16.mxu0 %v4714_v0 }
 0x4c8   : > { %v1428_v25 = vpop.f32.mrb[12].mxu1 }
 0x4c9   : > { %v3976_v29 = vpop.f32.mrb[13].mxu1 }
 0x4ca   : > { %v1431_v30 = vpop.f32.mrb[14].mxu1 }
 0x4cb   : > { %v1576_v31 = vpack.c.bf16 %v1431_v30, %v1428_v25  ;;  %v3977_v32 = vpop.f32.mrb[15].mxu1  ;;  %v4262_v30 = vld [vmem:[#allocation5] sm:$0xff]  }
 0x4cc   : > { %v4265_v32 = vld [vmem:[%s5888_s8 + $0x8] sm:$0xff]  }
 0x4cd   : > { %4005 = vmatmul.mubr.msk.bf16.vlgmr.msra.gmra.mrb[16].mxu0 %vm1082_vm2, %v1576_v31  ;;  %v4264_v31 = vld [vmem:[%s5888_s8] sm:$0xff]  }
 0x4ce   : > { %4015 = vmatpush3.bf16.msra.mxu0 %v1735_v33  ;;  %4016 = vmatprep.mubr.msk.bf16.mxu0 %vm4715_vm0, %v4714_v0 }
 0x4cf   : > { %4028 = vmatprep.subr.bf16.mxu0 %v4714_v0 }
 0x529   : > { %v1475_v34 = vpop.f32.mrb[8].mxu0 }
 0x52a   : > { %v3982_v36 = vpop.f32.mrb[9].mxu0 }
 0x52b   : > { %v1478_v37 = vpop.f32.mrb[10].mxu0 }
 0x52c   : > { %v1578_v38 = vpack.c.bf16 %v1478_v37, %v1475_v34  ;;  %v3983_v39 = vpop.f32.mrb[11].mxu0 }
 0x52d   : > { %v1522_v41 = vpop.f32.mrb[16].mxu1 }
 0x52e   : > { %v3988_v42 = vpop.f32.mrb[17].mxu1  ;;  %3999 = vmatmul.mubr.msk.bf16.vlgmr.msra.gmra.mrb[20].mxu1 %vm1082_vm2, %v1578_v38 }
 0x52f   : > { %v1525_v43 = vpop.f32.mrb[18].mxu1  ;;  %4009 = vmatpush3.bf16.msra.mxu1 %v1683_v40  ;;  %4010 = vmatprep.mubr.msk.bf16.mxu1 %vm4715_vm0, %v4714_v0  ;;  %v3743_v40 = vld [vmem:[%s5890_s10] ss:$0 sm:$0xff] }
 0x530   : > { %v1676_v44 = vpack.c.bf16 %v1525_v43, %v1522_v41  ;;  %v3989_v45 = vpop.f32.mrb[19].mxu1  ;;  %4020 = vmatprep.subr.bf16.mxu1 %v4714_v0 }
 0x531   : > { %v1569_v46 = vpop.f32.mrb[12].mxu0  ;;  %v3744_v45 = vld [vmem:[%s5891_s11] ss:$0 sm:$0xff] }
 0x532   : > { %v3994_v47 = vpop.f32.mrb[13].mxu0 }
 0x533   : > { %v1572_v48 = vpop.f32.mrb[14].mxu0 }
 0x534   : > { %v1728_v49 = vpack.c.bf16 %v1572_v48, %v1569_v46  ;;  %v3995_v50 = vpop.f32.mrb[15].mxu0 }
 0x535   : > { %v4266_v50 = vld [vmem:[%s5888_s8 + $0x10] sm:$0xff]  }
 0x536   : > { %4011 = vmatmul.mubr.msk.bf16.vlgmr.msra.gmra.mrb[24].mxu1 %vm1082_vm2, %v1676_v44  ;;  %4017 = vmatmul.mubr.msk.bf16.vlgmr.msra.gmra.mrb[20].mxu0 %vm1082_vm2, %v1728_v49 }
 0x537   : > { %4024 = vmatprep.mubr.msk.bf16.mxu1 %vm4715_vm0, %v4714_v0  ;;  %4036 = vmatprep.mubr.msk.bf16.mxu0 %vm4715_vm0, %v4714_v0 }
 0x538   : > { %4021 = vmatpush3.bf16.msra.mxu1 %v4262_v30  ;;  %4029 = vmatpush3.bf16.msra.mxu0 %v4264_v31  ;;  %v3755_v31 = vld [vmem:[%s5892_s12] ss:$0 sm:$0xff] }
 0x539   : > { %4022 = vmatprep.subr.bf16.mxu1 %v4714_v0  ;;  %4030 = vmatprep.subr.bf16.mxu0 %v4714_v0 }
 0x53c   : > { %4031 = vmatpush3.bf16.msra.mxu0 %v4265_v32 }
 0x53d   : > { %4032 = vmatprep.subr.bf16.mxu0 %v4714_v0 }
 0x540   : > { %4033 = vmatpush3.bf16.msra.mxu0 %v4266_v50 }
 0x541   : > { %4034 = vmatprep.subr.bf16.mxu0 %v4714_v0 }
 0x5a0   : > { %v1669_v51 = vpop.f32.mrb[16].mxu0 }
 0x5a1   : > { %v4006_v52 = vpop.f32.mrb[17].mxu0 }
 0x5a2   : > { %v1672_v53 = vpop.f32.mrb[18].mxu0  ;;  %v3745_v52 = vld [vmem:[%s5887_s7] ss:$0 sm:$0xff] }
 0x5a3   : > { %v4007_v54 = vpop.f32.mrb[19].mxu0 }
 0x601   : > { %v1622_v55 = vpop.f32.mrb[20].mxu1 }
 0x602   : > { %v1670_v56 = vadd.f32 %v1669_v51, %v1622_v55  ;;  %v4000_v27 = vpop.f32.mrb[21].mxu1  ;;  %v4267_v51 = vld [vmem:[%s5888_s8 + $0x18] sm:$0xff]  }
 0x603   : > { %v1625_v28 = vpop.f32.mrb[22].mxu1  ;;  %4035 = vmatpush3.bf16.msra.mxu0 %v4267_v51 }
 0x604   : > { %v1673_v57 = vadd.f32 %v1672_v53, %v1625_v28  ;;  %v4001_v58 = vpop.f32.mrb[23].mxu1  ;;  %4054 = vmatprep.subr.bf16.mxu0 %v4714_v0 }
 0x609   : > { %v1719_v59 = vpop.f32.mrb[24].mxu1  ;;  %v1771_v60 = vpop.f32.mrb[20].mxu0 }
 0x60a   : > { %v1726_v61 = vadd.f32 %v1719_v59, %v1670_v56  ;;  %v4012_v62 = vpop.f32.mrb[25].mxu1  ;;  %v4018_v63 = vpop.f32.mrb[21].mxu0 }
 0x60b   : > { %v1722_v2 = vpop.f32.mrb[26].mxu1  ;;  %v1774_v5 = vpop.f32.mrb[22].mxu0 }
 0x60c   : > { %v1778_v6 = vadd.f32 %v1771_v60, %v1726_v61  ;;  %v1727_v7 = vadd.f32 %v1722_v2, %v1673_v57  ;;  %v4013_v8 = vpop.f32.mrb[27].mxu1  ;;  %v4019_v9 = vpop.f32.mrb[23].mxu0  ;;  %v3749_v60 = vld [vmem:[%s5889_s9] ss:$0 sm:$0xff] }
 0x60e   : > { %v1787_v12 = vadd.f32 %v3742_v1, %v1778_v6  ;;  %v1779_v13 = vadd.f32 %v1774_v5, %v1727_v7 }
 0x610   : > { %v1788_v15 = vadd.f32 %v3742_v1, %v1779_v13  ;;  %v1789_v16 = vadd.f32 %v1787_v12, %v4973_v3 }
 0x612   : > { %v1793_v17 = vsel %vm694_vm1, %v1789_v16, 0.0  ;;  %v1790_v18 = vadd.f32 %v1788_v15, %v4975_v4  ;;  %v4263_v4 = vld [vmem:[#allocation5 + $0x8] sm:$0xff]  }
 0x613   : > { %1794 = vadd.xlane.f32.xlu1 %v1793_v17  ;;  %4023 = vmatpush3.bf16.msra.mxu1 %v4263_v4 }
 0x614   : > { %v1796_v14 = vsel %vm694_vm1, %v1790_v18, 0.0  ;;  %4040 = vmatprep.subr.bf16.mxu1 %v4714_v0 }
 0x615   : > { %1797 = vadd.xlane.f32.xlu0 %v1796_v14 }
 0x6a0   : > { %v1795_v19 = vpop.xlane.xlu1 %1794 }
 0x6a1   : > { %v1800_v20 = vmul.f32 0.03125, %v1795_v19 }
 0x6a2   : > { %v1798_v21 = vpop.xlane.xlu0 %1797 }
 0x6a3   : > { %v1802_v22 = vsub.f32 %v1789_v16, %v1800_v20  ;;  %v1801_v23 = vmul.f32 0.03125, %v1798_v21 }
 0x6a5   : > { %v1803_v24 = vsub.f32 %v1790_v18, %v1801_v23  ;;  %v1804_v25 = vmul.f32 %v1802_v22, %v1802_v22  ;;  %v4269_v23 = vld [vmem:[%s5950_s28 + $0x18] sm:$0xff]  }
 0x6a7   : > { %v1806_v26 = vsel %vm694_vm1, %v1804_v25, 0.0  ;;  %v1805_v29 = vmul.f32 %v1803_v24, %v1803_v24 }
 0x6a8   : > { %1807 = vadd.xlane.f32.xlu0 %v1806_v26 }
 0x6a9   : > { %v1809_v3 = vsel %vm694_vm1, %v1805_v29, 0.0 }
 0x6aa   : > { %1810 = vadd.xlane.f32.xlu1 %v1809_v3 }
 0x735   : > { %v1808_v33 = vpop.xlane.xlu0 %1807 }
 0x736   : > { %v1812_v34 = vmul.f32 0.03125, %v1808_v33 }
 0x737   : > { %v1811_v35 = vpop.xlane.xlu1 %1810 }
 0x738   : > { %v1814_v36 = vadd.f32 1e-05, %v1812_v34  ;;  %v1813_v37 = vmul.f32 0.03125, %v1811_v35 }
 0x73a   : > { %4308 = vrsqrt.f32 %v1814_v36  ;;  %v1815_v38 = vadd.f32 1e-05, %v1813_v37  ;;  %v3756_v36 = vld [vmem:[%s5893_s13] ss:$0 sm:$0xff] }
 0x73c   : > { %4310 = vrsqrt.f32 %v1815_v38 }
 0x744   : > { %v4309_v39 = vpop.eup %4308 }
 0x745   : > { %v1818_v41 = vmul.f32 %v4309_v39, %v1802_v22  ;;  %v4268_v22 = vld [vmem:[%s5950_s28 + $0x10] sm:$0xff]  }
 0x746   : > { %v4311_v42 = vpop.eup %4310 }
 0x747   : > { %v1826_v43 = vmul.f32 %v3743_v40, %v1818_v41  ;;  %v1819_v44 = vmul.f32 %v4311_v42, %v1803_v24  ;;  %v3762_v41 = vld [vmem:[%s5951_s18 + $0x1] ss:$0 sm:$0xff] }
 0x749   : > { %v1827_v46 = vmul.f32 %v3743_v40, %v1819_v44  ;;  %v1834_v47 = vadd.f32 %v3744_v45, %v1826_v43 }
 0x74b   : > { %v1835_v48 = vadd.f32 %v3744_v45, %v1827_v46 }
 0x74d   : > { %v1836_v49 = vpack.c.bf16 %v1835_v48, %v1834_v47 }
 0x74f   : > { %4025 = vmatmul.mubr.msk.bf16.vlgmr.msra.gmra.mrb[28].mxu1 %vm694_vm1, %v1836_v49 }
 0x750   : > { %4044 = vmatprep.mubr.msk.bf16.mxu1 %vm4715_vm0, %v4714_v0  ;;  %4041 = vmatpush3.bf16.msra.mxu1 %v4268_v22 }
 0x751   : > { %4042 = vmatprep.subr.bf16.mxu1 %v4714_v0 }
 0x754   : > { %4043 = vmatpush3.bf16.msra.mxu1 %v4269_v23 }
 0x755   : > { %4048 = vmatprep.subr.bf16.mxu1 %v4714_v0 }
 0x822   : > { %v1897_v53 = vpop.f32.mrb[28].mxu1 }
 0x823   : > { %v1898_v54 = vadd.f32 %v3745_v52, %v1897_v53  ;;  %v4026_v55 = vpop.f32.mrb[29].mxu1 }
 0x824   : > { %v1900_v56 = vpop.f32.mrb[30].mxu1 }
 0x825   : > { %v1901_v27 = vadd.f32 %v3745_v52, %v1900_v56  ;;  %v4027_v28 = vpop.f32.mrb[31].mxu1  ;;  %v1904_v57 = vmax.f32 %v1898_v54, 0.0 }
 0x827   : > { %v1905_v58 = vmax.f32 %v1901_v27, 0.0 }
 0x829   : > { %v1906_v59 = vpack.c.bf16 %v1905_v58, %v1904_v57 }
 0x82b   : > { %4037 = vmatmul.mubr.msk.bf16.vlgmr.msra.gmra.mrb[24].mxu0 %vm1946_vm5, %v1906_v59 }
 0x82c   : > { %4056 = vmatprep.mubr.msk.bf16.mxu0 %vm4715_vm0, %v4714_v0 }
 0x8fe   : > { %v1984_v61 = vpop.f32.mrb[24].mxu0 }
 0x8ff   : > { %v1985_v62 = vadd.f32 %v3749_v60, %v1984_v61  ;;  %v4038_v63 = vpop.f32.mrb[25].mxu0 }
 0x900   : > { %v1987_v1 = vpop.f32.mrb[26].mxu0 }
 0x901   : > { %v1988_v2 = vadd.f32 %v3749_v60, %v1987_v1  ;;  %v4039_v5 = vpop.f32.mrb[27].mxu0  ;;  %v1991_v6 = vadd.f32 %v1985_v62, %v1834_v47 }
 0x903   : > { %v1995_v7 = vsel %vm694_vm1, %v1991_v6, 0.0  ;;  %v1992_v8 = vadd.f32 %v1988_v2, %v1835_v48 }
 0x904   : > { %1996 = vadd.xlane.f32.xlu0 %v1995_v7 }
 0x905   : > { %v1998_v9 = vsel %vm694_vm1, %v1992_v8, 0.0 }
 0x906   : > { %1999 = vadd.xlane.f32.xlu1 %v1998_v9 }
 0x991   : > { %v1997_v12 = vpop.xlane.xlu0 %1996 }
 0x992   : > { %v2001_v13 = vmul.f32 0.03125, %v1997_v12 }
 0x993   : > { %v2000_v15 = vpop.xlane.xlu1 %1999 }
 0x994   : > { %v2003_v16 = vsub.f32 %v1991_v6, %v2001_v13  ;;  %v2002_v17 = vmul.f32 0.03125, %v2000_v15 }
 0x996   : > { %v2004_v18 = vsub.f32 %v1992_v8, %v2002_v17  ;;  %v2005_v14 = vmul.f32 %v2003_v16, %v2003_v16 }
 0x998   : > { %v2007_v19 = vsel %vm694_vm1, %v2005_v14, 0.0  ;;  %v2006_v20 = vmul.f32 %v2004_v18, %v2004_v18 }
 0x999   : > { %2008 = vadd.xlane.f32.xlu0 %v2007_v19 }
 0x99a   : > { %v2010_v21 = vsel %vm694_vm1, %v2006_v20, 0.0 }
 0x99b   : > { %2011 = vadd.xlane.f32.xlu1 %v2010_v21 }
 0xa26   : > { %v2009_v24 = vpop.xlane.xlu0 %2008 }
 0xa27   : > { %v2013_v25 = vmul.f32 0.03125, %v2009_v24 }
 0xa28   : > { %v2012_v26 = vpop.xlane.xlu1 %2011 }
 0xa29   : > { %v2015_v29 = vadd.f32 1e-05, %v2013_v25  ;;  %v2014_v3 = vmul.f32 0.03125, %v2012_v26 }
 0xa2b   : > { %4312 = vrsqrt.f32 %v2015_v29  ;;  %v2016_v30 = vadd.f32 1e-05, %v2014_v3 }
 0xa2d   : > { %4314 = vrsqrt.f32 %v2016_v30 }
 0xa35   : > { %v4313_v4 = vpop.eup %4312 }
 0xa36   : > { %v2019_v32 = vmul.f32 %v4313_v4, %v2003_v16 }
 0xa37   : > { %v4315_v33 = vpop.eup %4314 }
 0xa38   : > { %v2027_v34 = vmul.f32 %v3755_v31, %v2019_v32  ;;  %v2020_v35 = vmul.f32 %v4315_v33, %v2004_v18 }
 0xa3a   : > { %v2028_v37 = vmul.f32 %v3755_v31, %v2020_v35  ;;  %v5205_v38 = vadd.f32 %v3756_v36, %v2027_v34 }
 0xa3c   : > { %v5207_v39 = vadd.f32 %v3756_v36, %v2028_v37 }
 0xa3e   : > { %v2037_v40 = vpack.c.bf16 %v5207_v39, %v5205_v38 }
 0xa40   : > { %4045 = vmatmul.mubr.msk.bf16.vlgmr.msra.gmra.mrb[32].mxu1 %vm694_vm1, %v2037_v40 }
 0xa41   : > { %4050 = vmatprep.mubr.msk.bf16.mxu1 %vm4715_vm0, %v4714_v0 }
 0xb13   : > { %v2100_v42 = vpop.f32.mrb[32].mxu1 }
 0xb14   : > { %v4046_v43 = vpop.f32.mrb[33].mxu1  ;;  %v5217_v45 = vadd.f32 %v3762_v41, %v2100_v42 }
 0xb15   : > { %v2103_v44 = vpop.f32.mrb[34].mxu1 }
 0xb16   : > { %v5219_v46 = vadd.f32 %v3762_v41, %v2103_v44  ;;  %v4047_v47 = vpop.f32.mrb[35].mxu1 }
 0xb18   : > { %v4248_v48 = vpack.i.bf16 %v5219_v46, %v5217_v45  ;;  %v5227_v49 = vpack.c.bf16 %v5219_v46, %v5217_v45 }
 0xb1a   : > { %4249 = vrot.lane.b32.xlu1 %v4248_v48, %s4718_s23  ;;  %4244 = vrot.lane.b32.xlu0 %v4248_v48, %s4717_s27  ;;  %s4721_s27 = smov 127   ;;  %s4722_s23 = smov 126  }
 0xb1e   : > { %4254 = vrot.lane.b32.xlu1 %v4248_v48, %s4716_s0  ;;  %2448 = vrot.lane.b32.xlu0 %v5227_v49, %s4719_s20  ;;  %s5954_s0 = smov 64  }
 0xb8c   : > { %v4250_v50 = vpop.permute.xlu1 %4249  ;;  %v4245_v51 = vpop.permute.xlu0 %4244 }
 0xb8d   : > { %v4252_v52 = vunpack.i.h.bf16 %v4250_v50  ;;  %v4251_v53 = vunpack.i.l.bf16 %v4250_v50  ;;  %v4247_v54 = vunpack.i.h.bf16 %v4245_v51  ;;  %v4246_v55 = vunpack.i.l.bf16 %v4245_v51 }
 0xb8f   : > { %v5232_v56 = vpack.c.bf16 %v4247_v54, %v4246_v55  ;;  %v5234_v27 = vpack.c.bf16 %v4252_v52, %v4251_v53 }
 0xb90   : > { %v4255_v28 = vpop.permute.xlu1 %4254  ;;  %v2449_v57 = vpop.permute.xlu0 %2448 }
 0xb91   : > { %v4257_v58 = vunpack.i.h.bf16 %v4255_v28  ;;  %v4256_v59 = vunpack.i.l.bf16 %v4255_v28  ;;  %v2454_v60 = vsel %vm1082_vm2, %v2449_v57, 0  ;;  %2498 = vrot.lane.b32.xlu1 %v5232_v56, %s4719_s20  ;;  %2548 = vrot.lane.b32.xlu0 %v5234_v27, %s4719_s20 }
 0xb92   : > { %4049 = vmatpush3.bf16.xpose.msra.mxu1 %v2454_v60 }
 0xb93   : > { %v5241_v61 = vpack.c.bf16 %v4257_v58, %v4256_v59  ;;  %4060 = vmatprep.subr.bf16.mxu1 %v4714_v0 }
 0xb95   : > { %2598 = vrot.lane.b32.xlu1 %v5241_v61, %s4719_s20  ;;  %s4723_s20 = smov 125  }
 0xb99   : > { %4051 = vmatmul.mubr.msk.bf16.vlgmr.msra.gmra.mrb[36].mxu1 %vm1082_vm2, %v5227_v49 }
 0xb9a   : > { %4062 = vmatprep.mubr.msk.bf16.mxu1 %vm4715_vm0, %v4714_v0 }
 0xc03   : > { %v2499_v62 = vpop.permute.xlu1 %2498  ;;  %v2549_v63 = vpop.permute.xlu0 %2548 }
 0xc04   : > { %v2504_v1 = vsel %vm1082_vm2, %v2499_v62, 0  ;;  %v2554_v2 = vsel %vm1082_vm2, %v2549_v63, 0 }
 0xc05   : > { %4055 = vmatpush3.bf16.xpose.msra.mxu0 %v2504_v1  ;;  %4061 = vmatpush3.bf16.xpose.msra.mxu1 %v2554_v2 }
 0xc06   : > { %4066 = vmatprep.subr.bf16.mxu0 %v4714_v0  ;;  %4072 = vmatprep.subr.bf16.mxu1 %v4714_v0 }
 0xc07   : > { %v2599_v5 = vpop.permute.xlu1 %2598 }
 0xc08   : > { %v2604_v6 = vsel %vm1082_vm2, %v2599_v5, 0 }
 0xc0c   : > { %4057 = vmatmul.mubr.msk.bf16.vlgmr.msra.gmra.mrb[28].mxu0 %vm1082_vm2, %v5232_v56  ;;  %4063 = vmatmul.mubr.msk.bf16.vlgmr.msra.gmra.mrb[40].mxu1 %vm1082_vm2, %v5234_v27 }
 0xc0d   : > { %4067 = vmatpush3.bf16.xpose.msra.mxu0 %v2604_v6  ;;  %4068 = vmatprep.mubr.msk.bf16.mxu0 %vm4715_vm0, %v4714_v0 }
 0xc0e   : > { %4074 = vmatprep.mubr.msk.bf16.mxu1 %vm4715_vm0, %v4714_v0  ;;  %4078 = vmatprep.subr.bf16.mxu0 %v4714_v0 }
 0xc14   : > { %4069 = vmatmul.mubr.msk.bf16.vlgmr.msra.gmra.mrb[32].mxu0 %vm1082_vm2, %v5241_v61 }
 0xc15   : > { %4080 = vmatprep.mubr.msk.bf16.mxu0 %vm4715_vm0, %v4714_v0 }
 0xc6c   : > { %v2490_v7 = vpop.f32.mrb[36].mxu1 }
 0xc6d   : > { %v2647_v8 = vmul.f32 0.35355338, %v2490_v7  ;;  %v4052_v9 = vpop.f32.mrb[37].mxu1 }
 0xc6e   : > { %v2493_v12 = vpop.f32.mrb[38].mxu1 }
 0xc6f   : > { %v2648_v13 = vmul.f32 0.35355338, %v2493_v12  ;;  %v4053_v15 = vpop.f32.mrb[39].mxu1  ;;  %v2655_v16 = vsel %vm1048_vm3, %v2647_v8, -inf }
 0xc70   : > { %2656 = vmax.xlane.f32.xlu0 %v2655_v16 }
 0xc71   : > { %v2658_v17 = vsel %vm1048_vm3, %v2648_v13, -inf }
 0xc72   : > { %2659 = vmax.xlane.f32.xlu1 %v2658_v17 }
 0xcdf   : > { %v2540_v18 = vpop.f32.mrb[28].mxu0  ;;  %v2590_v14 = vpop.f32.mrb[40].mxu1 }
 0xce0   : > { %v2649_v19 = vmul.f32 0.35355338, %v2540_v18  ;;  %v2651_v20 = vmul.f32 0.35355338, %v2590_v14  ;;  %v4058_v21 = vpop.f32.mrb[29].mxu0  ;;  %v4064_v22 = vpop.f32.mrb[41].mxu1 }
 0xce1   : > { %v2543_v23 = vpop.f32.mrb[30].mxu0  ;;  %v2593_v24 = vpop.f32.mrb[42].mxu1 }
 0xce2   : > { %v4059_v25 = vpop.f32.mrb[31].mxu0  ;;  %v4065_v26 = vpop.f32.mrb[43].mxu1  ;;  %v2650_v29 = vmul.f32 0.35355338, %v2543_v23  ;;  %v2661_v3 = vsel %vm1048_vm3, %v2649_v19, -inf  ;;  %v2667_v30 = vsel %vm1048_vm3, %v2651_v20, -inf }
 0xce3   : > { %2662 = vmax.xlane.f32.xlu0 %v2661_v3  ;;  %2668 = vmax.xlane.f32.xlu1 %v2667_v30  ;;  %v2652_v4 = vmul.f32 0.35355338, %v2593_v24 }
 0xce4   : > { %v2664_v32 = vsel %vm1048_vm3, %v2650_v29, -inf }
 0xce5   : > { %v2670_v41 = vsel %vm1048_vm3, %v2652_v4, -inf }
 0xce7   : > { %v2640_v31 = vpop.f32.mrb[32].mxu0  ;;  %2665 = vmax.xlane.f32.xlu0 %v2664_v32 }
 0xce8   : > { %v2653_v33 = vmul.f32 0.35355338, %v2640_v31  ;;  %v4070_v34 = vpop.f32.mrb[33].mxu0 }
 0xce9   : > { %v2643_v35 = vpop.f32.mrb[34].mxu0 }
 0xcea   : > { %v4071_v36 = vpop.f32.mrb[35].mxu0  ;;  %v2673_v37 = vsel %vm1048_vm3, %v2653_v33, -inf  ;;  %v2654_v40 = vmul.f32 0.35355338, %v2643_v35 }
 0xceb   : > { %2674 = vmax.xlane.f32.xlu1 %v2673_v37  ;;  %2671 = vmax.xlane.f32.xlu0 %v2670_v41 }
 0xcec   : > { %v2676_v42 = vsel %vm1048_vm3, %v2654_v40, -inf }
 0xcef   : > { %2677 = vmax.xlane.f32.xlu0 %v2676_v42 }
 0xcfc   : > { %2756 = vrot.lane.b32.xlu1 %v5227_v49, %s5954_s0 }
 0xcfd   : > { %v2657_v48 = vpop.xlane.xlu0 %2656 }
 0xcfe   : > { %v2679_v50 = vsub.f32 %v2647_v8, %v2657_v48 }
 0xcff   : > { %v2660_v43 = vpop.xlane.xlu1 %2659 }
 0xd00   : > { %v2680_v44 = vsub.f32 %v2648_v13, %v2660_v43  ;;  %v2687_v52 = vmul.f32 1.442695, %v2679_v50 }
 0xd02   : > { %v2689_v47 = vmul.f32 1.442695, %v2680_v44 }
 0xd04   : > { %4316 = vpow2.f32 %v2689_v47 }
 0xd05   : > { %4318 = vpow2.f32 %v2687_v52 }
 0xd0e   : > { %v4317_v51 = vpop.eup %4316 }
 0xd0f   : > { %v2706_v53 = vsel %vm1048_vm3, %v4317_v51, 0.0  ;;  %v4319_v54 = vpop.eup %4318 }
 0xd10   : > { %2707 = vadd.xlane.f32.xlu0 %v2706_v53  ;;  %v2703_v55 = vsel %vm1048_vm3, %v4319_v54, 0.0 }
 0xd20   : > { %2704 = vadd.xlane.f32.xlu1 %v2703_v55 }
 0xd70   : > { %v2663_v28 = vpop.xlane.xlu0 %2662  ;;  %v2669_v57 = vpop.xlane.xlu1 %2668 }
 0xd71   : > { %v2681_v58 = vsub.f32 %v2649_v19, %v2663_v28  ;;  %v2683_v49 = vsub.f32 %v2651_v20, %v2669_v57 }
 0xd73   : > { %v2691_v59 = vmul.f32 1.442695, %v2681_v58  ;;  %v2695_v60 = vmul.f32 1.442695, %v2683_v49 }
 0xd74   : > { %v2666_v62 = vpop.xlane.xlu0 %2665 }
 0xd75   : > { %4320 = vpow2.f32 %v2691_v59  ;;  %v2682_v63 = vsub.f32 %v2650_v29, %v2666_v62  ;;  %v3814_v59 = vld [vmem:[%s5952_s4 + $0x10] sm:$0xf] }
 0xd76   : > { %4322 = vpow2.f32 %v2695_v60  ;;  %v3001_v62 = vsel %vm1584_vm4, %v3814_v59, 0 }
 0xd77   : > { %v2693_v1 = vmul.f32 1.442695, %v2682_v63  ;;  %v3815_v63 = vld [vmem:[%s5952_s4 + $0x14] sm:$0xf] }
 0xd78   : > { %v2675_v2 = vpop.xlane.xlu1 %2674  ;;  %v2672_v6 = vpop.xlane.xlu0 %2671 }
 0xd79   : > { %v2685_v5 = vsub.f32 %v2653_v33, %v2675_v2  ;;  %4324 = vpow2.f32 %v2693_v1  ;;  %v2684_v7 = vsub.f32 %v2652_v4, %v2672_v6  ;;  %v2954_v1 = vsel %vm1584_vm4, %v3815_v63, 0 }
 0xd7b   : > { %v2699_v8 = vmul.f32 1.442695, %v2685_v5  ;;  %v2697_v9 = vmul.f32 1.442695, %v2684_v7  ;;  %v3820_v5 = vld [vmem:[%s5952_s4 + $0x1c] sm:$0xf] }
 0xd7c   : > { %v2757_v12 = vpop.permute.xlu1 %2756  ;;  %v2678_v13 = vpop.xlane.xlu0 %2677 }
 0xd7d   : > { %4326 = vpow2.f32 %v2699_v8  ;;  %4073 = vmatpush3.bf16.msra.mxu1 %v2757_v12  ;;  %v2686_v15 = vsub.f32 %v2654_v40, %v2678_v13  ;;  %v3103_v12 = vsel %vm1584_vm4, %v3820_v5, 0 }
 0xd7e   : > { %4328 = vpow2.f32 %v2697_v9  ;;  %4084 = vmatprep.subr.bf16.mxu1 %v4714_v0 }
 0xd7f   : > { %v4321_v16 = vpop.eup %4320  ;;  %v2701_v17 = vmul.f32 1.442695, %v2686_v15  ;;  %v3818_v15 = vld [vmem:[%s5952_s4 + $0x18] sm:$0xf] }
 0xd80   : > { %v2709_v18 = vsel %vm1048_vm3, %v4321_v16, 0.0  ;;  %v4323_v14 = vpop.eup %4322 }
 0xd81   : > { %4330 = vpow2.f32 %v2701_v17  ;;  %2710 = vadd.xlane.f32.xlu1 %v2709_v18  ;;  %v2715_v20 = vsel %vm1048_vm3, %v4323_v14, 0.0 }
 0xd83   : > { %v4325_v19 = vpop.eup %4324 }
 0xd84   : > { %v2712_v21 = vsel %vm1048_vm3, %v4325_v19, 0.0 }
 0xd85   : > { %2716 = vadd.xlane.f32.xlu1 %v2715_v20  ;;  %2713 = vadd.xlane.f32.xlu0 %v2712_v21 }
 0xd87   : > { %v4327_v22 = vpop.eup %4326 }
 0xd88   : > { %v4329_v23 = vpop.eup %4328  ;;  %v2721_v24 = vsel %vm1048_vm3, %v4327_v22, 0.0 }
 0xd89   : > { %v2718_v25 = vsel %vm1048_vm3, %v4329_v23, 0.0  ;;  %2722 = vadd.xlane.f32.xlu1 %v2721_v24 }
 0xd8a   : > { %2719 = vadd.xlane.f32.xlu0 %v2718_v25 }
 0xd8b   : > { %v4331_v26 = vpop.eup %4330 }
 0xd8c   : > { %v2724_v29 = vsel %vm1048_vm3, %v4331_v26, 0.0 }
 0xd8e   : > { %2725 = vadd.xlane.f32.xlu0 %v2724_v29 }
 0xd9a   : > { %2850 = vrot.lane.b32.xlu1 %v5234_v27, %s5954_s0 }
 0xd9d   : > { %v2708_v3 = vpop.xlane.xlu0 %2707 }
 0xd9e   : > { %4332 = vrcp.f32 %v2708_v3  ;;  %2897 = vrot.lane.b32.xlu1 %v5241_v61, %s5954_s0 }
 0xda4   : > { %2803 = vrot.lane.b32.xlu0 %v5232_v56, %s5954_s0  ;;  %s5955_s0 = sshll.u32 %s5071_s21, 7 }
 0xda8   : > { %v4333_v30 = vpop.eup %4332 }
 0xda9   : > { %v2730_v4 = vmul.f32 %v4333_v30, %v4317_v51 }
 0xdab   : > { %3803 = vst.msk [vmem:[%s5077_s26 + $0x48] sm:$0xff] %vm1048_vm3, %v2730_v4 }
 0xdad   : > { %v2705_v31 = vpop.xlane.xlu1 %2704 }
 0xdae   : > { %4334 = vrcp.f32 %v2705_v31 }
 0xdb8   : > { %v4335_v32 = vpop.eup %4334 }
 0xdb9   : > { %v2728_v33 = vmul.f32 %v4335_v32, %v4319_v54 }
 0xdbb   : > { %3802 = vst.msk [vmem:[%s5077_s26 + $0x40] sm:$0xff] %vm1048_vm3, %v2728_v33  ;;  %v2752_v34 = vpack.c.bf16 %v2730_v4, %v2728_v33 }
 0xdbd   : > { %4075 = vmatmul.mubr.msk.bf16.vlgmr.msra.gmra.mrb[44].mxu1 %vm1048_vm3, %v2752_v34 }
 0xdbe   : > { %4086 = vmatprep.mubr.msk.bf16.mxu1 %vm4715_vm0, %v4714_v0 }
 0xe0e   : > { %v2711_v27 = vpop.xlane.xlu1 %2710 }
 0xe0f   : > { %4336 = vrcp.f32 %v2711_v27 }
 0xe12   : > { %v2717_v56 = vpop.xlane.xlu1 %2716  ;;  %v2714_v61 = vpop.xlane.xlu0 %2713 }
 0xe13   : > { %4338 = vrcp.f32 %v2717_v56 }
 0xe14   : > { %4340 = vrcp.f32 %v2714_v61 }
 0xe16   : > { %v2723_v35 = vpop.xlane.xlu1 %2722 }
 0xe17   : > { %v2720_v36 = vpop.xlane.xlu0 %2719  ;;  %4342 = vrcp.f32 %v2723_v35 }
 0xe18   : > { %4344 = vrcp.f32 %v2720_v36 }
 0xe19   : > { %v4337_v37 = vpop.eup %4336 }
 0xe1a   : > { %v2732_v40 = vmul.f32 %v4337_v37, %v4321_v16  ;;  %v2851_v41 = vpop.permute.xlu1 %2850 }
 0xe1b   : > { %v2726_v42 = vpop.xlane.xlu0 %2725  ;;  %4085 = vmatpush3.bf16.msra.mxu1 %v2851_v41 }
 0xe1c   : > { %4346 = vrcp.f32 %v2726_v42  ;;  %3804 = vst.msk [vmem:[%s5077_s26 + $0x50] sm:$0xff] %vm1048_vm3, %v2732_v40  ;;  %4096 = vmatprep.subr.bf16.mxu1 %v4714_v0 }
 0xe1d   : > { %v4339_v43 = vpop.eup %4338 }
 0xe1e   : > { %v4341_v44 = vpop.eup %4340  ;;  %v2736_v47 = vmul.f32 %v4339_v43, %v4323_v14  ;;  %v2898_v28 = vpop.permute.xlu1 %2897 }
 0xe1f   : > { %v2804_v48 = vpop.permute.xlu0 %2803  ;;  %v2734_v50 = vmul.f32 %v4341_v44, %v4325_v19  ;;  %v3051_v19 = vsel %vm1584_vm4, %v3818_v15, 0  ;;  %v3823_v44 = vld [vmem:[%s5953_s5 + $0x1] ss:$0 sm:$0xff] }
 0xe20   : > { %4079 = vmatpush3.bf16.msra.mxu0 %v2804_v48  ;;  %3806 = vst.msk [vmem:[%s5077_s26 + $0x60] sm:$0xff] %vm1048_vm3, %v2736_v47 }
 0xe21   : > { %4090 = vmatprep.subr.bf16.mxu0 %v4714_v0  ;;  %v4343_v51 = vpop.eup %4342  ;;  %3805 = vst.msk [vmem:[%s5077_s26 + $0x58] sm:$0xff] %vm1048_vm3, %v2734_v50  ;;  %v2753_v52 = vpack.c.bf16 %v2734_v50, %v2732_v40 }
 0xe22   : > { %v4345_v53 = vpop.eup %4344  ;;  %v2740_v54 = vmul.f32 %v4343_v51, %v4327_v22 }
 0xe23   : > { %v2738_v55 = vmul.f32 %v4345_v53, %v4329_v23  ;;  %4081 = vmatmul.mubr.msk.bf16.vlgmr.msra.gmra.mrb[36].mxu0 %vm1048_vm3, %v2753_v52 }
 0xe24   : > { %3808 = vst.msk [vmem:[%s5077_s26 + $0x70] sm:$0xff] %vm1048_vm3, %v2740_v54  ;;  %4091 = vmatpush3.bf16.msra.mxu0 %v2898_v28  ;;  %4092 = vmatprep.mubr.msk.bf16.mxu0 %vm4715_vm0, %v4714_v0 }
 0xe25   : > { %3807 = vst.msk [vmem:[%s5077_s26 + $0x68] sm:$0xff] %vm1048_vm3, %v2738_v55  ;;  %v2754_v58 = vpack.c.bf16 %v2738_v55, %v2736_v47  ;;  %4102 = vmatprep.subr.bf16.mxu0 %v4714_v0 }
 0xe26   : > { %v4347_v57 = vpop.eup %4346 }
 0xe27   : > { %v2742_v49 = vmul.f32 %v4347_v57, %v4331_v26  ;;  %4087 = vmatmul.mubr.msk.bf16.vlgmr.msra.gmra.mrb[48].mxu1 %vm1048_vm3, %v2754_v58 }
 0xe28   : > { %4098 = vmatprep.mubr.msk.bf16.mxu1 %vm4715_vm0, %v4714_v0  ;;  %4097 = vmatpush3.bf16.msra.mxu1 %v2954_v1 }
 0xe29   : > { %3809 = vst.msk [vmem:[%s5077_s26 + $0x78] sm:$0xff] %vm1048_vm3, %v2742_v49  ;;  %v2755_v60 = vpack.c.bf16 %v2742_v49, %v2740_v54  ;;  %4108 = vmatprep.subr.bf16.mxu1 %v4714_v0 }
 0xe2b   : > { %4093 = vmatmul.mubr.msk.bf16.vlgmr.msra.gmra.mrb[40].mxu0 %vm1048_vm3, %v2755_v60 }
 0xe2c   : > { %4103 = vmatpush3.bf16.msra.mxu0 %v3001_v62  ;;  %4104 = vmatprep.mubr.msk.bf16.mxu0 %vm4715_vm0, %v4714_v0 }
 0xe2d   : > { %4114 = vmatprep.subr.bf16.mxu0 %v4714_v0 }
 0xe90   : > { %v2796_v2 = vpop.f32.mrb[44].mxu1 }
 0xe91   : > { %v4076_v6 = vpop.f32.mrb[45].mxu1 }
 0xe92   : > { %v2799_v7 = vpop.f32.mrb[46].mxu1 }
 0xe93   : > { %v2944_v8 = vpack.c.bf16 %v2799_v7, %v2796_v2  ;;  %v4077_v9 = vpop.f32.mrb[47].mxu1 }
 0xe94   : > { %v4271_v9 = vld [vmem:[#allocation5 + $0x18] sm:$0xff]  }
 0xe95   : > { %4105 = vmatmul.mubr.msk.bf16.vlgmr.msra.gmra.mrb[44].mxu0 %vm1082_vm2, %v2944_v8  ;;  %v4270_v8 = vld [vmem:[#allocation5 + $0x10] sm:$0xff]  }
 0xe96   : > { %4115 = vmatpush3.bf16.msra.mxu0 %v3103_v12  ;;  %4116 = vmatprep.mubr.msk.bf16.mxu0 %vm4715_vm0, %v4714_v0  ;;  %v4272_v12 = vld [vmem:[%s5888_s8 + $0x20] sm:$0xff]  }
 0xe97   : > { %4128 = vmatprep.subr.bf16.mxu0 %v4714_v0 }
 0xef6   : > { %v2843_v13 = vpop.f32.mrb[36].mxu0 }
 0xef7   : > { %v4082_v16 = vpop.f32.mrb[37].mxu0 }
 0xef8   : > { %v2846_v17 = vpop.f32.mrb[38].mxu0 }
 0xef9   : > { %v2947_v18 = vpack.c.bf16 %v2846_v17, %v2843_v13  ;;  %v4083_v14 = vpop.f32.mrb[39].mxu0  ;;  %v4273_v13 = vld [vmem:[%s5888_s8 + $0x28] sm:$0xff]  }
 0xefa   : > { %v2890_v20 = vpop.f32.mrb[48].mxu1 }
 0xefb   : > { %v4088_v21 = vpop.f32.mrb[49].mxu1  ;;  %4099 = vmatmul.mubr.msk.bf16.vlgmr.msra.gmra.mrb[52].mxu1 %vm1082_vm2, %v2947_v18 }
 0xefc   : > { %v2893_v22 = vpop.f32.mrb[50].mxu1  ;;  %4109 = vmatpush3.bf16.msra.mxu1 %v3051_v19  ;;  %4110 = vmatprep.mubr.msk.bf16.mxu1 %vm4715_vm0, %v4714_v0 }
 0xefd   : > { %v3044_v23 = vpack.c.bf16 %v2893_v22, %v2890_v20  ;;  %v4089_v24 = vpop.f32.mrb[51].mxu1  ;;  %4120 = vmatprep.subr.bf16.mxu1 %v4714_v0  ;;  %v3826_v22 = vld [vmem:[%s5890_s10 + $0x1] ss:$0 sm:$0xff] }
 0xefe   : > { %v2937_v25 = vpop.f32.mrb[40].mxu0 }
 0xeff   : > { %v4094_v26 = vpop.f32.mrb[41].mxu0 }
 0xf00   : > { %v2940_v29 = vpop.f32.mrb[42].mxu0  ;;  %v3827_v26 = vld [vmem:[%s5891_s11 + $0x1] ss:$0 sm:$0xff] }
 0xf01   : > { %v3096_v3 = vpack.c.bf16 %v2940_v29, %v2937_v25  ;;  %v4095_v30 = vpop.f32.mrb[43].mxu0 }
 0xf03   : > { %4111 = vmatmul.mubr.msk.bf16.vlgmr.msra.gmra.mrb[56].mxu1 %vm1082_vm2, %v3044_v23  ;;  %4117 = vmatmul.mubr.msk.bf16.vlgmr.msra.gmra.mrb[48].mxu0 %vm1082_vm2, %v3096_v3 }
 0xf04   : > { %4124 = vmatprep.mubr.msk.bf16.mxu1 %vm4715_vm0, %v4714_v0  ;;  %4136 = vmatprep.mubr.msk.bf16.mxu0 %vm4715_vm0, %v4714_v0 }
 0xf05   : > { %4121 = vmatpush3.bf16.msra.mxu1 %v4270_v8  ;;  %4129 = vmatpush3.bf16.msra.mxu0 %v4272_v12 }
 0xf06   : > { %4122 = vmatprep.subr.bf16.mxu1 %v4714_v0  ;;  %4130 = vmatprep.subr.bf16.mxu0 %v4714_v0 }
 0xf09   : > { %4123 = vmatpush3.bf16.msra.mxu1 %v4271_v9  ;;  %4131 = vmatpush3.bf16.msra.mxu0 %v4273_v13 }
 0xf0a   : > { %4132 = vmatprep.subr.bf16.mxu0 %v4714_v0 }
 0xf68   : > { %v3037_v4 = vpop.f32.mrb[44].mxu0 }
 0xf69   : > { %v4106_v31 = vpop.f32.mrb[45].mxu0 }
 0xf6a   : > { %v3040_v32 = vpop.f32.mrb[46].mxu0  ;;  %v4274_v31 = vld [vmem:[%s5888_s8 + $0x30] sm:$0xff]  }
 0xf6b   : > { %v4107_v33 = vpop.f32.mrb[47].mxu0  ;;  %4133 = vmatpush3.bf16.msra.mxu0 %v4274_v31 }
 0xf6c   : > { %4134 = vmatprep.subr.bf16.mxu0 %v4714_v0  ;;  %v3829_v33 = vld [vmem:[%s5887_s7 + $0x1] ss:$0 sm:$0xff] }
 0xfce   : > { %v2990_v34 = vpop.f32.mrb[52].mxu1 }
 0xfcf   : > { %v3038_v27 = vadd.f32 %v3037_v4, %v2990_v34  ;;  %v4100_v56 = vpop.f32.mrb[53].mxu1 }
 0xfd0   : > { %v2993_v61 = vpop.f32.mrb[54].mxu1 }
 0xfd1   : > { %v3041_v35 = vadd.f32 %v3040_v32, %v2993_v61  ;;  %v4101_v36 = vpop.f32.mrb[55].mxu1  ;;  %v4275_v32 = vld [vmem:[%s5888_s8 + $0x38] sm:$0xff]  }
 0xfd2   : > { %4135 = vmatpush3.bf16.msra.mxu0 %v4275_v32 }
 0xfd6   : > { %v3087_v37 = vpop.f32.mrb[56].mxu1  ;;  %v3139_v40 = vpop.f32.mrb[48].mxu0 }
 0xfd7   : > { %v3094_v41 = vadd.f32 %v3087_v37, %v3038_v27  ;;  %v4112_v42 = vpop.f32.mrb[57].mxu1  ;;  %v4118_v43 = vpop.f32.mrb[49].mxu0 }
 0xfd8   : > { %v3090_v47 = vpop.f32.mrb[58].mxu1  ;;  %v3142_v48 = vpop.f32.mrb[50].mxu0  ;;  %v3712_v43 = vmul.f32 -5.0, %v4989_v11 }
 0xfd9   : > { %v3146_v50 = vadd.f32 %v3139_v40, %v3094_v41  ;;  %v3095_v51 = vadd.f32 %v3090_v47, %v3041_v35  ;;  %v4113_v52 = vpop.f32.mrb[59].mxu1  ;;  %v4119_v53 = vpop.f32.mrb[51].mxu0 }
 0xfda   : > { %v777_v47 = vmul.f32 1.442695, %v3712_v43 }
 0xfdb   : > { %v3156_v54 = vadd.f32 %v3823_v44, %v3146_v50  ;;  %v3147_v55 = vadd.f32 %v3142_v48, %v3095_v51  ;;  %v3711_v51 = vmul.f32 -5.0, %v4987_v10 }
 0xfdd   : > { %v3157_v28 = vadd.f32 %v3823_v44, %v3147_v55  ;;  %v3158_v57 = vadd.f32 %v3156_v54, %v5205_v38  ;;  %v775_v55 = vmul.f32 1.442695, %v3711_v51 }
 0xfdf   : > { %v3164_v58 = vsel %vm694_vm1, %v3158_v57, 0.0  ;;  %v3159_v49 = vadd.f32 %v3157_v28, %v5207_v39 }
 0xfe0   : > { %3165 = vadd.xlane.f32.xlu0 %v3164_v58 }
 0xfe1   : > { %v3167_v59 = vsel %vm694_vm1, %v3159_v49, 0.0 }
 0xfe2   : > { %3168 = vadd.xlane.f32.xlu1 %v3167_v59 }
 0xff3   : > { %741 = vrot.lane.b32.xlu1 %v4987_v10, %s4721_s27 }
 0xff7   : > { %747 = vrot.lane.b32.xlu1 %v4987_v10, %s4722_s23 }
 0xffb   : > { %749 = vrot.lane.b32.xlu1 %v4989_v11, %s4722_s23 }
0x106d   : > { %v3166_v38 = vpop.xlane.xlu0 %3165 }
0x106e   : > { %v3170_v60 = vmul.f32 0.03125, %v3166_v38 }
0x106f   : > { %v3169_v62 = vpop.xlane.xlu1 %3168 }
0x1070   : > { %v3172_v63 = vsub.f32 %v3158_v57, %v3170_v60  ;;  %v3171_v39 = vmul.f32 0.03125, %v3169_v62  ;;  %v3842_v62 = vld [vmem:[%s5889_s9 + $0x1] ss:$0 sm:$0xff] }
0x1072   : > { %v3173_v1 = vsub.f32 %v3159_v49, %v3171_v39  ;;  %v3174_v2 = vmul.f32 %v3172_v63, %v3172_v63 }
0x1073   : > { %v742_v0 = vpop.permute.xlu1 %741 }
0x1074   : > { %v3176_v5 = vsel %vm694_vm1, %v3174_v2, 0.0  ;;  %v3175_v6 = vmul.f32 %v3173_v1, %v3173_v1  ;;  %v3713_v54 = vmul.f32 -5.0, %v742_v0 }
0x1075   : > { %3177 = vadd.xlane.f32.xlu0 %v3176_v5 }
0x1076   : > { %v3179_v7 = vsel %vm694_vm1, %v3175_v6, 0.0  ;;  %v779_v57 = vmul.f32 1.442695, %v3713_v54 }
0x1077   : > { %v748_v42 = vpop.permute.xlu1 %747 }
0x1078   : > { %v3715_v58 = vmul.f32 -5.0, %v748_v42 }
0x1079   : > { %3180 = vadd.xlane.f32.xlu0 %v3179_v7 }
0x107a   : > { %v783_v59 = vmul.f32 1.442695, %v3715_v58 }
0x107b   : > { %v750_v50 = vpop.permute.xlu1 %749 }
0x107c   : > { %v3716_v52 = vmul.f32 -5.0, %v750_v50 }
0x107e   : > { %v785_v28 = vmul.f32 1.442695, %v3716_v52 }
0x108f   : > { %743 = vrot.lane.b32.xlu0 %v4989_v11, %s4721_s27 }
0x1102   : > { %v3178_v15 = vpop.xlane.xlu0 %3177 }
0x1103   : > { %v3182_v16 = vmul.f32 0.03125, %v3178_v15 }
0x1105   : > { %v3184_v17 = vadd.f32 1e-05, %v3182_v16 }
0x1106   : > { %v3181_v18 = vpop.xlane.xlu0 %3180 }
0x1107   : > { %4348 = vrsqrt.f32 %v3184_v17  ;;  %v3183_v14 = vmul.f32 0.03125, %v3181_v18 }
0x1109   : > { %v3185_v19 = vadd.f32 1e-05, %v3183_v14 }
0x110a   : > { %v744_v44 = vpop.permute.xlu0 %743 }
0x110b   : > { %4350 = vrsqrt.f32 %v3185_v19  ;;  %v3714_v48 = vmul.f32 -5.0, %v744_v44 }
0x110c   : > { %4352 = vpow2.f32 %v777_v47 }
0x110d   : > { %v781_v53 = vmul.f32 1.442695, %v3714_v48 }
0x110f   : > { %4354 = vpow2.f32 %v781_v53 }
0x1110   : > { %4356 = vpow2.f32 %v775_v55 }
0x1111   : > { %v4349_v20 = vpop.eup %4348  ;;  %4358 = vpow2.f32 %v785_v28 }
0x1112   : > { %v3188_v21 = vmul.f32 %v4349_v20, %v3172_v63  ;;  %4360 = vpow2.f32 %v779_v57  ;;  %v4725_v57 = vmov 96  }
0x1113   : > { %4362 = vpow2.f32 %v783_v59  ;;  %4259 = vset.pattern.permute.xlu1 %v4725_v57  ;;  %4258 = vset.pattern.permute.xlu0 %v4725_v57 }
0x1114   : > { %v3196_v24 = vmul.f32 %v3826_v22, %v3188_v21 }
0x1115   : > { %v4351_v23 = vpop.eup %4350 }
0x1116   : > { %v3189_v25 = vmul.f32 %v4351_v23, %v3173_v1  ;;  %v3204_v3 = vadd.f32 %v3827_v26, %v3196_v24  ;;  %v4353_v49 = vpop.eup %4352 }
0x1117   : > { %v792_v38 = vadd.f32 1.0, %v4353_v49 }
0x1118   : > { %v3197_v29 = vmul.f32 %v3826_v22, %v3189_v25 }
0x1119   : > { %v4355_v60 = vpop.eup %4354  ;;  %4364 = vrcp.f32 %v792_v38 }
0x111a   : > { %v3205_v30 = vadd.f32 %v3827_v26, %v3197_v29  ;;  %v4357_v63 = vpop.eup %4356  ;;  %v794_v39 = vadd.f32 1.0, %v4355_v60 }
0x111b   : > { %v4359_v1 = vpop.eup %4358  ;;  %v791_v8 = vadd.f32 1.0, %v4357_v63 }
0x111c   : > { %v3206_v4 = vpack.c.bf16 %v3205_v30, %v3204_v3  ;;  %v4361_v9 = vpop.eup %4360  ;;  %v796_v12 = vadd.f32 1.0, %v4359_v1  ;;  %4366 = vrcp.f32 %v794_v39 }
0x111d   : > { %v793_v14 = vadd.f32 1.0, %v4361_v9  ;;  %4368 = vrcp.f32 %v791_v8  ;;  %v4363_v19 = vpop.eup %4362 }
0x111e   : > { %4125 = vmatmul.mubr.msk.bf16.vlgmr.msra.gmra.mrb[60].mxu1 %vm694_vm1, %v3206_v4  ;;  %4370 = vrcp.f32 %v796_v12  ;;  %v795_v22 = vadd.f32 1.0, %v4363_v19 }
0x111f   : > { %4372 = vrcp.f32 %v793_v14 }
0x1120   : > { %4374 = vrcp.f32 %v795_v22 }
0x1123   : > { %v4365_v21 = vpop.eup %4364 }
0x1124   : > { %v816_v23 = vadd.f32 1e-05, %v4365_v21 }
0x1126   : > { %v4367_v24 = vpop.eup %4366  ;;  %v824_v25 = vmul.f32 1.0986123, %v816_v23 }
0x1127   : > { %v4369_v26 = vpop.eup %4368  ;;  %v818_v29 = vadd.f32 1e-05, %v4367_v24 }
0x1128   : > { %v815_v4 = vadd.f32 1e-05, %v4369_v26  ;;  %v3766_v26 = vmul.f32 -5.0, %v5217_v45 }
0x11f1   : > { %v3269_v34 = vpop.f32.mrb[60].mxu1 }
0x11f2   : > { %v3270_v27 = vadd.f32 %v3829_v33, %v3269_v34  ;;  %v4126_v56 = vpop.f32.mrb[61].mxu1 }
0x11f3   : > { %v3272_v61 = vpop.f32.mrb[62].mxu1 }
0x11f4   : > { %v3273_v35 = vadd.f32 %v3829_v33, %v3272_v61  ;;  %v4127_v36 = vpop.f32.mrb[63].mxu1  ;;  %v3276_v37 = vmax.f32 %v3270_v27, 0.0  ;;  %v826_v33 = vmul.f32 1.0986123, %v818_v29  ;;  %v823_v27 = vmul.f32 1.0986123, %v815_v4 }
0x11f6   : > { %v3277_v40 = vmax.f32 %v3273_v35, 0.0  ;;  %v837_v61 = vmul.f32 1.442695, %v826_v33 }
0x11f8   : > { %v3278_v41 = vpack.c.bf16 %v3277_v40, %v3276_v37  ;;  %v831_v37 = vmul.f32 1.442695, %v823_v27 }
0x11fa   : > { %4137 = vmatmul.mubr.msk.bf16.vlgmr.msra.gmra.mrb[52].mxu0 %vm1946_vm5, %v3278_v41 }
0x12cd   : > { %v3357_v2 = vpop.f32.mrb[52].mxu0 }
0x12ce   : > { %v3358_v5 = vadd.f32 %v3842_v62, %v3357_v2  ;;  %v4138_v6 = vpop.f32.mrb[53].mxu0 }
0x12cf   : > { %v3360_v7 = vpop.f32.mrb[54].mxu0 }
0x12d0   : > { %v3361_v13 = vadd.f32 %v3842_v62, %v3360_v7  ;;  %v4139_v15 = vpop.f32.mrb[55].mxu0  ;;  %v5405_v16 = vadd.f32 %v3358_v5, %v3204_v3  ;;  %v4371_v3 = vpop.eup %4370 }
0x12d1   : > { %v4373_v31 = vpop.eup %4372  ;;  %v820_v32 = vadd.f32 1e-05, %v4371_v3 }
0x12d2   : > { %v3370_v17 = vsel %vm694_vm1, %v5405_v16, 0.0  ;;  %v5409_v18 = vadd.f32 %v3361_v13, %v3205_v30  ;;  %v833_v30 = vmul.f32 1.442695, %v824_v25  ;;  %v817_v34 = vadd.f32 1e-05, %v4373_v31  ;;  %v4375_v56 = vpop.eup %4374 }
0x12d3   : > { %3371 = vadd.xlane.f32.xlu1 %v3370_v17  ;;  %v828_v35 = vmul.f32 1.0986123, %v820_v32  ;;  %v819_v36 = vadd.f32 1e-05, %v4375_v56  ;;  %v2143_v32 = vmul.f32 1.442695, %v3766_v26 }
0x12d4   : > { %v3373_v20 = vsel %vm694_vm1, %v5409_v18, 0.0  ;;  %4376 = vpow2.f32 %v833_v30  ;;  %v825_v40 = vmul.f32 1.0986123, %v817_v34  ;;  %v3767_v30 = vmul.f32 -5.0, %v5219_v46 }
0x12d5   : > { %3374 = vadd.xlane.f32.xlu0 %v3373_v20  ;;  %4378 = vpow2.f32 %v837_v61  ;;  %v841_v41 = vmul.f32 1.442695, %v828_v35  ;;  %v827_v0 = vmul.f32 1.0986123, %v819_v36 }
0x12d6   : > { %4380 = vpow2.f32 %v831_v37  ;;  %v2145_v27 = vmul.f32 1.442695, %v3767_v30 }
0x12d7   : > { %4382 = vpow2.f32 %v841_v41  ;;  %v839_v43 = vmul.f32 1.442695, %v827_v0 }
0x12de   : > { %v4377_v42 = vpop.eup %4376 }
0x12df   : > { %v5425_v44 = vadd.f32 -1.0, %v4377_v42  ;;  %v4379_v47 = vpop.eup %4378 }
0x12e0   : > { %v5431_v48 = vadd.f32 -1.0, %v4379_v47 }
0x12e4   : > { %755 = vrot.lane.b32.xlu1 %v4989_v11, %s4723_s20  ;;  %v835_v11 = vmul.f32 1.442695, %v825_v40 }
0x12e6   : > { %4384 = vpow2.f32 %v835_v11 }
0x12e7   : > { %4386 = vpow2.f32 %v839_v43 }
0x12e8   : > { %2111 = vrot.lane.b32.xlu1 %v5219_v46, %s4721_s27 }
0x12eb   : > { %753 = vrot.lane.b32.xlu0 %v4987_v10, %s4723_s20  ;;  %v4381_v10 = vpop.eup %4380 }
0x12ec   : > { %2117 = vrot.lane.b32.xlu1 %v5219_v46, %s4722_s23  ;;  %v4383_v50 = vpop.eup %4382  ;;  %v5437_v51 = vadd.f32 -1.0, %v4381_v10 }
0x12ed   : > { %v5439_v53 = vadd.f32 -1.0, %v4383_v50 }
0x12ef   : > { %2109 = vrot.lane.b32.xlu0 %v5217_v45, %s4721_s27  ;;  %s3866_s27 = sshll.u32 %s4958_s22, 7 }
0x12f0   : > { %2123 = vrot.lane.b32.xlu1 %v5219_v46, %s4723_s20  ;;  %v4385_v52 = vpop.eup %4384  ;;  %s5461_s14 = scalar_lea.vmem %s5899_s19, %s3866_s27  ;;  %s3463_s27 = sand.u32 1, %s4852_s1  }
0x12f1   : > { %v5445_v54 = vadd.f32 -1.0, %v4385_v52  ;;  %v4387_v55 = vpop.eup %4386  ;;  %s5743_s29 = scalar_lea.sflag [#allocation9], %s3463_s27 }
0x12f2   : > { %v5449_v28 = vadd.f32 -1.0, %v4387_v55 }
0x12f3   : > { %2115 = vrot.lane.b32.xlu0 %v5217_v45, %s4722_s23  ;;  %s5920_s23 = sshll.u32 %s4852_s1, 11 }
0x12f4   : > { %865 = vrot.lane.b32.xlu1 %v5425_v44, %s4724_s16  ;;  %s5739_s24 = scalar_lea.hbm %s5897_s17, %s5920_s23 }
0x12f7   : > { %2121 = vrot.lane.b32.xlu0 %v5217_v45, %s4723_s20  ;;  %s5644_s20 = scalar_lea.vmem [#allocation10], %s5955_s0  ;;  %s4576_s0 = scalar_lea.vmem %s5741_s25, 2048 }
0x12f8   : > { %869 = vrot.lane.b32.xlu1 %v5431_v48, %s4724_s16  ;;  %p4577_p12 = scmp.ne.s32.totalorder %s5741_s25, %s4576_s0 }
0x12fa   : > { %p4578_p2 = pnand %p4577_p12, %p5956_p1 }
0x12fb   : > { %863 = vrot.lane.b32.xlu0 %v5437_v51, %s4724_s16 }
0x12fc   : > { %873 = vrot.lane.b32.xlu1 %v5439_v53, %s4724_s16  ;;  %p4579_p3 = pneg %p4578_p2 }
0x12ff   : > { %867 = vrot.lane.b32.xlu0 %v5445_v54, %s4724_s16 }
0x1303   : > { %871 = vrot.lane.b32.xlu0 %v5449_v28, %s4724_s16 }
0x1360   : > { %v5453_v58 = vpop.xlane.xlu1 %3371 }
0x1362   : > { %v5455_v49 = vpop.xlane.xlu0 %3374 }
0x1364   : > { %v756_v59 = vpop.permute.xlu1 %755 }
0x1365   : > { %v3718_v38 = vmul.f32 -5.0, %v756_v59 }
0x1366   : > { %v754_v60 = vpop.permute.xlu0 %753 }
0x1367   : > { %v789_v62 = vmul.f32 1.442695, %v3718_v38  ;;  %v3717_v63 = vmul.f32 -5.0, %v754_v60 }
0x1368   : > { %v2112_v39 = vpop.permute.xlu1 %2111 }
0x1369   : > { %4388 = vpow2.f32 %v789_v62  ;;  %v787_v1 = vmul.f32 1.442695, %v3717_v63  ;;  %v3769_v56 = vmul.f32 -5.0, %v2112_v39 }
0x136a   : > { %v2110_v2 = vpop.permute.xlu0 %2109 }
0x136b   : > { %4390 = vpow2.f32 %v787_v1  ;;  %v3768_v33 = vmul.f32 -5.0, %v2110_v2  ;;  %v2149_v36 = vmul.f32 1.442695, %v3769_v56 }
0x136c   : > { %v2118_v5 = vpop.permute.xlu1 %2117 }
0x136d   : > { %v2147_v61 = vmul.f32 1.442695, %v3768_v33  ;;  %v3771_v37 = vmul.f32 -5.0, %v2118_v5 }
0x136e   : > { %v2116_v6 = vpop.permute.xlu0 %2115 }
0x136f   : > { %v3770_v35 = vmul.f32 -5.0, %v2116_v6  ;;  %v2153_v46 = vmul.f32 1.442695, %v3771_v37 }
0x1370   : > { %v2124_v7 = vpop.permute.xlu1 %2123 }
0x1371   : > { %v2151_v45 = vmul.f32 1.442695, %v3770_v35  ;;  %v3773_v11 = vmul.f32 -5.0, %v2124_v7 }
0x1372   : > { %v2122_v8 = vpop.permute.xlu0 %2121 }
0x1373   : > { %v4389_v9 = vpop.eup %4388  ;;  %v3772_v40 = vmul.f32 -5.0, %v2122_v8  ;;  %v2157_v50 = vmul.f32 1.442695, %v3773_v11 }
0x1374   : > { %v798_v12 = vadd.f32 1.0, %v4389_v9  ;;  %v866_v13 = vpop.permute.xlu1 %865 }
0x1375   : > { %v4391_v15 = vpop.eup %4390  ;;  %889 = vst.msk [vmem:[%s5461_s14 + $0x8] sm:$0xff] %vm887_vm6, %v866_v13  ;;  %v2155_v43 = vmul.f32 1.442695, %v3772_v40  ;;  %v3377_v13 = vmul.f32 0.03125, %v5455_v49 }
0x1376   : > { %4392 = vrcp.f32 %v798_v12  ;;  %v797_v17 = vadd.f32 1.0, %v4391_v15  ;;  %v864_v14 = vpop.permute.xlu0 %863 }
0x1377   : > { %888 = vst.msk [vmem:[%s5461_s14] sm:$0xff] %vm887_vm6, %v864_v14  ;;  %v3376_v14 = vmul.f32 0.03125, %v5453_v58 }
0x1378   : > { %4394 = vrcp.f32 %v797_v17  ;;  %v870_v19 = vpop.permute.xlu1 %869 }
0x1379   : > { %891 = vst.msk [vmem:[%s5461_s14 + $0x18] sm:$0xff] %vm887_vm6, %v870_v19 }
0x137a   : > { %v868_v20 = vpop.permute.xlu0 %867 }
0x137b   : > { %890 = vst.msk [vmem:[%s5461_s14 + $0x10] sm:$0xff] %vm887_vm6, %v868_v20 }
0x137c   : > { %v874_v21 = vpop.permute.xlu1 %873 }
0x137d   : > { %893 = vst.msk [vmem:[%s5461_s14 + $0x28] sm:$0xff] %vm887_vm6, %v874_v21  ;;  %v5488_v21 = vsub.f32 %v5409_v18, %v3377_v13 }
0x137e   : > { %v872_v22 = vpop.permute.xlu0 %871 }
0x137f   : > { %892 = vst.msk [vmem:[%s5461_s14 + $0x20] sm:$0xff] %vm887_vm6, %v872_v22 }
0x1380   : > { %v4393_v23 = vpop.eup %4392 }
0x1381   : > { %v822_v24 = vadd.f32 1e-05, %v4393_v23 }
0x1382   : > { %v4395_v25 = vpop.eup %4394 }
0x1383   : > { %v821_v29 = vadd.f32 1e-05, %v4395_v25  ;;  %v830_v3 = vmul.f32 1.0986123, %v822_v24  ;;  %v5491_v25 = vsub.f32 %v5405_v16, %v3376_v14 }
0x1385   : > { %v845_v4 = vmul.f32 1.442695, %v830_v3  ;;  %v829_v31 = vmul.f32 1.0986123, %v821_v29  ;;  %v3381_v3 = vmul.f32 %v5488_v21, %v5488_v21  ;;  %v3380_v18 = vmul.f32 %v5491_v25, %v5491_v25 }
0x1387   : > { %4396 = vpow2.f32 %v845_v4  ;;  %v843_v34 = vmul.f32 1.442695, %v829_v31  ;;  %v3385_v16 = vsel %vm694_vm1, %v3381_v3, 0.0 }
0x1389   : > { %4398 = vpow2.f32 %v843_v34 }
0x138a   : > { %4400 = vpow2.f32 %v2143_v32 }
0x138b   : > { %4402 = vpow2.f32 %v2145_v27 }
0x138c   : > { %4404 = vpow2.f32 %v2147_v61 }
0x138d   : > { %4406 = vpow2.f32 %v2149_v36  ;;  %v3382_v36 = vsel %vm694_vm1, %v3380_v18, 0.0 }
0x138e   : > { %4408 = vpow2.f32 %v2151_v45 }
0x138f   : > { %4410 = vpow2.f32 %v2153_v46 }
0x1390   : > { %4412 = vpow2.f32 %v2155_v43 }
0x1391   : > { %v4397_v41 = vpop.eup %4396  ;;  %4414 = vpow2.f32 %v2157_v50 }
0x1392   : > { %v5477_v0 = vadd.f32 -1.0, %v4397_v41 }
0x1393   : > { %v4399_v42 = vpop.eup %4398 }
0x1394   : > { %877 = vrot.lane.b32.xlu1 %v5477_v0, %s4724_s16  ;;  %v5481_v47 = vadd.f32 -1.0, %v4399_v42  ;;  %v4401_v10 = vpop.eup %4400 }
0x1395   : > { %v4403_v52 = vpop.eup %4402  ;;  %v2159_v55 = vadd.f32 1.0, %v4401_v10 }
0x1396   : > { %875 = vrot.lane.b32.xlu0 %v5481_v47, %s4724_s16  ;;  %v4405_v57 = vpop.eup %4404  ;;  %v2160_v59 = vadd.f32 1.0, %v4403_v52 }
0x1397   : > { %v4407_v38 = vpop.eup %4406  ;;  %4416 = vrcp.f32 %v2159_v55  ;;  %v2161_v60 = vadd.f32 1.0, %v4405_v57 }
0x1398   : > { %v4409_v62 = vpop.eup %4408  ;;  %4418 = vrcp.f32 %v2160_v59  ;;  %v2162_v63 = vadd.f32 1.0, %v4407_v38 }
0x1399   : > { %v4411_v39 = vpop.eup %4410  ;;  %4420 = vrcp.f32 %v2161_v60  ;;  %v2163_v1 = vadd.f32 1.0, %v4409_v62 }
0x139a   : > { %v4413_v2 = vpop.eup %4412  ;;  %4422 = vrcp.f32 %v2162_v63  ;;  %v2164_v5 = vadd.f32 1.0, %v4411_v39 }
0x139b   : > { %v4415_v6 = vpop.eup %4414  ;;  %4424 = vrcp.f32 %v2163_v1  ;;  %v2165_v7 = vadd.f32 1.0, %v4413_v2 }
0x139c   : > { %4426 = vrcp.f32 %v2164_v5  ;;  %v2166_v9 = vadd.f32 1.0, %v4415_v6 }
0x139d   : > { %4428 = vrcp.f32 %v2165_v7 }
0x139e   : > { %4430 = vrcp.f32 %v2166_v9 }
0x13a1   : > { %v4417_v8 = vpop.eup %4416 }
0x13a2   : > { %v4419_v12 = vpop.eup %4418  ;;  %v2183_v15 = vadd.f32 1e-05, %v4417_v8 }
0x13a3   : > { %v4421_v17 = vpop.eup %4420  ;;  %v2184_v19 = vadd.f32 1e-05, %v4419_v12 }
0x13a4   : > { %v4423_v20 = vpop.eup %4422  ;;  %v2185_v22 = vadd.f32 1e-05, %v4421_v17  ;;  %v2191_v23 = vmul.f32 1.0986123, %v2183_v15 }
0x13a5   : > { %v4425_v24 = vpop.eup %4424  ;;  %v2186_v26 = vadd.f32 1e-05, %v4423_v20  ;;  %v2192_v29 = vmul.f32 1.0986123, %v2184_v19 }
0x13a6   : > { %v4427_v49 = vpop.eup %4426  ;;  %v2193_v30 = vmul.f32 1.0986123, %v2185_v22  ;;  %v2187_v58 = vadd.f32 1e-05, %v4425_v24  ;;  %v2199_v4 = vmul.f32 1.442695, %v2191_v23 }
0x13a7   : > { %v4429_v31 = vpop.eup %4428  ;;  %v2194_v32 = vmul.f32 1.0986123, %v2186_v26  ;;  %v2188_v33 = vadd.f32 1e-05, %v4427_v49  ;;  %v2201_v34 = vmul.f32 1.442695, %v2192_v29 }
0x13a8   : > { %v4431_v27 = vpop.eup %4430  ;;  %v2203_v56 = vmul.f32 1.442695, %v2193_v30  ;;  %v2195_v61 = vmul.f32 1.0986123, %v2187_v58  ;;  %v2189_v35 = vadd.f32 1e-05, %v4429_v31  ;;  %4432 = vpow2.f32 %v2199_v4 }
0x13a9   : > { %4434 = vrcp.f32 %v5425_v44  ;;  %v2205_v37 = vmul.f32 1.442695, %v2194_v32  ;;  %v2196_v45 = vmul.f32 1.0986123, %v2188_v33  ;;  %v2190_v40 = vadd.f32 1e-05, %v4431_v27 }
0x13aa   : > { %4436 = vpow2.f32 %v2201_v34  ;;  %v2207_v41 = vmul.f32 1.442695, %v2195_v61  ;;  %v2197_v46 = vmul.f32 1.0986123, %v2189_v35 }
0x13ab   : > { %4438 = vrcp.f32 %v5437_v51  ;;  %v2209_v11 = vmul.f32 1.442695, %v2196_v45  ;;  %v2198_v42 = vmul.f32 1.0986123, %v2190_v40 }
0x13ac   : > { %4440 = vpow2.f32 %v2203_v56  ;;  %v2211_v44 = vmul.f32 1.442695, %v2197_v46 }
0x13ad   : > { %4442 = vrcp.f32 %v5445_v54  ;;  %v2213_v10 = vmul.f32 1.442695, %v2198_v42 }
0x13ae   : > { %4444 = vpow2.f32 %v2205_v37 }
0x13af   : > { %4446 = vrcp.f32 %v5431_v48 }
0x13b0   : > { %4448 = vpow2.f32 %v2207_v41 }
0x13b1   : > { %4450 = vrcp.f32 %v5449_v28 }
0x13b2   : > { %v4433_v43 = vpop.eup %4432  ;;  %4452 = vpow2.f32 %v2209_v11 }
0x13b3   : > { %v5504_v50 = vpop.eup %4434  ;;  %4454 = vrcp.f32 %v5439_v53  ;;  %v5510_v54 = vadd.f32 -1.0, %v4433_v43 }
0x13b4   : > { %v4437_v51 = vpop.eup %4436  ;;  %4456 = vpow2.f32 %v2211_v44  ;;  %v921_v55 = vmul.f32 0.5, %v5504_v50 }
0x13b5   : > { %3386 = vadd.xlane.f32.xlu0 %v3385_v16  ;;  %v5507_v52 = vpop.eup %4438  ;;  %4458 = vrcp.f32 %v5477_v0  ;;  %v5516_v57 = vadd.f32 -1.0, %v4437_v51 }
0x13b6   : > { %v4441_v48 = vpop.eup %4440  ;;  %4460 = vpow2.f32 %v2213_v10  ;;  %v920_v53 = vmul.f32 0.5, %v5507_v52  ;;  %v929_v62 = vmul.f32 %v5504_v50, %v921_v55  ;;  %v913_v55 = vmul.f32 0.3989423, %v5504_v50 }
0x13b7   : > { %v5513_v28 = vpop.eup %4442  ;;  %4462 = vrcp.f32 %v5481_v47  ;;  %v5521_v60 = vadd.f32 -1.0, %v4441_v48  ;;  %v912_v48 = vmul.f32 0.3989423, %v5507_v52 }
0x13b8   : > { %3383 = vadd.xlane.f32.xlu1 %v3382_v36  ;;  %v4445_v59 = vpop.eup %4444  ;;  %4464 = vrcp.f32 %v5510_v54  ;;  %v922_v63 = vmul.f32 0.5, %v5513_v28  ;;  %v928_v2 = vmul.f32 %v5507_v52, %v920_v53 }
0x13b9   : > { %v5519_v38 = vpop.eup %4446  ;;  %v5528_v1 = vadd.f32 -1.0, %v4445_v59  ;;  %4466 = vrcp.f32 %v5516_v57  ;;  %v914_v59 = vmul.f32 0.3989423, %v5513_v28 }
0x13ba   : > { %v4449_v0 = vpop.eup %4448  ;;  %v923_v5 = vmul.f32 0.5, %v5519_v38  ;;  %4468 = vrcp.f32 %v5521_v60  ;;  %v930_v9 = vmul.f32 %v5513_v28, %v922_v63  ;;  %v915_v53 = vmul.f32 0.3989423, %v5519_v38 }
0x13bb   : > { %v5526_v39 = vpop.eup %4450  ;;  %v5536_v7 = vadd.f32 -1.0, %v4449_v0  ;;  %4470 = vrcp.f32 %v5528_v1 }
0x13bc   : > { %v4453_v47 = vpop.eup %4452  ;;  %v924_v12 = vmul.f32 0.5, %v5526_v39  ;;  %v931_v14 = vmul.f32 %v5519_v38, %v923_v5  ;;  %v916_v0 = vmul.f32 0.3989423, %v5526_v39 }
0x13bd   : > { %v5533_v6 = vpop.eup %4454  ;;  %v5543_v15 = vadd.f32 -1.0, %v4453_v47  ;;  %4472 = vrcp.f32 %v5536_v7 }
0x13be   : > { %v4457_v8 = vpop.eup %4456  ;;  %v925_v19 = vmul.f32 0.5, %v5533_v6  ;;  %v932_v23 = vmul.f32 %v5526_v39, %v924_v12  ;;  %v663_v12 = vld [vmem:[#allocation2 + $0x8] sm:$0xff] }
0x13bf   : > { %v5540_v13 = vpop.eup %4458  ;;  %v5550_v22 = vadd.f32 -1.0, %v4457_v8  ;;  %4474 = vrcp.f32 %v5543_v15 }
0x13c0   : > { %v4461_v17 = vpop.eup %4460  ;;  %v927_v24 = vmul.f32 0.5, %v5540_v13  ;;  %v933_v49 = vmul.f32 %v5533_v6, %v925_v19  ;;  %v665_v19 = vmul.f32 %v663_v12, %v663_v12 }
0x13c1   : > { %v5547_v20 = vpop.eup %4462  ;;  %v5557_v29 = vadd.f32 -1.0, %v4461_v17  ;;  %4476 = vrcp.f32 %v5550_v22 }
0x13c2   : > { %v5554_v26 = vpop.eup %4464  ;;  %v926_v3 = vmul.f32 0.5, %v5547_v20  ;;  %v935_v58 = vmul.f32 %v5540_v13, %v927_v24 }
0x13c3   : > { %v5561_v30 = vpop.eup %4466  ;;  %v2288_v4 = vmul.f32 0.5, %v5554_v26  ;;  %4478 = vrcp.f32 %v5557_v29 }
0x13c4   : > { %v5566_v31 = vpop.eup %4468  ;;  %v934_v18 = vmul.f32 %v5547_v20, %v926_v3  ;;  %v2289_v32 = vmul.f32 0.5, %v5561_v30 }
0x13c5   : > { %v5571_v33 = vpop.eup %4470  ;;  %v2296_v34 = vmul.f32 %v5554_v26, %v2288_v4  ;;  %v2290_v27 = vmul.f32 0.5, %v5566_v31 }
0x13c6   : > { %v2297_v56 = vmul.f32 %v5561_v30, %v2289_v32  ;;  %v2291_v61 = vmul.f32 0.5, %v5571_v33 }
0x13c7   : > { %v5575_v16 = vpop.eup %4472  ;;  %v2298_v36 = vmul.f32 %v5566_v31, %v2290_v27 }
0x13c8   : > { %v2292_v37 = vmul.f32 0.5, %v5575_v16  ;;  %v2299_v40 = vmul.f32 %v5571_v33, %v2291_v61 }
0x13c9   : > { %943 = vperm.xlu1 %4259, %v929_v62   ;;  %v5579_v35 = vpop.eup %4474  ;;  %v917_v62 = vmul.f32 0.3989423, %v5533_v6 }
0x13ca   : > { %v2293_v41 = vmul.f32 0.5, %v5579_v35  ;;  %v2300_v11 = vmul.f32 %v5575_v16, %v2292_v37 }
0x13cb   : > { %938 = vperm.xlu0 %4258, %v928_v2   ;;  %v5583_v45 = vpop.eup %4476 }
0x13cc   : > { %v2294_v42 = vmul.f32 0.5, %v5583_v45  ;;  %v2301_v44 = vmul.f32 %v5579_v35, %v2293_v41 }
0x13cd   : > { %948 = vperm.xlu1 %4259, %v930_v9   ;;  %v5587_v46 = vpop.eup %4478  ;;  %v662_v9 = vld [vmem:[#allocation2] sm:$0xff] }
0x13ce   : > { %v2295_v43 = vmul.f32 0.5, %v5587_v46  ;;  %v2302_v10 = vmul.f32 %v5583_v45, %v2294_v42 }
0x13cf   : > { %953 = vperm.xlu0 %4258, %v931_v14   ;;  %v664_v14 = vmul.f32 %v662_v9, %v662_v9 }
0x13d0   : > { %v2303_v51 = vmul.f32 %v5587_v46, %v2295_v43 }
0x13d1   : > { %958 = vperm.xlu1 %4259, %v932_v23   ;;  %v666_v4 = vsub.f32 0.0, %v664_v14 }
0x13d3   : > { %963 = vperm.xlu0 %4258, %v933_v49   ;;  %v3850_v49 = vld [vmem:[%s5892_s12 + $0x1] ss:$0 sm:$0xff] }
0x13d5   : > { %973 = vperm.xlu1 %4259, %v935_v58  }
0x13d7   : > { %968 = vperm.xlu0 %4258, %v934_v18   ;;  %v3851_v18 = vld [vmem:[%s5893_s13 + $0x1] ss:$0 sm:$0xff] }
0x13d9   : > { %2306 = vperm.xlu1 %4259, %v2296_v34   ;;  %v667_v34 = vsub.f32 0.0, %v665_v19 }
0x13db   : > { %2311 = vperm.xlu0 %4258, %v2297_v56  }
0x13dd   : > { %2316 = vperm.xlu1 %4259, %v2298_v36  }
0x13df   : > { %2321 = vperm.xlu0 %4258, %v2299_v40  }
0x13e1   : > { %2326 = vperm.xlu1 %4259, %v2300_v11  }
0x13e3   : > { %2331 = vperm.xlu0 %4258, %v2301_v44  }
0x13e5   : > { %2336 = vperm.xlu1 %4259, %v2302_v10  }
0x13e7   : > { %2341 = vperm.xlu0 %4258, %v2303_v51  }
0x13e9   : > { %1002 = vperm.xlu1 %4259, %v912_v48  }
0x13eb   : > { %1007 = vperm.xlu0 %4258, %v913_v55  }
0x13ed   : > { %1012 = vperm.xlu1 %4259, %v914_v59  }
0x13ef   : > { %1017 = vperm.xlu0 %4258, %v915_v53  }
0x13f1   : > { %1022 = vperm.xlu1 %4259, %v916_v0  }
0x13f3   : > { %1027 = vperm.xlu0 %4258, %v917_v62  }
0x1406   : > { %v878_v63 = vpop.permute.xlu1 %877 }
0x1407   : > { %895 = vst.msk [vmem:[%s5461_s14 + $0x38] sm:$0xff] %vm887_vm6, %v878_v63 }
0x1408   : > { %v876_v52 = vpop.permute.xlu0 %875 }
0x1409   : > { %894 = vst.msk [vmem:[%s5461_s14 + $0x30] sm:$0xff] %vm887_vm6, %v876_v52 }
0x1442   : > { %v3387_v50 = vpop.xlane.xlu0 %3386 }
0x1443   : > { %v3389_v47 = vmul.f32 0.03125, %v3387_v50 }
0x1445   : > { %v3391_v2 = vadd.f32 1e-05, %v3389_v47  ;;  %v3384_v28 = vpop.xlane.xlu1 %3383 }
0x1446   : > { %v3388_v5 = vmul.f32 0.03125, %v3384_v28 }
0x1447   : > { %4480 = vrsqrt.f32 %v3391_v2 }
0x1448   : > { %v3390_v38 = vadd.f32 1e-05, %v3388_v5 }
0x1449   : > { %v944_v8 = vpop.permute.xlu1 %943 }
0x144a   : > { %4482 = vrsqrt.f32 %v3390_v38  ;;  %v939_v39 = vpop.permute.xlu0 %938  ;;  %v977_v42 = vmul.f32 %v944_v8, %v667_v34 }
0x144b   : > { %v976_v41 = vmul.f32 %v939_v39, %v666_v4 }
0x144c   : > { %v986_v0 = vmul.f32 1.442695, %v977_v42  ;;  %v919_v42 = vmul.f32 0.3989423, %v5540_v13  ;;  %v2283_v13 = vmul.f32 0.3989423, %v5571_v33 }
0x144d   : > { %v949_v6 = vpop.permute.xlu1 %948  ;;  %v984_v48 = vmul.f32 1.442695, %v976_v41 }
0x144e   : > { %v954_v17 = vpop.permute.xlu0 %953  ;;  %v978_v55 = vmul.f32 %v949_v6, %v666_v4 }
0x144f   : > { %v979_v62 = vmul.f32 %v954_v17, %v667_v34  ;;  %4484 = vpow2.f32 %v984_v48 }
0x1450   : > { %v988_v47 = vmul.f32 1.442695, %v978_v55  ;;  %4486 = vpow2.f32 %v986_v0  ;;  %v2281_v0 = vmul.f32 0.3989423, %v5561_v30  ;;  %v2287_v30 = vmul.f32 0.3989423, %v5587_v46 }
0x1451   : > { %v4481_v23 = vpop.eup %4480  ;;  %v959_v24 = vpop.permute.xlu1 %958  ;;  %v990_v5 = vmul.f32 1.442695, %v979_v62  ;;  %v2284_v62 = vmul.f32 0.3989423, %v5575_v16 }
0x1452   : > { %v964_v3 = vpop.permute.xlu0 %963  ;;  %v3395_v58 = vmul.f32 %v4481_v23, %v5488_v21  ;;  %v980_v2 = vmul.f32 %v959_v24, %v666_v4  ;;  %4488 = vpow2.f32 %v988_v47 }
0x1453   : > { %v981_v38 = vmul.f32 %v964_v3, %v667_v34  ;;  %4490 = vpow2.f32 %v990_v5 }
0x1454   : > { %v4483_v32 = vpop.eup %4482  ;;  %v3403_v27 = vmul.f32 %v3850_v49, %v3395_v58  ;;  %v992_v12 = vmul.f32 1.442695, %v980_v2 }
0x1455   : > { %v974_v56 = vpop.permute.xlu1 %973  ;;  %v3394_v61 = vmul.f32 %v4483_v32, %v5491_v25  ;;  %v994_v17 = vmul.f32 1.442695, %v981_v38 }
0x1456   : > { %v5613_v36 = vmul.f32 %v974_v56, %v667_v34  ;;  %v969_v37 = vpop.permute.xlu0 %968  ;;  %v5615_v40 = vadd.f32 %v3851_v18, %v3403_v27  ;;  %4492 = vpow2.f32 %v992_v12 }
0x1457   : > { %v5617_v11 = vmul.f32 %v969_v37, %v666_v4  ;;  %v3402_v21 = vmul.f32 %v3850_v49, %v3394_v61  ;;  %4494 = vpow2.f32 %v994_v17  ;;  %v918_v49 = vmul.f32 0.3989423, %v5547_v20 }
0x1458   : > { %v3417_v44 = vsel %vm694_vm1, %v5615_v40, 0.0 }
0x1459   : > { %v2307_v43 = vpop.permute.xlu1 %2306  ;;  %3418 = vadd.xlane.f32.xlu1 %v3417_v44  ;;  %v5621_v10 = vadd.f32 %v3851_v18, %v3402_v21  ;;  %v4485_v3 = vpop.eup %4484  ;;  %v2282_v44 = vmul.f32 0.3989423, %v5566_v31  ;;  %v2286_v31 = vmul.f32 0.3989423, %v5583_v45  ;;  %v996_v33 = vmul.f32 1.442695, %v5617_v11 }
0x145a   : > { %v5623_v51 = vmul.f32 %v2307_v43, %v666_v4  ;;  %v2312_v25 = vpop.permute.xlu0 %2311  ;;  %v4487_v18 = vpop.eup %4486 }
0x145b   : > { %v5625_v59 = vmul.f32 %v2312_v25, %v667_v34  ;;  %v3414_v53 = vsel %vm694_vm1, %v5621_v10, 0.0  ;;  %4496 = vpow2.f32 %v996_v33 }
0x145c   : > { %3415 = vadd.xlane.f32.xlu0 %v3414_v53  ;;  %v2352_v16 = vmul.f32 1.442695, %v5623_v51 }
0x145d   : > { %v2317_v63 = vpop.permute.xlu1 %2316  ;;  %v2354_v46 = vmul.f32 1.442695, %v5625_v59 }
0x145e   : > { %v5629_v52 = vmul.f32 %v2317_v63, %v666_v4  ;;  %v2322_v50 = vpop.permute.xlu0 %2321  ;;  %v2285_v63 = vmul.f32 0.3989423, %v5579_v35  ;;  %v998_v35 = vmul.f32 1.442695, %v5613_v36  ;;  %4498 = vpow2.f32 %v2352_v16 }
0x145f   : > { %v5631_v28 = vmul.f32 %v2322_v50, %v667_v34 }
0x1460   : > { %v2356_v45 = vmul.f32 1.442695, %v5629_v52  ;;  %4500 = vpow2.f32 %v998_v35 }
0x1461   : > { %v2327_v8 = vpop.permute.xlu1 %2326  ;;  %v2358_v36 = vmul.f32 1.442695, %v5631_v28 }
0x1462   : > { %v5633_v39 = vmul.f32 %v2327_v8, %v666_v4  ;;  %v2332_v9 = vpop.permute.xlu0 %2331  ;;  %4502 = vpow2.f32 %v2356_v45 }
0x1463   : > { %v5635_v6 = vmul.f32 %v2332_v9, %v667_v34  ;;  %4504 = vpow2.f32 %v2354_v46 }
0x1465   : > { %v2337_v14 = vpop.permute.xlu1 %2336  ;;  %v2362_v9 = vmul.f32 1.442695, %v5635_v6 }
0x1466   : > { %v5637_v19 = vmul.f32 %v2337_v14, %v666_v4  ;;  %v2342_v23 = vpop.permute.xlu0 %2341  ;;  %v2280_v4 = vmul.f32 0.3989423, %v5554_v26 }
0x1467   : > { %v5639_v24 = vmul.f32 %v2342_v23, %v667_v34  ;;  %v4489_v34 = vpop.eup %4488 }
0x1468   : > { %v4491_v61 = vpop.eup %4490  ;;  %v2364_v59 = vmul.f32 1.442695, %v5637_v19 }
0x1469   : > { %v1003_v58 = vpop.permute.xlu1 %1002  ;;  %v4493_v43 = vpop.eup %4492 }
0x146a   : > { %v1040_v32 = vmul.f32 %v4485_v3, %v1003_v58  ;;  %1032 = vperm.xlu1 %4259, %v918_v49   ;;  %v1008_v27 = vpop.permute.xlu0 %1007  ;;  %v4495_v25 = vpop.eup %4494  ;;  %v2366_v3 = vmul.f32 1.442695, %v5639_v24 }
0x146b   : > { %v1041_v56 = vmul.f32 %v4487_v18, %v1008_v27  ;;  %v4497_v47 = vpop.eup %4496 }
0x146c   : > { %1049 = vst.msk [vmem:[%s5644_s20] sm:$0xff] %vm1048_vm3, %v1040_v32  ;;  %v4499_v8 = vpop.eup %4498 }
0x146d   : > { %1050 = vst.msk [vmem:[%s5644_s20 + $0x8] sm:$0xff] %vm1048_vm3, %v1041_v56  ;;  %v1013_v20 = vpop.permute.xlu1 %1012  ;;  %v4501_v17 = vpop.eup %4500 }
0x146e   : > { %v1042_v37 = vmul.f32 %v4489_v34, %v1013_v20  ;;  %2370 = vperm.xlu1 %4259, %v2280_v4   ;;  %v1018_v41 = vpop.permute.xlu0 %1017  ;;  %v4503_v19 = vpop.eup %4502 }
0x146f   : > { %v1043_v21 = vmul.f32 %v4491_v61, %v1018_v41  ;;  %v4505_v6 = vpop.eup %4504 }
0x1470   : > { %1051 = vst.msk [vmem:[%s5644_s20 + $0x10] sm:$0xff] %vm1048_vm3, %v1042_v37 }
0x1471   : > { %1052 = vst.msk [vmem:[%s5644_s20 + $0x18] sm:$0xff] %vm1048_vm3, %v1043_v21  ;;  %v1023_v26 = vpop.permute.xlu1 %1022 }
0x1472   : > { %v1044_v48 = vmul.f32 %v4493_v43, %v1023_v26  ;;  %1037 = vperm.xlu0 %4258, %v919_v42   ;;  %2380 = vperm.xlu1 %4259, %v2282_v44   ;;  %v1028_v55 = vpop.permute.xlu0 %1027 }
0x1473   : > { %v1045_v53 = vmul.f32 %v4495_v25, %v1028_v55 }
0x1474   : > { %1053 = vst.msk [vmem:[%s5644_s20 + $0x20] sm:$0xff] %vm1048_vm3, %v1044_v48 }
0x1475   : > { %1054 = vst.msk [vmem:[%s5644_s20 + $0x28] sm:$0xff] %vm1048_vm3, %v1045_v53 }
0x1476   : > { %2375 = vperm.xlu0 %4258, %v2281_v0   ;;  %2390 = vperm.xlu1 %4259, %v2284_v62  }
0x147a   : > { %2385 = vperm.xlu0 %4258, %v2283_v13   ;;  %2400 = vperm.xlu1 %4259, %v2286_v31  }
0x147e   : > { %2395 = vperm.xlu0 %4258, %v2285_v63   ;;  %2231 = vrot.lane.b32.xlu1 %v5510_v54, %s4724_s16 }
0x1482   : > { %2405 = vperm.xlu0 %4258, %v2287_v30   ;;  %2235 = vrot.lane.b32.xlu1 %v5521_v60, %s4724_s16  ;;  %v2360_v60 = vmul.f32 1.442695, %v5633_v39 }
0x1484   : > { %4506 = vpow2.f32 %v2360_v60 }
0x1485   : > { %4508 = vpow2.f32 %v2358_v36 }
0x1486   : > { %2233 = vrot.lane.b32.xlu0 %v5516_v57, %s4724_s16  ;;  %4510 = vpow2.f32 %v2364_v59 }
0x1487   : > { %4512 = vpow2.f32 %v2362_v9 }
0x1488   : > { %4514 = vpow2.f32 %v2366_v3 }
0x148e   : > { %v4507_v32 = vpop.eup %4506 }
0x148f   : > { %v4509_v34 = vpop.eup %4508 }
0x1490   : > { %v4511_v20 = vpop.eup %4510 }
0x1491   : > { %v4513_v21 = vpop.eup %4512 }
0x1492   : > { %v4515_v26 = vpop.eup %4514 }
0x14e6   : > { %v3419_v54 = vpop.xlane.xlu1 %3418 }
0x14e7   : > { %v3421_v50 = vmul.f32 0.03125, %v3419_v54 }
0x14e9   : > { %v5680_v57 = vsub.f32 %v5615_v40, %v3421_v50  ;;  %v3416_v11 = vpop.xlane.xlu0 %3415 }
0x14ea   : > { %v3420_v51 = vmul.f32 0.03125, %v3416_v11  ;;  %v1033_v2 = vpop.permute.xlu1 %1032 }
0x14eb   : > { %v1046_v52 = vmul.f32 %v4497_v47, %v1033_v2  ;;  %v3425_v5 = vmul.f32 %v5680_v57, %v5680_v57 }
0x14ec   : > { %v5687_v38 = vsub.f32 %v5621_v10, %v3420_v51 }
0x14ed   : > { %1055 = vst.msk [vmem:[%s5644_s20 + $0x30] sm:$0xff] %vm1048_vm3, %v1046_v52  ;;  %v3429_v40 = vsel %vm694_vm1, %v3425_v5, 0.0 }
0x14ee   : > { %3430 = vadd.xlane.f32.xlu0 %v3429_v40  ;;  %v2371_v39 = vpop.permute.xlu1 %2370  ;;  %v3424_v28 = vmul.f32 %v5687_v38, %v5687_v38 }
0x14ef   : > { %v2408_v12 = vmul.f32 %v4499_v8, %v2371_v39 }
0x14f0   : > { %v3426_v10 = vsel %vm694_vm1, %v3424_v28, 0.0 }
0x14f1   : > { %3790 = vst.msk [vmem:[%s5644_s20 + $0x40] sm:$0xff] %vm1048_vm3, %v2408_v12  ;;  %3427 = vadd.xlane.f32.xlu1 %v3426_v10  ;;  %v1038_v14 = vpop.permute.xlu0 %1037 }
0x14f2   : > { %v1047_v23 = vmul.f32 %v4501_v17, %v1038_v14  ;;  %v2381_v49 = vpop.permute.xlu1 %2380 }
0x14f3   : > { %v2410_v58 = vmul.f32 %v4503_v19, %v2381_v49 }
0x14f4   : > { %1056 = vst.msk [vmem:[%s5644_s20 + $0x38] sm:$0xff] %vm1048_vm3, %v1047_v23 }
0x14f5   : > { %3792 = vst.msk [vmem:[%s5644_s20 + $0x50] sm:$0xff] %vm1048_vm3, %v2410_v58  ;;  %v2376_v18 = vpop.permute.xlu0 %2375 }
0x14f6   : > { %v2409_v27 = vmul.f32 %v4505_v6, %v2376_v18  ;;  %v2391_v56 = vpop.permute.xlu1 %2390 }
0x14f7   : > { %v2412_v4 = vmul.f32 %v4507_v32, %v2391_v56 }
0x14f8   : > { %3791 = vst.msk [vmem:[%s5644_s20 + $0x48] sm:$0xff] %vm1048_vm3, %v2409_v27 }
0x14f9   : > { %3794 = vst.msk [vmem:[%s5644_s20 + $0x60] sm:$0xff] %vm1048_vm3, %v2412_v4  ;;  %v2386_v24 = vpop.permute.xlu0 %2385 }
0x14fa   : > { %v2411_v61 = vmul.f32 %v4509_v34, %v2386_v24  ;;  %v2401_v37 = vpop.permute.xlu1 %2400 }
0x14fb   : > { %v2414_v41 = vmul.f32 %v4511_v20, %v2401_v37 }
0x14fc   : > { %3793 = vst.msk [vmem:[%s5644_s20 + $0x58] sm:$0xff] %vm1048_vm3, %v2411_v61 }
0x14fd   : > { %3796 = vst.msk [vmem:[%s5644_s20 + $0x70] sm:$0xff] %vm1048_vm3, %v2414_v41  ;;  %v2396_v42 = vpop.permute.xlu0 %2395 }
0x14fe   : > { %v2413_v44 = vmul.f32 %v4513_v21, %v2396_v42  ;;  %v2232_v43 = vpop.permute.xlu1 %2231 }
0x14ff   : > { %3782 = vst.msk [vmem:[%s5461_s14 + $0x40] sm:$0xff] %vm887_vm6, %v2232_v43 }
0x1500   : > { %3795 = vst.msk [vmem:[%s5644_s20 + $0x68] sm:$0xff] %vm1048_vm3, %v2413_v44 }
0x1501   : > { %v2406_v25 = vpop.permute.xlu0 %2405 }
0x1502   : > { %v2415_v48 = vmul.f32 %v4515_v26, %v2406_v25  ;;  %v2236_v55 = vpop.permute.xlu1 %2235  ;;  %2239 = vrot.lane.b32.xlu1 %v5536_v7, %s4724_s16 }
0x1503   : > { %3784 = vst.msk [vmem:[%s5461_s14 + $0x50] sm:$0xff] %vm887_vm6, %v2236_v55 }
0x1504   : > { %3797 = vst.msk [vmem:[%s5644_s20 + $0x78] sm:$0xff] %vm1048_vm3, %v2415_v48  ;;  %2237 = vrot.lane.b32.xlu0 %v5528_v1, %s4724_s16 }
0x1505   : > { %v2234_v53 = vpop.permute.xlu0 %2233 }
0x1506   : > { %3783 = vst.msk [vmem:[%s5461_s14 + $0x48] sm:$0xff] %vm887_vm6, %v2234_v53  ;;  %2243 = vrot.lane.b32.xlu1 %v5550_v22, %s4724_s16 }
0x1508   : > { %2241 = vrot.lane.b32.xlu0 %v5543_v15, %s4724_s16 }
0x150c   : > { %2245 = vrot.lane.b32.xlu0 %v5557_v29, %s4724_s16  ;;  %s4726_s16 = smov [#allocation8]  }
0x150d   : > { %s4580_s26 = sshll.u32 %s4726_s16, 4  ;;  %s4581_s26 = int_to_ptr.vmem [resolvable:$false] %s4580_s26 }
0x150e   : > { %s4582_s2 = scalar_lea.vmem %s4581_s26, 4096  ;;  %p4583_p4 = scmp.lt.s32.totalorder %s5741_s25, %s4581_s26 }
0x150f   : > { %p4584_p7 = scmp.lt.s32.totalorder %s4582_s2, %s4576_s0 }
0x1511   : > { %p4585_p8 = por %p4584_p7, %p4583_p4 }
0x1513   : > { %p4586_p11 = pnand %p4585_p8, %p4579_p3 }
0x1515   : > { %4589 = shalt.err (!%p4586_p11)
}
0x1516   : > { %s4590_s27 = scalar_lea.hbm %s5739_s24, 2048  ;;  %s4594_s16 = scalar_lea.hbm %s5897_s17, 4096 }
0x1517   : > { %p4591_p13 = scmp.ne.s32.totalorder %s5739_s24, %s4590_s27  ;;  %p4595_p6 = scmp.lt.u32.totalorder %s5739_s24, %s5897_s17 }
0x1518   : > { %p4596_p9 = scmp.lt.u32.totalorder %s4594_s16, %s4590_s27  ;;  %p4598_p12 = scmp.lt.u32.totalorder %s4590_s27, %s5739_s24 }
0x1519   : > { %p4592_p0 = pnand %p4591_p13, %p5956_p1 }
0x151a   : > { %p4597_p10 = por %p4596_p9, %p4595_p6 }
0x151b   : > { %p4593_p5 = pneg %p4592_p0 }
0x151c   : > { %p4599_p2 = por %p4598_p12, %p4597_p10 }
0x151e   : > { %p4600_p3 = pnand %p4599_p2, %p4593_p5 }
0x1520   : > { %4603 = shalt.err (!%p4600_p3)
}
0x1521   : > { %s4727_s2 = smov 128   ;;  %s4728_s0 = smov 8  }
0x1522   : > { %4149 = dma.vmem_to_hbm [thread:$0]  (%p5956_p1), %s5741_s25, 2048, %s5739_s24, %s5743_s29, %s4727_s2, %s4727_s2, %s4728_s0  }
0x1523   : > { %s5957_s23 = sshll.u32 %s4852_s1, 11  ;;  %s5958_s15 = sld [smem:[#allocation31_spill]] }
0x1524   : > { %s3519_s26 = sshll.u32 %s5644_s20, 4  ;;  %s4729_s5 = smov [#allocation10]   ;;  %s5778_s26 = int_to_ptr.vmem [resolvable:$true] %s3519_s26 }
0x1525   : > { %s4604_s4 = scalar_lea.vmem %s5778_s26, 2048  ;;  %s4608_s6 = sshll.u32 %s4729_s5, 4  ;;  %s4609_s6 = int_to_ptr.vmem [resolvable:$false] %s4608_s6 }
0x1526   : > { %p4605_p4 = scmp.ne.s32.totalorder %s5778_s26, %s4604_s4  ;;  %s4610_s25 = scalar_lea.vmem %s4609_s6, 4096 }
0x1527   : > { %p4611_p11 = scmp.lt.s32.totalorder %s5778_s26, %s4609_s6  ;;  %p4612_p13 = scmp.lt.s32.totalorder %s4610_s25, %s4604_s4 }
0x1528   : > { %p4606_p7 = pnand %p4605_p4, %p5956_p1 }
0x1529   : > { %s5775_s16 = scalar_lea.hbm %s5958_s15, %s5957_s23  ;;  %p4613_p0 = por %p4612_p13, %p4611_p11 }
0x152a   : > { %p4607_p8 = pneg %p4606_p7 }
0x152c   : > { %p4614_p5 = pnand %p4613_p0, %p4607_p8 }
0x152e   : > { %4617 = shalt.err (!%p4614_p5)
}
0x152f   : > { %s4618_s20 = scalar_lea.hbm %s5775_s16, 2048  ;;  %s4622_s5 = scalar_lea.hbm %s5958_s15, 4096 }
0x1530   : > { %p4619_p6 = scmp.ne.s32.totalorder %s5775_s16, %s4618_s20  ;;  %p4623_p12 = scmp.lt.u32.totalorder %s5775_s16, %s5958_s15 }
0x1531   : > { %p4624_p2 = scmp.lt.u32.totalorder %s4622_s5, %s4618_s20  ;;  %p4626_p4 = scmp.lt.u32.totalorder %s4618_s20, %s5775_s16 }
0x1532   : > { %p4620_p9 = pnand %p4619_p6, %p5956_p1 }
0x1533   : > { %p4625_p3 = por %p4624_p2, %p4623_p12 }
0x1534   : > { %p4621_p10 = pneg %p4620_p9 }
0x1535   : > { %p4627_p7 = por %p4626_p4, %p4625_p3 }
0x1537   : > { %p4628_p8 = pnand %p4627_p7, %p4621_p10 }
0x1539   : > { %4631 = shalt.err (!%p4628_p8)
}
0x153a   : > { %4150 = dma.vmem_to_hbm [thread:$0]  (%p5956_p1), %s5778_s26, 2048, %s5775_s16, %s5743_s29, %s4727_s2, %s4727_s2, %s4728_s0  }
0x153b   : > { %s5959_s27 = sld [smem:[#allocation28_spill]]  ;;  %s3700_s16 = sshll.u32 %s5071_s21, 4 }
0x153c   : > { %s5960_s20 = sld [smem:[#allocation29_spill]]  ;;  %s629_s24 = scalar_lea.vmem [#allocation7], %s3700_s16 }
0x153d   : > { %s3487_s23 = sshll.u32 %s629_s24, 4  ;;  %s5961_s6 = sld [smem:[#allocation30_spill]]  ;;  %s5831_s23 = int_to_ptr.vmem [resolvable:$true] %s3487_s23 }
0x153e   : > { %s3459_s29 = scalar_lea.sflag [#allocation4], %s5071_s21 }
0x1541   : > { %v3852_v16 = vld [vmem:[%s5959_s27] ss:$0 sm:$0xff]  ;;  %s4730_s27 = smov [#allocation7]  }
0x1542   : > { %v3853_v45 = vld [vmem:[%s5960_s20] ss:$0 sm:$0xff]  ;;  %s4636_s16 = sshll.u32 %s4730_s27, 4  ;;  %s4637_s16 = int_to_ptr.vmem [resolvable:$false] %s4636_s16 }
0x1543   : > { %s4638_s26 = scalar_lea.vmem %s4637_s16, 512  ;;  %p4639_p5 = scmp.lt.s32.totalorder %s5831_s23, %s4637_s16 }
0x157b   : > { %v3431_v1 = vpop.xlane.xlu0 %3430 }
0x157c   : > { %v3433_v7 = vmul.f32 0.03125, %v3431_v1 }
0x157e   : > { %v3435_v15 = vadd.f32 1e-05, %v3433_v7  ;;  %v3428_v22 = vpop.xlane.xlu1 %3427 }
0x157f   : > { %v3432_v29 = vmul.f32 0.03125, %v3428_v22  ;;  %v2238_v0 = vpop.permute.xlu0 %2237 }
0x1580   : > { %4516 = vrsqrt.f32 %v3435_v15  ;;  %3785 = vst.msk [vmem:[%s5461_s14 + $0x58] sm:$0xff] %vm887_vm6, %v2238_v0 }
0x1581   : > { %v3434_v62 = vadd.f32 1e-05, %v3432_v29 }
0x1582   : > { %v2240_v13 = vpop.permute.xlu1 %2239 }
0x1583   : > { %4518 = vrsqrt.f32 %v3434_v62  ;;  %3786 = vst.msk [vmem:[%s5461_s14 + $0x60] sm:$0xff] %vm887_vm6, %v2240_v13  ;;  %v2242_v31 = vpop.permute.xlu0 %2241 }
0x1584   : > { %3787 = vst.msk [vmem:[%s5461_s14 + $0x68] sm:$0xff] %vm887_vm6, %v2242_v31 }
0x1586   : > { %v2244_v63 = vpop.permute.xlu1 %2243 }
0x1587   : > { %3788 = vst.msk [vmem:[%s5461_s14 + $0x70] sm:$0xff] %vm887_vm6, %v2244_v63  ;;  %v2246_v30 = vpop.permute.xlu0 %2245 }
0x1588   : > { %3789 = vst.msk [vmem:[%s5461_s14 + $0x78] sm:$0xff] %vm887_vm6, %v2246_v30  ;;  %s3867_s14 = sshll.u32 %s4852_s1, 8  ;;  %s4632_s1 = scalar_lea.vmem %s5831_s23, 256 }
0x1589   : > { %s5829_s4 = scalar_lea.hbm %s5961_s6, %s3867_s14  ;;  %p4633_p11 = scmp.ne.s32.totalorder %s5831_s23, %s4632_s1 }
0x158a   : > { %v4517_v33 = vpop.eup %4516  ;;  %p4640_p6 = scmp.lt.s32.totalorder %s4638_s26, %s4632_s1 }
0x158b   : > { %v3439_v35 = vmul.f32 %v4517_v33, %v5680_v57  ;;  %p4634_p13 = pnand %p4633_p11, %p5956_p1 }
0x158c   : > { %p4641_p9 = por %p4640_p6, %p4639_p5 }
0x158d   : > { %v4519_v54 = vpop.eup %4518  ;;  %v3447_v46 = vmul.f32 %v3852_v16, %v3439_v35  ;;  %p4635_p0 = pneg %p4634_p13 }
0x158e   : > { %v3438_v50 = vmul.f32 %v4519_v54, %v5687_v38 }
0x158f   : > { %v3455_v60 = vadd.f32 %v3853_v45, %v3447_v46  ;;  %p4642_p10 = pnand %p4641_p9, %p4635_p0 }
0x1590   : > { %v3446_v11 = vmul.f32 %v3852_v16, %v3438_v50 }
0x1591   : > { %3457 = vst.msk [vmem:[%s629_s24 + $0x8] sm:$0xff] %vm694_vm1, %v3455_v60 }
0x1592   : > { %v3454_v47 = vadd.f32 %v3853_v45, %v3446_v11 }
0x1594   : > { %3456 = vst.msk [vmem:[%s629_s24] sm:$0xff] %vm694_vm1, %v3454_v47 }
0x1595   : > { %4645 = shalt.err (!%p4642_p10)
}
0x1596   : > { %s4646_s25 = scalar_lea.hbm %s5829_s4, 256  ;;  %s4650_s24 = scalar_lea.hbm %s5961_s6, 512 }
0x1597   : > { %p4647_p12 = scmp.ne.s32.totalorder %s5829_s4, %s4646_s25  ;;  %p4651_p4 = scmp.lt.u32.totalorder %s5829_s4, %s5961_s6 }
0x1598   : > { %p4652_p7 = scmp.lt.u32.totalorder %s4650_s24, %s4646_s25  ;;  %p4654_p11 = scmp.lt.u32.totalorder %s4646_s25, %s5829_s4 }
0x1599   : > { %p4648_p2 = pnand %p4647_p12, %p5956_p1 }
0x159a   : > { %p4653_p8 = por %p4652_p7, %p4651_p4 }
0x159b   : > { %p4649_p3 = pneg %p4648_p2 }
0x159c   : > { %p4655_p13 = por %p4654_p11, %p4653_p8 }
0x159e   : > { %p4656_p0 = pnand %p4655_p13, %p4649_p3 }
0x15a0   : > { %4659 = shalt.err (!%p4656_p0)
}
0x15a1   : > { %4148 = dma.vmem_to_hbm [thread:$0]  (%p5956_p1), %s5831_s23, 256, %s5829_s4, %s3459_s29, %s4727_s2, %s4727_s2, %s4728_s0  }
0x15a2 PF: > { %s5962_s1 = sld [smem:[#allocation17_spill]]  ;;  %s5963_s27 = sld [smem:[#allocation15_spill]] }
0x15a3   : > { %s5964_s16 = sld [smem:[#allocation20_spill]] }
0x15a8   : > { %p4175_p5 = scmp.ge.s32.totalorder %s5962_s1, 2  ;;  %s3537_s26 = sand.u32 1, %s5963_s27  }
0x15a9   : > { %p5965_p6 = scmp.ne.s32.totalorder %s5964_s16, 0  ;;  %s3538_s25 = scalar_lea.sflag [#allocation4], %s3537_s26 }
0x15ab   : > { %p4162_p9 = pnand %p4175_p5, %p5965_p6 }
0x15ad   : > { %4685 = dma.done.wait (!%p4162_p9), %s3538_s25, 256  }
0x15ae   : > { %4687 = vsyncadd (!%p4162_p9), %s3538_s25, 4294967040  ;;  %s5966_s3 = sadd.s32 4294967294, %s5962_s1  }
0x15af   : > { %s3546_s20 = sand.u32 1, %s5966_s3  }
0x15b0   : > { %s3547_s14 = scalar_lea.sflag [#allocation9], %s3546_s20 }
0x15b1   : > { %4689 = dma.done.wait (!%p4162_p9), %s3547_s14, 4096  }
0x15b2   : > { %4691 = vsyncadd (!%p4162_p9), %s3547_s14, 4294963200  ;;  %s5967_s21 = sld [smem:[#allocation18_spill]]  ;;  %s5968_s2 = sld [smem:[#allocation16_spill]] }
0x15b3   : > { %s5969_s20 = sld [smem:[#allocation19_spill]]  ;;  %s5970_s0 = smov %s4698_s30 }
0x15b8   : > { %p35_p1 = scmp.ge.s32.totalorder %s5967_s21, 4   ;;  %s5971_s30 = smov %s5968_s2 }
0x15ba   :  { %37 = sbr.rel (!%p35_p1) target bundleno = 19 (0x13), region = 193 }
0x15c1   :  { %3569 = vsyncpa [#allocation3], 1 }
0x15c2   :  { %3571 = vsyncpa [#allocation3 + $0x1], 1 }
0x15c3   :  { %3572 = vsyncpa [#allocation6], 1 }
0x15c4   :  { %3573 = vsyncpa [#allocation4], 1 }
0x15c5   :  { %3575 = vsyncpa [#allocation4 + $0x1], 1 }
0x15c6   :  { %3576 = vsyncpa [#allocation9], 1 }
0x15c7   :  { %3578 = vsyncpa [#allocation9 + $0x1], 1 }

</bundles_post_ra>
